<compile_context>
chip_gen: v5e
topology: v5e:2x2
jax: 0.10.0
libtpu: 0.0.40
codegen_flags: <defaults>
</compile_context>

<pallas_src>
import math
from functools import partial

import jax
import jax.numpy as jnp
from jax import lax
from jax.experimental import pallas as pl
from jax.experimental.pallas import tpu as pltpu

LN_EPS = 1e-6
VMEM_LIMIT = 32 * 1024 * 1024  # explicit scoped-VMEM limit, safe on v5e/v6e/v7x


# --------------------------------------------------------------------------- #
# Shared in-kernel LayerNorm helper
# (torch LayerNormalization semantics: mean, *unbiased* std, alpha*(x-m)/(std+eps)+b)
# --------------------------------------------------------------------------- #
def _layernorm_f32(x_f32, alpha_f32, beta_f32):
    d = x_f32.shape[-1]
    mean = jnp.mean(x_f32, axis=-1, keepdims=True)
    diff = x_f32 - mean
    var = jnp.sum(diff * diff, axis=-1, keepdims=True) * (1.0 / (d - 1))
    inv = pl.reciprocal(jnp.sqrt(var) + LN_EPS, approx=True)
    return alpha_f32 * diff * inv + beta_f32


# --------------------------------------------------------------------------- #
# Kernel 1: fused LN1 + QKV projection (one (d, 3d) matmul, three outputs)
# --------------------------------------------------------------------------- #
def _ln_qkv_kernel(x_ref, alpha_ref, beta_ref, wqkv_ref, q_ref, k_ref, v_ref):
    d = q_ref.shape[-1]
    x = x_ref[...].astype(jnp.float32)
    h = _layernorm_f32(x,
                       alpha_ref[...].astype(jnp.float32),
                       beta_ref[...].astype(jnp.float32))
    qkv = jnp.dot(h.astype(x_ref.dtype), wqkv_ref[...],
                  preferred_element_type=jnp.float32)          # (tm, 3d)
    q_ref[...] = qkv[:, :d].astype(q_ref.dtype)                # 128-aligned slices
    k_ref[...] = qkv[:, d:2 * d].astype(k_ref.dtype)
    v_ref[...] = qkv[:, 2 * d:].astype(v_ref.dtype)


def ln_qkv_projection(x2d, alpha, beta, wqkv, *, tm):
    M, d = x2d.shape
    row = pl.BlockSpec((tm, d), lambda i: (i, 0))
    out_sds = jax.ShapeDtypeStruct((M, d), x2d.dtype)
    return pl.pallas_call(
        _ln_qkv_kernel,
        out_shape=(out_sds, out_sds, out_sds),
        grid_spec=pltpu.PrefetchScalarGridSpec(
            num_scalar_prefetch=0,
            grid=(M // tm,),
            in_specs=[
                row,
                pl.BlockSpec((1, d), lambda i: (0, 0)),
                pl.BlockSpec((1, d), lambda i: (0, 0)),
                pl.BlockSpec((d, 3 * d), lambda i: (0, 0)),
            ],
            out_specs=(row, row, row),
        ),
        compiler_params=pltpu.CompilerParams(
            dimension_semantics=("parallel",),
            vmem_limit_bytes=VMEM_LIMIT),
    )(x2d, alpha.reshape(1, d), beta.reshape(1, d), wqkv)


# --------------------------------------------------------------------------- #
# Kernel 2: per-batch attention (all heads) + output projection + residual
# --------------------------------------------------------------------------- #
def _attention_kernel(bias_ref, q_ref, k_ref, v_ref, res_ref, wo_ref, o_ref,
                      *, head_count):
    d = q_ref.shape[-1]
    dk = d // head_count
    scale = 1.0 / math.sqrt(dk)

    bias = bias_ref[...].astype(jnp.float32)   # (1, S) additive key-mask bias
    q = q_ref[...]                             # (S, d_model), native dtype
    k = k_ref[...]
    v = v_ref[...]
    wo = wo_ref[...]

    y = res_ref[...].astype(jnp.float32)       # residual rows, f32 accumulator
    for h in range(head_count):                # small static head loop
        lo, hi = h * dk, (h + 1) * dk
        qh, kh, vh = q[:, lo:hi], k[:, lo:hi], v[:, lo:hi]
        # scores = Qh @ Kh^T / sqrt(dk) + mask_bias
        s = lax.dot_general(qh, kh, (((1,), (1,)), ((), ())),
                            preferred_element_type=jnp.float32)
        s = s * scale + bias
        s = s - jnp.max(s, axis=-1, keepdims=True)
        p = jnp.exp(s)
        p = p * pl.reciprocal(jnp.sum(p, axis=-1, keepdims=True), approx=True)
        oh = jnp.dot(p.astype(vh.dtype), vh, preferred_element_type=jnp.float32)
        # fused output projection: accumulate oh @ Wo[h*dk:(h+1)*dk, :]
        y += jnp.dot(oh.astype(wo.dtype), wo[lo:hi, :],
                     preferred_element_type=jnp.float32)
    o_ref[...] = y.astype(o_ref.dtype)          # lane-dense (S, d_model) store


def attention_block(q3, k3, v3, bias3, x3, wo, *, head_count):
    B, S, d = q3.shape
    blk = pl.BlockSpec((None, S, d), lambda b: (b, 0, 0))
    return pl.pallas_call(
        partial(_attention_kernel, head_count=head_count),
        out_shape=jax.ShapeDtypeStruct((B, S, d), x3.dtype),
        grid_spec=pltpu.PrefetchScalarGridSpec(
            num_scalar_prefetch=0,
            grid=(B,),
            in_specs=[
                pl.BlockSpec((None, 1, S), lambda b: (b, 0, 0)),  # mask bias
                blk, blk, blk,                                     # q, k, v
                blk,                                               # residual x
                pl.BlockSpec((d, d), lambda b: (0, 0)),            # Wo (resident)
            ],
            out_specs=blk,
        ),
        compiler_params=pltpu.CompilerParams(
            dimension_semantics=("parallel",),
            vmem_limit_bytes=VMEM_LIMIT),
    )(bias3, q3, k3, v3, x3, wo)


# --------------------------------------------------------------------------- #
# Kernel 3: fused LN2 + FFN + residual, dff streamed on an "arbitrary" axis
# --------------------------------------------------------------------------- #
def _ln_ffn_kernel(x_ref, alpha_ref, beta_ref, w1_ref, b1_ref, w2_ref, b2_ref,
                   o_ref, h_ref, acc_ref):
    kk = pl.program_id(1)

    @pl.when(kk == 0)
    def _():
        x = x_ref[...].astype(jnp.float32)
        hn = _layernorm_f32(x,
                            alpha_ref[...].astype(jnp.float32),
                            beta_ref[...].astype(jnp.float32))
        h_ref[...] = hn.astype(h_ref.dtype)     # LN2(x1), reused for all chunks
        acc_ref[...] = jnp.zeros_like(acc_ref)

    # first linear on this dff chunk + relu  (dropout = identity in eval mode)
    hid = jnp.dot(h_ref[...], w1_ref[...], preferred_element_type=jnp.float32)
    hid = jnp.maximum(hid + b1_ref[...].astype(jnp.float32), 0.0)
    # partial second linear, accumulated in f32
    acc_ref[...] += jnp.dot(hid.astype(w2_ref.dtype), w2_ref[...],
                            preferred_element_type=jnp.float32)

    @pl.when(kk == pl.num_programs(1) - 1)
    def _():
        y = acc_ref[...] + b2_ref[...].astype(jnp.float32) \
            + x_ref[...].astype(jnp.float32)     # residual add, exactly once
        o_ref[...] = y.astype(o_ref.dtype)


def ln_ffn_residual(x2d, alpha, beta, w1, b1, w2, b2, *, tm, tk):
    M, d = x2d.shape
    dff = w1.shape[1]
    assert dff % tk == 0, "dff must divide the dff tile"
    row = pl.BlockSpec((tm, d), lambda i, k: (i, 0))
    return pl.pallas_call(
        _ln_ffn_kernel,
        out_shape=jax.ShapeDtypeStruct((M, d), x2d.dtype),
        grid_spec=pltpu.PrefetchScalarGridSpec(
            num_scalar_prefetch=0,
            grid=(M // tm, dff // tk),
            in_specs=[
                row,                                                # x1 rows
                pl.BlockSpec((1, d), lambda i, k: (0, 0)),          # ln2 alpha
                pl.BlockSpec((1, d), lambda i, k: (0, 0)),          # ln2 beta
                pl.BlockSpec((d, tk), lambda i, k: (0, k)),         # W1 chunk
                pl.BlockSpec((1, tk), lambda i, k: (0, k)),         # b1 chunk
                pl.BlockSpec((tk, d), lambda i, k: (k, 0)),         # W2 chunk
                pl.BlockSpec((1, d), lambda i, k: (0, 0)),          # b2 (resident)
            ],
            out_specs=row,
            scratch_shapes=[pltpu.VMEM((tm, d), x2d.dtype),         # LN2 rows
                            pltpu.VMEM((tm, d), jnp.float32)],      # f32 acc
        ),
        compiler_params=pltpu.CompilerParams(
            dimension_semantics=("parallel", "arbitrary"),
            vmem_limit_bytes=VMEM_LIMIT),
    )(x2d, alpha.reshape(1, d), beta.reshape(1, d),
      w1, b1.reshape(1, dff), w2, b2.reshape(1, d))


# --------------------------------------------------------------------------- #
# Full encoder block
# --------------------------------------------------------------------------- #
def encoder_block(x, source_mask, params, *, head_count, tm=512, tk=512):
    batch, seq, d_model = x.shape
    assert d_model % head_count == 0
    M = batch * seq
    tm = min(tm, M)
    assert M % tm == 0, "batch*seq must divide the row tile"

    x2d = x.reshape(M, d_model)

    # ---- sublayer 1: x + Wo @ MHA(LN1(x), mask) ----
    q2d, k2d, v2d = ln_qkv_projection(
        x2d, params["ln1_alpha"], params["ln1_bias"], params["wqkv"], tm=tm)

    # additive key-mask bias: 0 for kept keys, -1e9 for masked keys
    bias3 = ((source_mask.astype(jnp.float32) - 1.0) * 1e9).reshape(batch, 1, seq)

    x1 = attention_block(
        q2d.reshape(batch, seq, d_model),     # free reshapes, no transposes
        k2d.reshape(batch, seq, d_model),
        v2d.reshape(batch, seq, d_model),
        bias3, x, params["wo"], head_count=head_count)

    # ---- sublayer 2: x1 + FFN(LN2(x1)) ----
    dff = params["w1"].shape[1]
    tk = min(tk, dff)
    out2d = ln_ffn_residual(
        x1.reshape(M, d_model), params["ln2_alpha"], params["ln2_bias"],
        params["w1"], params["b1"], params["w2"], params["b2"], tm=tm, tk=tk)
    return out2d.reshape(batch, seq, d_model)


# --------------------------------------------------------------------------- #
# Parameter init (mirrors nn.Linear U(-1/sqrt(fan_in), 1/sqrt(fan_in)); LN: 1/0)
# --------------------------------------------------------------------------- #
def init_params(key, d_model, dff, dtype=jnp.float32):
    ks = jax.random.split(key, 8)
    b_in = 1.0 / math.sqrt(d_model)
    b_ff = 1.0 / math.sqrt(dff)

    def u(k, shape, b):
        return jax.random.uniform(k, shape, dtype, -b, b)

    wq = u(ks[0], (d_model, d_model), b_in)
    wk = u(ks[1], (d_model, d_model), b_in)
    wv = u(ks[2], (d_model, d_model), b_in)
    return dict(
        ln1_alpha=jnp.ones((d_model,), dtype), ln1_bias=jnp.zeros((d_model,), dtype),
        ln2_alpha=jnp.ones((d_model,), dtype), ln2_bias=jnp.zeros((d_model,), dtype),
        wqkv=jnp.concatenate([wq, wk, wv], axis=1),          # (d, 3d) fused weight
        wo=u(ks[3], (d_model, d_model), b_in),
        w1=u(ks[4], (d_model, dff), b_in), b1=u(ks[5], (dff,), b_in),
        w2=u(ks[6], (dff, d_model), b_ff), b2=u(ks[7], (d_model,), b_ff),
    )


# --------------------------------------------------------------------------- #
# Plain-JAX reference (eval-mode semantics of the PyTorch EncoderBlock)
# --------------------------------------------------------------------------- #
def _layernorm_ref(x, alpha, bias):
    mean = x.mean(axis=-1, keepdims=True)
    var = jnp.sum((x - mean) ** 2, axis=-1, keepdims=True) / (x.shape[-1] - 1)
    std = jnp.sqrt(var)
    return alpha * (x - mean) / (std + LN_EPS) + bias


def encoder_block_ref(x, source_mask, params, *, head_count):
    P = jax.lax.Precision.HIGHEST
    batch, seq, d_model = x.shape
    d_k = d_model // head_count
    wq = params["wqkv"][:, :d_model]
    wk = params["wqkv"][:, d_model:2 * d_model]
    wv = params["wqkv"][:, 2 * d_model:]

    h = _layernorm_ref(x, params["ln1_alpha"], params["ln1_bias"])
    q = jnp.dot(h, wq, precision=P)
    k = jnp.dot(h, wk, precision=P)
    v = jnp.dot(h, wv, precision=P)

    def to_heads(t):
        return t.reshape(batch, seq, head_count, d_k).transpose(0, 2, 1, 3)

    q, k, v = to_heads(q), to_heads(k), to_heads(v)
    s = jnp.einsum("bhqd,bhkd->bhqk", q, k, precision=P) / math.sqrt(d_k)
    s = jnp.where(source_mask[:, None, None, :] == 0.0, -1e9, s)
    p = jax.nn.softmax(s, axis=-1)
    o = jnp.einsum("bhqk,bhkd->bhqd", p, v, precision=P)
    o = o.transpose(0, 2, 1, 3).reshape(batch, seq, d_model)
    x = x + jnp.dot(o, params["wo"], precision=P)

    h = _layernorm_ref(x, params["ln2_alpha"], params["ln2_bias"])
    hid = jnp.maximum(jnp.dot(h, params["w1"], precision=P) + params["b1"], 0.0)
    f = jnp.dot(hid, params["w2"], precision=P) + params["b2"]
    return x + f


if __name__ == "__main__":
    batch, seq, d_model, dff, head_count = 2, 256, 128, 1024, 4

    key = jax.random.PRNGKey(0)
    kx, kp = jax.random.split(key)
    x = jax.random.normal(kx, (batch, seq, d_model), dtype=jnp.float32)
    params = init_params(kp, d_model, dff)

    # encoder source mask over key positions: mask out the last 32 keys of batch 1
    source_mask = jnp.ones((batch, seq), dtype=jnp.float32)
    source_mask = source_mask.at[1, seq - 32:].set(0.0)

    out = encoder_block(x, source_mask, params, head_count=head_count)
    out = jax.block_until_ready(out)

    ref = encoder_block_ref(x, source_mask, params, head_count=head_count)

    assert out.shape == (batch, seq, d_model)
    assert not bool(jnp.any(jnp.isnan(out)))
    max_err = float(jnp.max(jnp.abs(out - ref)))
    assert jnp.allclose(out, ref, atol=2e-2, rtol=2e-2), f"max abs err {max_err}"

    print("KERNEL_OK")
</pallas_src>

<mosaic_0001>
module attributes {stable_mosaic.version = 11 : i64} {
  func.func @_ln_qkv_kernel(%arg0: i32, %arg1: memref<512x128xf32, #tpu.memory_space<vmem>>, %arg2: memref<1x128xf32, #tpu.memory_space<vmem>>, %arg3: memref<1x128xf32, #tpu.memory_space<vmem>>, %arg4: memref<128x384xf32, #tpu.memory_space<vmem>>, %arg5: memref<512x128xf32, #tpu.memory_space<vmem>>, %arg6: memref<512x128xf32, #tpu.memory_space<vmem>>, %arg7: memref<512x128xf32, #tpu.memory_space<vmem>>) attributes {dimension_semantics = [#tpu.dimension_semantics<parallel>], iteration_bounds = array<i64: 1>, scalar_prefetch = 0 : i64, scratch_operands = 0 : i64, tpu.core_type = #tpu.core_type<tc>, window_params = [{transform_indices = @transform_0, window_bounds = array<i64: 512, 128>}, {pipeline_mode = #tpu.pipeline_mode<synchronous>, transform_indices = @transform_1, window_bounds = array<i64: 1, 128>}, {pipeline_mode = #tpu.pipeline_mode<synchronous>, transform_indices = @transform_2, window_bounds = array<i64: 1, 128>}, {pipeline_mode = #tpu.pipeline_mode<synchronous>, transform_indices = @transform_3, window_bounds = array<i64: 128, 384>}, {transform_indices = @transform_4, window_bounds = array<i64: 512, 128>}, {transform_indices = @transform_5, window_bounds = array<i64: 512, 128>}, {transform_indices = @transform_6, window_bounds = array<i64: 512, 128>}]} {
    %c0 = arith.constant 0 : index
    %c0_0 = arith.constant 0 : index
    %0 = vector.load %arg1[%c0, %c0_0] : memref<512x128xf32, #tpu.memory_space<vmem>>, vector<512x128xf32>
    %c0_1 = arith.constant 0 : index
    %c0_2 = arith.constant 0 : index
    %1 = vector.load %arg2[%c0_1, %c0_2] : memref<1x128xf32, #tpu.memory_space<vmem>>, vector<1x128xf32>
    %c0_3 = arith.constant 0 : index
    %c0_4 = arith.constant 0 : index
    %2 = vector.load %arg3[%c0_3, %c0_4] : memref<1x128xf32, #tpu.memory_space<vmem>>, vector<1x128xf32>
    %cst = arith.constant dense<0.000000e+00> : vector<512xf32>
    %3 = vector.multi_reduction <add>, %0, %cst [1] : vector<512x128xf32> to vector<512xf32>
    %4 = vector.shape_cast %3 : vector<512xf32> to vector<512x1xf32>
    %cst_5 = arith.constant 1.280000e+02 : f32
    %5 = vector.broadcast %cst_5 : f32 to vector<512x1xf32>
    %6 = arith.divf %4, %5 : vector<512x1xf32>
    %7 = vector.broadcast %6 : vector<512x1xf32> to vector<512x128xf32>
    %8 = arith.subf %0, %7 : vector<512x128xf32>
    %9 = arith.mulf %8, %8 : vector<512x128xf32>
    %cst_6 = arith.constant dense<0.000000e+00> : vector<512xf32>
    %10 = vector.multi_reduction <add>, %9, %cst_6 [1] : vector<512x128xf32> to vector<512xf32>
    %11 = vector.shape_cast %10 : vector<512xf32> to vector<512x1xf32>
    %cst_7 = arith.constant 0.00787401571 : f32
    %12 = vector.broadcast %cst_7 : f32 to vector<512x1xf32>
    %13 = arith.mulf %11, %12 : vector<512x1xf32>
    %14 = math.sqrt %13 : vector<512x1xf32>
    %cst_8 = arith.constant 9.99999997E-7 : f32
    %15 = vector.broadcast %cst_8 : f32 to vector<512x1xf32>
    %16 = arith.addf %14, %15 : vector<512x1xf32>
    %17 = tpu.reciprocal %16 {approx = true} : vector<512x1xf32> -> vector<512x1xf32>
    %18 = vector.broadcast %1 : vector<1x128xf32> to vector<512x128xf32>
    %19 = arith.mulf %18, %8 : vector<512x128xf32>
    %20 = vector.broadcast %17 : vector<512x1xf32> to vector<512x128xf32>
    %21 = arith.mulf %19, %20 : vector<512x128xf32>
    %22 = vector.broadcast %2 : vector<1x128xf32> to vector<512x128xf32>
    %23 = arith.addf %21, %22 : vector<512x128xf32>
    %c0_9 = arith.constant 0 : index
    %c0_10 = arith.constant 0 : index
    %24 = vector.load %arg4[%c0_9, %c0_10] : memref<128x384xf32, #tpu.memory_space<vmem>>, vector<128x384xf32>
    %cst_11 = arith.constant dense<0.000000e+00> : vector<512x384xf32>
    %25 = tpu.matmul %23, %24, %cst_11 {dimension_numbers = #tpu.dot_dimension_numbers<[1], [0], [0], [1], [0, 0, 1, 1], [], []>} : vector<512x128xf32>, vector<128x384xf32>, vector<512x384xf32> -> vector<512x384xf32>
    %26 = vector.extract_strided_slice %25 {offsets = [0, 0], sizes = [512, 128], strides = [1, 1]} : vector<512x384xf32> to vector<512x128xf32>
    %c0_12 = arith.constant 0 : index
    %c0_13 = arith.constant 0 : index
    %27 = vector.load %arg5[%c0_12, %c0_13] : memref<512x128xf32, #tpu.memory_space<vmem>>, vector<512x128xf32>
    tpu.vector_store %arg5[%c0_12, %c0_13], %26 {strides = array<i32>} : memref<512x128xf32, #tpu.memory_space<vmem>>, vector<512x128xf32>,
    %28 = vector.extract_strided_slice %25 {offsets = [0, 128], sizes = [512, 128], strides = [1, 1]} : vector<512x384xf32> to vector<512x128xf32>
    %c0_14 = arith.constant 0 : index
    %c0_15 = arith.constant 0 : index
    %29 = vector.load %arg6[%c0_14, %c0_15] : memref<512x128xf32, #tpu.memory_space<vmem>>, vector<512x128xf32>
    tpu.vector_store %arg6[%c0_14, %c0_15], %28 {strides = array<i32>} : memref<512x128xf32, #tpu.memory_space<vmem>>, vector<512x128xf32>,
    %30 = vector.extract_strided_slice %25 {offsets = [0, 256], sizes = [512, 128], strides = [1, 1]} : vector<512x384xf32> to vector<512x128xf32>
    %c0_16 = arith.constant 0 : index
    %c0_17 = arith.constant 0 : index
    %31 = vector.load %arg7[%c0_16, %c0_17] : memref<512x128xf32, #tpu.memory_space<vmem>>, vector<512x128xf32>
    tpu.vector_store %arg7[%c0_16, %c0_17], %30 {strides = array<i32>} : memref<512x128xf32, #tpu.memory_space<vmem>>, vector<512x128xf32>,
    return
  }
  func.func @transform_0(%arg0: i32) -> (i32, i32) {
    %c0_i32 = arith.constant 0 : i32
    %c0_i32_0 = arith.constant 0 : i32
    return %arg0, %c0_i32 : i32, i32
  }
  func.func @transform_1(%arg0: i32) -> (i32, i32) {
    %c0_i32 = arith.constant 0 : i32
    %c0_i32_0 = arith.constant 0 : i32
    %c0_i32_1 = arith.constant 0 : i32
    return %c0_i32, %c0_i32_0 : i32, i32
  }
  func.func @transform_2(%arg0: i32) -> (i32, i32) {
    %c0_i32 = arith.constant 0 : i32
    %c0_i32_0 = arith.constant 0 : i32
    %c0_i32_1 = arith.constant 0 : i32
    return %c0_i32, %c0_i32_0 : i32, i32
  }
  func.func @transform_3(%arg0: i32) -> (i32, i32) {
    %c0_i32 = arith.constant 0 : i32
    %c0_i32_0 = arith.constant 0 : i32
    %c0_i32_1 = arith.constant 0 : i32
    return %c0_i32, %c0_i32_0 : i32, i32
  }
  func.func @transform_4(%arg0: i32) -> (i32, i32) {
    %c0_i32 = arith.constant 0 : i32
    %c0_i32_0 = arith.constant 0 : i32
    return %arg0, %c0_i32 : i32, i32
  }
  func.func @transform_5(%arg0: i32) -> (i32, i32) {
    %c0_i32 = arith.constant 0 : i32
    %c0_i32_0 = arith.constant 0 : i32
    return %arg0, %c0_i32 : i32, i32
  }
  func.func @transform_6(%arg0: i32) -> (i32, i32) {
    %c0_i32 = arith.constant 0 : i32
    %c0_i32_0 = arith.constant 0 : i32
    return %arg0, %c0_i32 : i32, i32
  }
}

</mosaic_0001>

<bundles_post_ra>
// kernel: tpu_custom_call.1
= control target key start
LH: loop header
LB: loop body
LE: loop exit
PB: predicated region body
PF: predicated region fallthrough
CT: control target
= control target key end

     0   :  { %12 = vsyncpa [#allocation3], 0  ;;  %s4859_s0 = inlined_call_operand.hbm [shape: f32[512,128], index: 0, kind: input, shape index: {}]   ;;  %s4860_s1 = inlined_call_operand.hbm [shape: f32[1,128], index: 1, kind: input, shape index: {}]   ;;  %s4861_s2 = inlined_call_operand.vmem [shape: f32[1,128], index: 2, kind: input, shape index: {}]   ;;  %s4862_s3 = inlined_call_operand.hbm [shape: f32[128,384], index: 3, kind: input, shape index: {}]   ;;  %s4863_s4 = inlined_call_operand.hbm [shape: f32[512,128], index: 4, kind: output, shape index: {0}]   ;;  %s4864_s5 = inlined_call_operand.hbm [shape: f32[512,128], index: 5, kind: output, shape index: {1}]   ;;  %s4865_s6 = inlined_call_operand.hbm [shape: f32[512,128], index: 6, kind: output, shape index: {2}]  }
   0x1   :  { %13 = vsyncpa [#allocation6], 0 }
   0x2   :  { %14 = vsyncpa [#allocation4], 0  ;;  %s34_s23 = sshll.u32 %s4860_s1, 4  ;;  %s35_s23 = int_to_ptr.hbm [resolvable:$true] %s34_s23 }
   0x3   :  { %15 = vsyncpa [#allocation10], 0  ;;  %s3154_s24 = smov [#allocation5]   ;;  %s20_s28 = sshll.u32 %s4859_s0, 4  ;;  %s21_s28 = int_to_ptr.hbm [resolvable:$true] %s20_s28 }
   0x4   :  { %s36_s25 = sshll.u32 %s3154_s24, 4  ;;  %s3155_s29 = smov [#allocation2]   ;;  %s37_s25 = int_to_ptr.vmem [resolvable:$true] %s36_s25 }
   0x5   :  { %39 = dma.hbm_to_vmem [thread:$0]  %s35_s23, 16, %s37_s25, [#allocation6]  }
   0x6   :  { %s22_s30 = sshll.u32 %s3155_s29, 4  ;;  %s3156_s7 = smov 128   ;;  %s23_s30 = int_to_ptr.vmem [resolvable:$true] %s22_s30 }
   0x7   :  { %s3157_s8 = smov 8   ;;  %s46_s10 = sshll.u32 %s4862_s3, 4  ;;  %s47_s10 = int_to_ptr.hbm [resolvable:$true] %s46_s10 }
   0x8   :  { %28 = dma.hbm_to_vmem [thread:$0]  %s21_s28, 8192, %s23_s30, [#allocation3], %s3156_s7, %s3156_s7, %s3157_s8  }
   0x9   :  { %s3158_s11 = smov [#allocation7]   ;;  %s3159_s0 = smov 384  }
   0xa   :  { %s48_s12 = sshll.u32 %s3158_s11, 4  ;;  %s3160_s13 = smov 24   ;;  %s49_s12 = int_to_ptr.vmem [resolvable:$true] %s48_s12 }
   0xb   :  { %54 = dma.hbm_to_vmem [thread:$0]  %s47_s10, 6144, %s49_s12, [#allocation6], %s3159_s0, %s3159_s0, %s3160_s13  }
   0xc   :  { %3146 = dma.done.wait [#allocation3], 8192  }
   0xd   :  { %3147 = vsyncadd [#allocation3], 4294959104 }
   0xe   :  { %3148 = dma.done.wait [#allocation6], 6160  }
   0xf   :  { %3149 = vsyncadd [#allocation6], 4294961136  ;;  %v3212_v0 = vld [vmem:[#allocation2 + $0x8] sm:$0xff]  ;;  %v67_v1 = vld [vmem:[#allocation2] sm:$0xff]  ;;  %v3161_v22 = vmov 128.0   ;;  %s2619_s24 = sshll.u32 %s4863_s4, 4  ;;  %s2620_s24 = int_to_ptr.hbm [resolvable:$true] %s2619_s24 }
  0x10   :  { %v3214_v2 = vld [vmem:[#allocation2 + $0x10] sm:$0xff]  ;;  %135 = vadd.xlane.f32.xlu1 %v3212_v0  ;;  %133 = vadd.xlane.f32.xlu0 %v67_v1  ;;  %v116_v3 = vld [vmem:[#allocation2 + $0x188] sm:$0xff]  ;;  %v115_v4 = vld [vmem:[#allocation2 + $0x180] sm:$0xff]  ;;  %2729 = vrcp.f32 %v3161_v22  ;;  %s3163_s25 = smov [#allocation9]   ;;  %s2632_s29 = sshll.u32 %s4864_s5, 4  ;;  %s2633_s29 = int_to_ptr.hbm [resolvable:$true] %s2632_s29 }
  0x11   :  { %137 = vadd.xlane.f32.xlu2 %v3214_v2  ;;  %v3218_v5 = vld [vmem:[#allocation2 + $0x190] sm:$0xff]  ;;  %v3221_v6 = vld [vmem:[#allocation2 + $0x18] sm:$0xff]  ;;  %v3225_v8 = vld [vmem:[#allocation2 + $0x20] sm:$0xff]  ;;  %s2630_s26 = sshll.u32 %s3163_s25, 4  ;;  %s3164_s30 = smov [#allocation11]   ;;  %s2631_s26 = int_to_ptr.vmem [resolvable:$true] %s2630_s26 }
  0x12   :  { %v3223_v7 = vld [vmem:[#allocation2 + $0x198] sm:$0xff]  ;;  %v3230_v9 = vld [vmem:[#allocation2 + $0x1a0] sm:$0xff]  ;;  %v3232_v10 = vld [vmem:[#allocation2 + $0x28] sm:$0xff]  ;;  %s2643_s1 = sshll.u32 %s3164_s30, 4  ;;  %s2645_s4 = sshll.u32 %s4865_s6, 4  ;;  %s2644_s1 = int_to_ptr.vmem [resolvable:$true] %s2643_s1  ;;  %s2646_s4 = int_to_ptr.hbm [resolvable:$true] %s2645_s4 }
  0x13   :  { %v3234_v11 = vld [vmem:[#allocation2 + $0x1a8] sm:$0xff]  ;;  %v3239_v12 = vld [vmem:[#allocation2 + $0x1b8] sm:$0xff]  ;;  %v3241_v13 = vld [vmem:[#allocation2 + $0x1b0] sm:$0xff] }
  0x14   :  { %v3243_v14 = vld [vmem:[#allocation2 + $0x30] sm:$0xff]  ;;  %v3248_v15 = vld [vmem:[#allocation2 + $0x40] sm:$0xff]  ;;  %v3250_v16 = vld [vmem:[#allocation2 + $0x38] sm:$0xff] }
  0x15   :  { %v3252_v17 = vld [vmem:[#allocation2 + $0x1c0] sm:$0xff]  ;;  %v3257_v18 = vld [vmem:[#allocation2 + $0x1d0] sm:$0xff]  ;;  %v3259_v19 = vld [vmem:[#allocation2 + $0x1c8] sm:$0xff] }
  0x16   :  { %v3261_v20 = vld [vmem:[#allocation2 + $0x48] sm:$0xff]  ;;  %v3266_v21 = vld [vmem:[#allocation2 + $0x1d8] sm:$0xff]  ;;  %v2730_v23 = vpop.eup %2729  ;;  %v3283_v43 = vld [vmem:[#allocation2 + $0x50] sm:$0xff] }
  0x17   :  { %v262_v24 = vmul.f32 128.0, %v2730_v23  ;;  %vm266_vm0 = vweird.f32 %v2730_v23  ;;  %v3314_v62 = vld [vmem:[#allocation2 + $0x60] sm:$0xff] }
  0x18   :  { %231 = vadd.xlane.f32.xlu1 %v116_v3  ;;  %229 = vadd.xlane.f32.xlu0 %v115_v4 }
  0x19   :  { %233 = vadd.xlane.f32.xlu2 %v3218_v5  ;;  %v263_v25 = vsub.f32 1.0, %v262_v24  ;;  %v3333_v24 = vld [vmem:[#allocation2 + $0x1e0] sm:$0xff] }
  0x1b   :  { %v264_v26 = vmul.f32 %v2730_v23, %v263_v25 }
  0x1d   :  { %v265_v27 = vadd.f32 %v2730_v23, %v264_v26 }
  0x1f   :  { %v3269_v28 = vsel %vm266_vm0, %v2730_v23, %v265_v27 }
  0x20   :  { %139 = vadd.xlane.f32.xlu0 %v3221_v6  ;;  %235 = vadd.xlane.f32.xlu1 %v3223_v7 }
  0x21   :  { %141 = vadd.xlane.f32.xlu2 %v3225_v8 }
  0x28   :  { %237 = vadd.xlane.f32.xlu0 %v3230_v9  ;;  %143 = vadd.xlane.f32.xlu1 %v3232_v10 }
  0x29   :  { %239 = vadd.xlane.f32.xlu2 %v3234_v11 }
  0x30   :  { %243 = vadd.xlane.f32.xlu1 %v3239_v12  ;;  %241 = vadd.xlane.f32.xlu0 %v3241_v13 }
  0x31   :  { %145 = vadd.xlane.f32.xlu2 %v3243_v14 }
  0x38   :  { %149 = vadd.xlane.f32.xlu1 %v3248_v15  ;;  %147 = vadd.xlane.f32.xlu0 %v3250_v16 }
  0x39   :  { %245 = vadd.xlane.f32.xlu2 %v3252_v17 }
  0x40   :  { %249 = vadd.xlane.f32.xlu1 %v3257_v18  ;;  %247 = vadd.xlane.f32.xlu0 %v3259_v19 }
  0x41   :  { %151 = vadd.xlane.f32.xlu2 %v3261_v20 }
  0x49   :  { %251 = vadd.xlane.f32.xlu2 %v3266_v21 }
  0x83   :  { %v136_v29 = vpop.xlane.xlu1 %135  ;;  %v134_v30 = vpop.xlane.xlu0 %133 }
  0x84   :  { %v268_v31 = vmul.f32 %v3269_v28, %v134_v30  ;;  %v138_v32 = vpop.xlane.xlu2 %137  ;;  %v269_v47 = vmul.f32 %v3269_v28, %v136_v29 }
  0x85   :  { %v270_v44 = vmul.f32 %v3269_v28, %v138_v32 }
  0x86   :  { %v3272_v33 = vsub.f32 %v67_v1, %v268_v31  ;;  %v3299_v51 = vsub.f32 %v3212_v0, %v269_v47  ;;  %v3317_v0 = vld [vmem:[#allocation2 + $0x58] sm:$0xff] }
  0x87   :  { %v3296_v50 = vsub.f32 %v3214_v2, %v270_v44 }
  0x88   :  { %v396_v34 = vmul.f32 %v3272_v33, %v3272_v33  ;;  %v397_v56 = vmul.f32 %v3299_v51, %v3299_v51 }
  0x89   :  { %v398_v55 = vmul.f32 %v3296_v50, %v3296_v50 }
  0x8a   :  { %460 = vadd.xlane.f32.xlu0 %v396_v34 }
  0x8b   :  { %v232_v35 = vpop.xlane.xlu1 %231  ;;  %v230_v36 = vpop.xlane.xlu0 %229 }
  0x8c   :  { %v317_v37 = vmul.f32 %v3269_v28, %v232_v35  ;;  %v316_v38 = vmul.f32 %v3269_v28, %v230_v36  ;;  %v234_v39 = vpop.xlane.xlu2 %233  ;;  %v3359_v36 = vld [vmem:[#allocation2 + $0x1f0] sm:$0xff] }
  0x8d   :  { %v318_v42 = vmul.f32 %v3269_v28, %v234_v39 }
  0x8e   :  { %v3278_v40 = vsub.f32 %v116_v3, %v317_v37  ;;  %v3280_v41 = vsub.f32 %v115_v4, %v316_v38  ;;  %v3362_v38 = vld [vmem:[#allocation2 + $0x1e8] sm:$0xff] }
  0x8f   :  { %v3293_v48 = vsub.f32 %v3218_v5, %v318_v42 }
  0x90   :  { %v445_v45 = vmul.f32 %v3278_v40, %v3278_v40  ;;  %v444_v46 = vmul.f32 %v3280_v41, %v3280_v41 }
  0x91   :  { %v446_v52 = vmul.f32 %v3293_v48, %v3293_v48 }
  0x92   :  { %558 = vadd.xlane.f32.xlu2 %v445_v45  ;;  %153 = vadd.xlane.f32.xlu0 %v3283_v43 }
  0x93   :  { %556 = vadd.xlane.f32.xlu1 %v444_v46  ;;  %v140_v49 = vpop.xlane.xlu0 %139  ;;  %v236_v57 = vpop.xlane.xlu1 %235 }
  0x94   :  { %v271_v53 = vmul.f32 %v3269_v28, %v140_v49  ;;  %v142_v54 = vpop.xlane.xlu2 %141  ;;  %v319_v63 = vmul.f32 %v3269_v28, %v236_v57 }
  0x96   :  { %v3309_v58 = vsub.f32 %v3221_v6, %v271_v53  ;;  %v3325_v3 = vsub.f32 %v3223_v7, %v319_v63 }
  0x98   :  { %v399_v60 = vmul.f32 %v3309_v58, %v3309_v58  ;;  %v447_v23 = vmul.f32 %v3325_v3, %v3325_v3 }
  0x9a   :  { %464 = vadd.xlane.f32.xlu2 %v398_v55  ;;  %560 = vadd.xlane.f32.xlu0 %v446_v52  ;;  %v3376_v52 = vld [vmem:[#allocation2 + $0x68] sm:$0xff] }
  0x9b   :  { %462 = vadd.xlane.f32.xlu1 %v397_v56  ;;  %v238_v59 = vpop.xlane.xlu0 %237  ;;  %v144_v4 = vpop.xlane.xlu1 %143 }
  0x9c   :  { %v320_v61 = vmul.f32 %v3269_v28, %v238_v59  ;;  %v240_v1 = vpop.xlane.xlu2 %239  ;;  %v273_v22 = vmul.f32 %v3269_v28, %v144_v4  ;;  %v82_v4 = vld [vmem:[#allocation2 + $0x78] sm:$0xff] }
  0x9d   :  { %v321_v6 = vmul.f32 %v3269_v28, %v240_v1 }
  0x9e   :  { %v3321_v2 = vsub.f32 %v3230_v9, %v320_v61  ;;  %v272_v9 = vmul.f32 %v3269_v28, %v142_v54  ;;  %v3341_v25 = vsub.f32 %v3232_v10, %v273_v22 }
  0x9f   :  { %v3338_v7 = vsub.f32 %v3234_v11, %v321_v6  ;;  %v3405_v6 = vld [vmem:[#allocation2 + $0x70] sm:$0xff] }
  0xa0   :  { %v448_v5 = vmul.f32 %v3321_v2, %v3321_v2  ;;  %v3344_v27 = vsub.f32 %v3225_v8, %v272_v9  ;;  %v401_v30 = vmul.f32 %v3341_v25, %v3341_v25  ;;  %4887 = vst [vmem:[#allocation19_spill] sm:$0xff] %v3405_v6 }
  0xa1   :  { %v449_v29 = vmul.f32 %v3338_v7, %v3338_v7 }
  0xa2   :  { %157 = vadd.xlane.f32.xlu2 %v3314_v62  ;;  %466 = vadd.xlane.f32.xlu0 %v399_v60  ;;  %v400_v11 = vmul.f32 %v3344_v27, %v3344_v27 }
  0xa3   :  { %155 = vadd.xlane.f32.xlu1 %v3317_v0  ;;  %v244_v32 = vpop.xlane.xlu1 %243  ;;  %v242_v34 = vpop.xlane.xlu0 %241 }
  0xa4   :  { %v146_v26 = vpop.xlane.xlu2 %145  ;;  %v323_v35 = vmul.f32 %v3269_v28, %v244_v32  ;;  %v322_v37 = vmul.f32 %v3269_v28, %v242_v34  ;;  %v3424_v32 = vld [vmem:[#allocation7 + $0x170] sm:$0xff]  ;;  %v3426_v34 = vld [vmem:[#allocation7 + $0x178] sm:$0xff] }
  0xa5   :  { %v274_v31 = vmul.f32 %v3269_v28, %v146_v26  ;;  %2003 = vmatpush.msra.mxu1 %v3424_v32  ;;  %2212 = vmatpush.msra.mxu2 %v3426_v34 }
  0xa6   :  { %v3370_v42 = vsub.f32 %v3241_v13, %v322_v37  ;;  %v84_v37 = vld [vmem:[#allocation2 + $0x88] sm:$0xff] }
  0xa7   :  { %v3354_v10 = vsub.f32 %v3243_v14, %v274_v31  ;;  %v3366_v14 = vsub.f32 %v3239_v12, %v323_v35  ;;  %v83_v31 = vld [vmem:[#allocation2 + $0x80] sm:$0xff] }
  0xa8   :  { %v450_v12 = vmul.f32 %v3370_v42, %v3370_v42  ;;  %v3432_v35 = vld [vmem:[#allocation7 + $0x160] sm:$0xff] }
  0xa9   :  { %v402_v8 = vmul.f32 %v3354_v10, %v3354_v10  ;;  %v451_v46 = vmul.f32 %v3366_v14, %v3366_v14  ;;  %2213 = vmatpush.msra.mxu2 %v3432_v35 }
  0xaa   :  { %253 = vadd.xlane.f32.xlu0 %v3333_v24  ;;  %564 = vadd.xlane.f32.xlu2 %v448_v5 }
  0xab   :  { %562 = vadd.xlane.f32.xlu1 %v447_v23  ;;  %v150_v44 = vpop.xlane.xlu1 %149  ;;  %v148_v45 = vpop.xlane.xlu0 %147 }
  0xac   :  { %v246_v39 = vpop.xlane.xlu2 %245  ;;  %v276_v49 = vmul.f32 %v3269_v28, %v150_v44  ;;  %v275_v53 = vmul.f32 %v3269_v28, %v148_v45  ;;  %v3436_v44 = vld [vmem:[#allocation7 + $0x140] sm:$0xff]  ;;  %v3438_v45 = vld [vmem:[#allocation7 + $0x148] sm:$0xff] }
  0xad   :  { %v324_v47 = vmul.f32 %v3269_v28, %v246_v39  ;;  %v1785_v39 = vld [vmem:[#allocation7 + $0x138] sm:$0xff]  ;;  %2214 = vmatpush.msra.mxu2 %v3438_v45 }
  0xae   :  { %v3386_v54 = vsub.f32 %v3248_v15, %v276_v49  ;;  %v3389_v55 = vsub.f32 %v3250_v16, %v275_v53  ;;  %v3444_v49 = vld [vmem:[#allocation7 + $0x130] sm:$0xff] }
  0xaf   :  { %v3383_v13 = vsub.f32 %v3252_v17, %v324_v47  ;;  %v3442_v47 = vld [vmem:[#allocation7 + $0x128] sm:$0xff]  ;;  %2215 = vmatpush.msra.mxu2 %v3444_v49  ;;  %v3448_v53 = vld [vmem:[#allocation7 + $0x110] sm:$0xff] }
  0xb0   :  { %4885 = vst [vmem:[#allocation17_spill] sm:$0xff] %v3389_v55  ;;  %v404_v59 = vmul.f32 %v3386_v54, %v3386_v54  ;;  %v403_v17 = vmul.f32 %v3389_v55, %v3389_v55  ;;  %v3519_v55 = vld [vmem:[#allocation7 + $0x10] sm:$0xff] }
  0xb1   :  { %4884 = vst [vmem:[#allocation16_spill] sm:$0xff] %v3383_v13  ;;  %v452_v57 = vmul.f32 %v3383_v13, %v3383_v13  ;;  %v3517_v13 = vld [vmem:[#allocation7 + $0x8] sm:$0xff] }
  0xb2   :  { %566 = vadd.xlane.f32.xlu0 %v449_v29  ;;  %470 = vadd.xlane.f32.xlu2 %v401_v30  ;;  %v130_v29 = vld [vmem:[#allocation2 + $0x1f8] sm:$0xff]  ;;  %4898 = vst [vmem:[#allocation30_spill] sm:$0xff] %v3519_v55 }
  0xb3   :  { %468 = vadd.xlane.f32.xlu1 %v400_v11  ;;  %v250_v16 = vpop.xlane.xlu1 %249  ;;  %v248_v61 = vpop.xlane.xlu0 %247  ;;  %v1791_v11 = vld [vmem:[#allocation7 + $0x168] sm:$0xff] }
  0xb4   :  { %v152_v56 = vpop.xlane.xlu2 %151  ;;  %v326_v1 = vmul.f32 %v3269_v28, %v250_v16  ;;  %v325_v5 = vmul.f32 %v3269_v28, %v248_v61  ;;  %1794 = vmatpush.msra.mxu0 %v1791_v11  ;;  %2668 = vmatpush.msra.mxu3 %v1791_v11  ;;  %v1773_v16 = vld [vmem:[#allocation7 + $0xd8] sm:$0xff]  ;;  %v3460_v61 = vld [vmem:[#allocation7 + $0xe0] sm:$0xff] }
  0xb5   :  { %v277_v60 = vmul.f32 %v3269_v28, %v152_v56  ;;  %v3450_v56 = vld [vmem:[#allocation7 + $0x118] sm:$0xff] }
  0xb6   :  { %v3408_v22 = vsub.f32 %v3257_v18, %v326_v1  ;;  %2216 = vmatpush.msra.mxu2 %v3450_v56  ;;  %v1770_v1 = vld [vmem:[#allocation7 + $0xc0] sm:$0xff]  ;;  %v1761_v11 = vld [vmem:[#allocation7 + $0x78] sm:$0xff] }
  0xb7   :  { %v3399_v15 = vsub.f32 %v3261_v20, %v277_v60  ;;  %v3412_v20 = vsub.f32 %v3259_v19, %v325_v5  ;;  %v3456_v60 = vld [vmem:[#allocation7 + $0x100] sm:$0xff]  ;;  %v3468_v5 = vld [vmem:[#allocation7 + $0xd0] sm:$0xff] }
  0xb8   :  { %4888 = vst [vmem:[#allocation20_spill] sm:$0xff] %v3408_v22  ;;  %v454_v9 = vmul.f32 %v3408_v22, %v3408_v22  ;;  %2217 = vmatpush.msra.mxu2 %v3456_v60  ;;  %v3506_v22 = vld [vmem:[#allocation7 + $0x40] sm:$0xff] }
  0xb9   :  { %4886 = vst [vmem:[#allocation18_spill] sm:$0xff] %v3399_v15  ;;  %v405_v63 = vmul.f32 %v3399_v15, %v3399_v15  ;;  %v453_v30 = vmul.f32 %v3412_v20, %v3412_v20  ;;  %v3511_v15 = vld [vmem:[#allocation7 + $0x20] sm:$0xff] }
  0xba   :  { %472 = vadd.xlane.f32.xlu0 %v402_v8  ;;  %257 = vadd.xlane.f32.xlu2 %v3359_v36  ;;  %4889 = vst [vmem:[#allocation21_spill] sm:$0xff] %v3412_v20  ;;  %v1788_v8 = vld [vmem:[#allocation7 + $0x150] sm:$0xff]  ;;  %v87_v20 = vld [vmem:[#allocation2 + $0xa0] sm:$0xff] }
  0xbb   :  { %255 = vadd.xlane.f32.xlu1 %v3362_v38  ;;  %1795 = vmatpush.msra.mxu0 %v1788_v8  ;;  %4896 = vst [vmem:[#allocation28_spill] sm:$0xff] %v3506_v22 }
  0xbc   :  { %v252_v23 = vpop.xlane.xlu2 %251  ;;  %2669 = vmatpush.msra.mxu3 %v1788_v8  ;;  %v3484_v8 = vld [vmem:[#allocation7 + $0x80] sm:$0xff] }
  0xbd   :  { %v327_v26 = vmul.f32 %v3269_v28, %v252_v23  ;;  %1796 = vmatpush.msra.mxu0 %v1785_v39  ;;  %v1767_v23 = vld [vmem:[#allocation7 + $0xa8] sm:$0xff] }
  0xbe   :  { %2670 = vmatpush.msra.mxu3 %v1785_v39  ;;  %v1758_v39 = vld [vmem:[#allocation7 + $0x60] sm:$0xff] }
  0xbf   :  { %v3420_v18 = vsub.f32 %v3266_v21, %v327_v26  ;;  %v3430_v21 = vld [vmem:[#allocation7 + $0x158] sm:$0xff] }
  0xc0   :  { %2004 = vmatpush.msra.mxu1 %v3430_v21  ;;  %v3474_v26 = vld [vmem:[#allocation7 + $0xb8] sm:$0xff] }
  0xc1   :  { %4890 = vst [vmem:[#allocation22_spill] sm:$0xff] %v3420_v18  ;;  %v455_v19 = vmul.f32 %v3420_v18, %v3420_v18  ;;  %v3504_v18 = vld [vmem:[#allocation7 + $0x38] sm:$0xff] }
  0xc2   :  { %159 = vadd.xlane.f32.xlu0 %v3376_v52  ;;  %570 = vadd.xlane.f32.xlu2 %v451_v46  ;;  %v1782_v46 = vld [vmem:[#allocation7 + $0x120] sm:$0xff]  ;;  %4891 = vst [vmem:[#allocation23_spill] sm:$0xff] %v3474_v26 }
  0xc3   :  { %568 = vadd.xlane.f32.xlu1 %v450_v12  ;;  %2005 = vmatpush.msra.mxu1 %v3436_v44  ;;  %v1779_v12 = vld [vmem:[#allocation7 + $0x108] sm:$0xff] }
  0xc4   :  { %1797 = vmatpush.msra.mxu0 %v1782_v46  ;;  %2671 = vmatpush.msra.mxu3 %v1782_v46  ;;  %v3490_v46 = vld [vmem:[#allocation7 + $0x68] sm:$0xff] }
  0xc5   :  { %2006 = vmatpush.msra.mxu1 %v3442_v47 }
  0xc6   :  { %1798 = vmatpush.msra.mxu0 %v1779_v12  ;;  %2672 = vmatpush.msra.mxu3 %v1779_v12  ;;  %v3492_v12 = vld [vmem:[#allocation7 + $0x70] sm:$0xff] }
  0xc7   :  { %2007 = vmatpush.msra.mxu1 %v3448_v53  ;;  %4894 = vst [vmem:[#allocation26_spill] sm:$0xff] %v3492_v12 }
  0xca   :  { %572 = vadd.xlane.f32.xlu0 %v452_v57  ;;  %476 = vadd.xlane.f32.xlu2 %v404_v59  ;;  %v1776_v57 = vld [vmem:[#allocation7 + $0xf0] sm:$0xff]  ;;  %v3454_v59 = vld [vmem:[#allocation7 + $0xf8] sm:$0xff] }
  0xcb   :  { %474 = vadd.xlane.f32.xlu1 %v403_v17  ;;  %1799 = vmatpush.msra.mxu0 %v1776_v57  ;;  %v85_v17 = vld [vmem:[#allocation2 + $0x90] sm:$0xff] }
  0xcc   :  { %2008 = vmatpush.msra.mxu1 %v3454_v59  ;;  %2673 = vmatpush.msra.mxu3 %v1776_v57  ;;  %v1755_v57 = vld [vmem:[#allocation7 + $0x48] sm:$0xff] }
  0xcd   :  { %1800 = vmatpush.msra.mxu0 %v1773_v16 }
  0xce   :  { %2009 = vmatpush.msra.mxu1 %v3460_v61  ;;  %2674 = vmatpush.msra.mxu3 %v1773_v16  ;;  %v3498_v16 = vld [vmem:[#allocation7 + $0x58] sm:$0xff] }
  0xcf   :  { %1801 = vmatpush.msra.mxu0 %v1770_v1  ;;  %4895 = vst [vmem:[#allocation27_spill] sm:$0xff] %v3498_v16 }
  0xd0   :  { %2675 = vmatpush.msra.mxu3 %v1770_v1 }
  0xd1   :  { %1802 = vmatpush.msra.mxu0 %v1767_v23 }
  0xd2   :  { %478 = vadd.xlane.f32.xlu0 %v405_v63  ;;  %163 = vadd.xlane.f32.xlu2 %v82_v4  ;;  %v3462_v63 = vld [vmem:[#allocation7 + $0xe8] sm:$0xff] }
  0xd3   :  { %161 = vadd.xlane.f32.xlu1 %v3405_v6  ;;  %2218 = vmatpush.msra.mxu2 %v3462_v63  ;;  %v3466_v4 = vld [vmem:[#allocation7 + $0xc8] sm:$0xff] }
  0xd4   :  { %2010 = vmatpush.msra.mxu1 %v3466_v4  ;;  %2676 = vmatpush.msra.mxu3 %v1767_v23 }
  0xd5   :  { %2219 = vmatpush.msra.mxu2 %v3468_v5 }
  0xd7   :  { %2220 = vmatpush.msra.mxu2 %v3474_v26 }
  0xda   :  { %259 = vadd.xlane.f32.xlu0 %v130_v29  ;;  %576 = vadd.xlane.f32.xlu2 %v454_v9  ;;  %v3472_v9 = vld [vmem:[#allocation7 + $0xb0] sm:$0xff] }
  0xdb   :  { %574 = vadd.xlane.f32.xlu1 %v453_v30  ;;  %2011 = vmatpush.msra.mxu1 %v3472_v9  ;;  %v1764_v29 = vld [vmem:[#allocation7 + $0x90] sm:$0xff]  ;;  %v3478_v30 = vld [vmem:[#allocation7 + $0x98] sm:$0xff] }
  0xdc   :  { %1803 = vmatpush.msra.mxu0 %v1764_v29  ;;  %2677 = vmatpush.msra.mxu3 %v1764_v29  ;;  %v1749_v29 = vld [vmem:[#allocation7 + $0x18] sm:$0xff] }
  0xdd   :  { %2012 = vmatpush.msra.mxu1 %v3478_v30 }
  0xde   :  { %1804 = vmatpush.msra.mxu0 %v1761_v11  ;;  %2678 = vmatpush.msra.mxu3 %v1761_v11  ;;  %v1746_v11 = vld [vmem:[#allocation7] sm:$0xff] }
  0xdf   :  { %2013 = vmatpush.msra.mxu1 %v3484_v8 }
  0xe0   :  { %1805 = vmatpush.msra.mxu0 %v1758_v39  ;;  %2679 = vmatpush.msra.mxu3 %v1758_v39 }
  0xe1   :  { %2014 = vmatpush.msra.mxu1 %v3490_v46 }
  0xe2   :  { %165 = vadd.xlane.f32.xlu0 %v83_v31  ;;  %578 = vadd.xlane.f32.xlu2 %v455_v19  ;;  %v3480_v19 = vld [vmem:[#allocation7 + $0xa0] sm:$0xff]  ;;  %v86_v31 = vld [vmem:[#allocation2 + $0x98] sm:$0xff] }
  0xe3   :  { %4892 = vst [vmem:[#allocation24_spill] sm:$0xff] %v3480_v19  ;;  %2221 = vmatpush.msra.mxu2 %v3480_v19  ;;  %1806 = vmatpush.msra.mxu0 %v1755_v57  ;;  %v88_v19 = vld [vmem:[#allocation2 + $0xa8] sm:$0xff] }
  0xe4   :  { %2680 = vmatpush.msra.mxu3 %v1755_v57  ;;  %v3533_v57 = vld [vmem:[#allocation5] ss:$0 sm:$0xff] }
  0xea   :  { %167 = vadd.xlane.f32.xlu0 %v84_v37  ;;  %v3486_v37 = vld [vmem:[#allocation7 + $0x88] sm:$0xff] }
  0xeb   :  { %4893 = vst [vmem:[#allocation25_spill] sm:$0xff] %v3486_v37  ;;  %2222 = vmatpush.msra.mxu2 %v3486_v37 }
  0xed   :  { %2223 = vmatpush.msra.mxu2 %v3492_v12 }
  0xef   :  { %2224 = vmatpush.msra.mxu2 %v3498_v16 }
  0xf1   :  { %2225 = vmatpush.msra.mxu2 %v3506_v22 }
  0xf2   :  { %169 = vadd.xlane.f32.xlu0 %v85_v17  ;;  %v3496_v17 = vld [vmem:[#allocation7 + $0x50] sm:$0xff] }
  0xf3   :  { %2015 = vmatpush.msra.mxu1 %v3496_v17 }
  0xf5   :  { %2016 = vmatpush.msra.mxu1 %v3504_v18 }
  0xf7   :  { %2017 = vmatpush.msra.mxu1 %v3511_v15 }
  0xf9   :  { %2018 = vmatpush.msra.mxu1 %v3517_v13 }
  0xfa   :  { %171 = vadd.xlane.f32.xlu0 %v86_v31  ;;  %v1752_v31 = vld [vmem:[#allocation7 + $0x30] sm:$0xff] }
  0xfb   :  { %1807 = vmatpush.msra.mxu0 %v1752_v31  ;;  %2681 = vmatpush.msra.mxu3 %v1752_v31 }
  0xfd   :  { %v461_v1 = vpop.xlane.xlu0 %460  ;;  %1808 = vmatpush.msra.mxu0 %v1749_v29  ;;  %2682 = vmatpush.msra.mxu3 %v1749_v29  ;;  %v3549_v29 = vmul.f32 %v3533_v57, %v3296_v50 }
  0xfe   :  { %v3501_v23 = vmul.f32 0.007874016, %v461_v1  ;;  %v3513_v1 = vld [vmem:[#allocation7 + $0x28] sm:$0xff] }
  0xff   :  { %4897 = vst [vmem:[#allocation29_spill] sm:$0xff] %v3513_v1  ;;  %2226 = vmatpush.msra.mxu2 %v3513_v1  ;;  %1809 = vmatpush.msra.mxu0 %v1746_v11 }
 0x100   :  { %2731 = vrsqrt.f32 %v3501_v23  ;;  %2683 = vmatpush.msra.mxu3 %v1746_v11  ;;  %vm659_vm1 = vcmp.eq.f32.partialorder %v3501_v23, inf  ;;  %vm661_vm2 = vcmp.eq.f32.partialorder %v3501_v23, 0.0 }
 0x101   :  { %2227 = vmatpush.msra.mxu2 %v3519_v55 }
 0x102   :  { %173 = vadd.xlane.f32.xlu0 %v87_v20  ;;  %2684 = vmatpush.msrb.mxu3 %v3424_v32  ;;  %v3554_v32 = vmul.f32 %v3533_v57, %v3278_v40 }
 0x104   :  { %2685 = vmatpush.msrb.mxu3 %v3430_v21 }
 0x105   :  { %v559_v22 = vpop.xlane.xlu2 %558  ;;  %v154_v16 = vpop.xlane.xlu0 %153 }
 0x106   :  { %v2732_v39 = vpop.eup %2731  ;;  %v3523_v12 = vmul.f32 0.007874016, %v559_v22  ;;  %v557_v6 = vpop.xlane.xlu1 %556  ;;  %v278_v20 = vmul.f32 %v3269_v28, %v154_v16  ;;  %2686 = vmatpush.msrb.mxu3 %v3436_v44 }
 0x107   :  { %v653_v1 = vmul.f32 %v2732_v39, %v3501_v23  ;;  %v3527_v37 = vmul.f32 0.007874016, %v557_v6  ;;  %v3541_v6 = vmul.f32 %v3533_v57, %v3299_v51  ;;  %v3558_v51 = vmul.f32 %v3533_v57, %v3280_v41 }
 0x108   :  { %2733 = vrsqrt.f32 %v3523_v12  ;;  %v3531_v26 = vsub.f32 %v3283_v43, %v278_v20  ;;  %v3545_v43 = vmul.f32 %v3533_v57, %v3272_v33  ;;  %v3574_v41 = vmul.f32 %v3533_v57, %v3309_v58  ;;  %2687 = vmatpush.msrb.mxu3 %v3442_v47 }
 0x109   :  { %2735 = vrsqrt.f32 %v3527_v37  ;;  %v654_v22 = vmul.f32 %v2732_v39, %v653_v1  ;;  %v662_v58 = vand.u32 2147483648, %v3501_v23  ;;  %v3605_v47 = vmul.f32 %v3533_v57, %v3338_v7 }
 0x10a   :  { %4899 = vst [vmem:[#allocation31_spill] sm:$0xff] %v3531_v26  ;;  %175 = vadd.xlane.f32.xlu0 %v88_v19  ;;  %v406_v16 = vmul.f32 %v3531_v26, %v3531_v26  ;;  %2688 = vmatpush.msrb.mxu3 %v3448_v53  ;;  %vm1247_vm3 = vcmp.eq.f32.partialorder %v3523_v12, inf  ;;  %vm1249_vm4 = vcmp.eq.f32.partialorder %v3523_v12, 0.0  ;;  %vm1235_vm5 = vcmp.eq.f32.partialorder %v3527_v37, inf }
 0x10b   :  { %v655_v31 = vmul.f32 0.5, %v654_v22  ;;  %4900 = vst [vmem:[#allocation32_spill] sm:$0xff] %v3605_v47  ;;  %vm1237_vm6 = vcmp.eq.f32.partialorder %v3527_v37, 0.0 }
 0x10c   :  { %480 = vadd.xlane.f32.xlu1 %v406_v16  ;;  %2689 = vmatpush.msrb.mxu3 %v3454_v59 }
 0x10d   :  { %v465_v19 = vpop.xlane.xlu2 %464  ;;  %v561_v1 = vpop.xlane.xlu0 %560  ;;  %v656_v20 = vsub.f32 1.5, %v655_v31  ;;  %v3566_v31 = vmul.f32 %v3533_v57, %v3293_v48  ;;  %v3584_v48 = vmul.f32 %v3533_v57, %v3344_v27  ;;  %v3598_v27 = vmul.f32 %v3533_v57, %v3341_v25 }
 0x10e   :  { %v2734_v11 = vpop.eup %2733  ;;  %v3560_v33 = vmul.f32 0.007874016, %v465_v19  ;;  %v463_v22 = vpop.xlane.xlu1 %462  ;;  %v3562_v16 = vmul.f32 0.007874016, %v561_v1  ;;  %v3578_v19 = vmul.f32 %v3533_v57, %v3325_v3  ;;  %v3613_v25 = vmul.f32 %v3533_v57, %v3370_v42  ;;  %2690 = vmatpush.msrb.mxu3 %v3460_v61 }
 0x10f   :  { %v2736_v50 = vpop.eup %2735  ;;  %v1241_v21 = vmul.f32 %v2734_v11, %v3523_v12  ;;  %v3569_v26 = vmul.f32 0.007874016, %v463_v22  ;;  %v657_v40 = vmul.f32 %v2732_v39, %v656_v20  ;;  %v3594_v20 = vmul.f32 %v3533_v57, %v3321_v2 }
 0x110   :  { %v1229_v1 = vmul.f32 %v2736_v50, %v3527_v37  ;;  %2737 = vrsqrt.f32 %v3560_v33  ;;  %v3609_v2 = vmul.f32 %v3533_v57, %v3366_v14  ;;  %4902 = vst [vmem:[#allocation34_spill] sm:$0xff] %v3613_v25  ;;  %2691 = vmatpush.msrb.mxu3 %v3466_v4  ;;  %v3648_v4 = vld [vmem:[%s4861_s2] ss:$0 sm:$0xff]  ;;  %vm683_vm7 = vcmp.eq.f32.partialorder %v3560_v33, inf }
 0x111   :  { %2739 = vrsqrt.f32 %v3569_v26  ;;  %v658_v44 = vmul.f32 %v657_v40, %v3501_v23  ;;  %v1242_v39 = vmul.f32 %v2734_v11, %v1241_v21  ;;  %vm671_vm8 = vcmp.eq.f32.partialorder %v3569_v26, inf }
 0x112   :  { %2741 = vrsqrt.f32 %v3562_v16  ;;  %v1230_v3 = vmul.f32 %v2736_v50, %v1229_v1  ;;  %4901 = vst [vmem:[#allocation33_spill] sm:$0xff] %v3609_v2  ;;  %2692 = vmatpush.msrb.mxu3 %v3472_v9  ;;  %vm673_vm9 = vcmp.eq.f32.partialorder %v3569_v26, 0.0  ;;  %vm685_vm10 = vcmp.eq.f32.partialorder %v3560_v33, 0.0 }
 0x113   :  { %v660_v22 = vsel %vm659_vm1, %v3501_v23, %v658_v44  ;;  %v1243_v1 = vmul.f32 0.5, %v1242_v39  ;;  %vm1259_vm11 = vcmp.eq.f32.partialorder %v3562_v16, inf  ;;  %vm1261_vm12 = vcmp.eq.f32.partialorder %v3562_v16, 0.0 }
 0x114   :  { %v663_v40 = vsel %vm661_vm2, %v662_v58, %v660_v22  ;;  %v1231_v21 = vmul.f32 0.5, %v1230_v3  ;;  %2693 = vmatpush.msrb.mxu3 %v3478_v30 }
 0x115   :  { %v158_v44 = vpop.xlane.xlu2 %157  ;;  %v467_v55 = vpop.xlane.xlu0 %466  ;;  %v1420_v23 = vadd.f32 1e-06, %v663_v40  ;;  %v1244_v14 = vsub.f32 1.5, %v1243_v1 }
 0x116   :  { %v2738_v7 = vpop.eup %2737  ;;  %v280_v53 = vmul.f32 %v3269_v28, %v158_v44  ;;  %v156_v58 = vpop.xlane.xlu1 %155  ;;  %v3618_v3 = vmul.f32 0.007874016, %v467_v55  ;;  %v1232_v39 = vsub.f32 1.5, %v1231_v21  ;;  %2694 = vmatpush.msrb.mxu3 %v3484_v8 }
 0x117   :  { %v2740_v22 = vpop.eup %2739  ;;  %v677_v2 = vmul.f32 %v2738_v7, %v3560_v33  ;;  %v279_v42 = vmul.f32 %v3269_v28, %v156_v58  ;;  %2743 = vrcp.f32 %v1420_v23  ;;  %v1245_v23 = vmul.f32 %v2734_v11, %v1244_v14 }
 0x118   :  { %v3624_v40 = vpop.eup %2741  ;;  %v665_v59 = vmul.f32 %v2740_v22, %v3569_v26  ;;  %v3628_v44 = vsub.f32 %v3314_v62, %v280_v53  ;;  %2745 = vrsqrt.f32 %v3618_v3  ;;  %v1233_v55 = vmul.f32 %v2736_v50, %v1232_v39  ;;  %2695 = vmatpush.msrb.mxu3 %v3490_v46 }
 0x119   :  { %v1253_v21 = vmul.f32 %v3624_v40, %v3562_v16  ;;  %v3634_v1 = vsub.f32 %v3317_v0, %v279_v42  ;;  %v678_v58 = vmul.f32 %v2738_v7, %v677_v2  ;;  %v1238_v53 = vand.u32 2147483648, %v3527_v37 }
 0x11a   :  { %4903 = vst [vmem:[#allocation35_spill] sm:$0xff] %v3628_v44  ;;  %v1234_v61 = vmul.f32 %v1233_v55, %v3527_v37  ;;  %v666_v62 = vmul.f32 %v2740_v22, %v665_v59  ;;  %v1246_v39 = vmul.f32 %v1245_v23, %v3523_v12  ;;  %v408_v11 = vmul.f32 %v3628_v44, %v3628_v44 }
 0x11b   :  { %4904 = vst [vmem:[#allocation36_spill] sm:$0xff] %v3634_v1  ;;  %v407_v50 = vmul.f32 %v3634_v1, %v3634_v1  ;;  %v679_v0 = vmul.f32 0.5, %v678_v58  ;;  %v1250_v42 = vand.u32 2147483648, %v3523_v12  ;;  %v1254_v25 = vmul.f32 %v3624_v40, %v1253_v21  ;;  %2696 = vmatpush.msrb.mxu3 %v3496_v17 }
 0x11c   :  { %v1236_v2 = vsel %vm1235_vm5, %v3527_v37, %v1234_v61  ;;  %v667_v14 = vmul.f32 0.5, %v666_v62  ;;  %v1248_v58 = vsel %vm1247_vm3, %v3523_v12, %v1246_v39  ;;  %v674_v46 = vand.u32 2147483648, %v3569_v26 }
 0x11d   :  { %v2744_v59 = vpop.eup %2743  ;;  %482 = vadd.xlane.f32.xlu1 %v407_v50  ;;  %v565_v55 = vpop.xlane.xlu2 %564  ;;  %v1239_v9 = vsel %vm1237_vm6, %v1238_v53, %v1236_v2  ;;  %v680_v1 = vsub.f32 1.5, %v679_v0  ;;  %v1251_v21 = vsel %vm1249_vm4, %v1250_v42, %v1248_v58  ;;  %2697 = vmatpush.msrb.mxu3 %v3504_v18  ;;  %vm695_vm13 = vcmp.eq.f32.partialorder %v3618_v3, inf }
 0x11e   :  { %v254_v23 = vpop.xlane.xlu0 %253  ;;  %v3661_v61 = vpop.eup %2745  ;;  %v3663_v44 = vmul.f32 0.007874016, %v565_v55  ;;  %v1615_v47 = vmul.f32 %v2744_v59, %v3545_v43  ;;  %v1468_v37 = vadd.f32 1e-06, %v1239_v9  ;;  %v668_v39 = vsub.f32 1.5, %v667_v14 }
 0x11f   :  { %v563_v62 = vpop.xlane.xlu1 %562  ;;  %v328_v50 = vmul.f32 %v3269_v28, %v254_v23  ;;  %v689_v53 = vmul.f32 %v3661_v61, %v3618_v3  ;;  %v1469_v43 = vadd.f32 1e-06, %v1251_v21  ;;  %v681_v55 = vmul.f32 %v2738_v7, %v680_v1  ;;  %2698 = vmatpush.msrb.mxu3 %v3511_v15 }
 0x120   :  { %v3669_v2 = vmul.f32 0.007874016, %v563_v62  ;;  %2747 = vrsqrt.f32 %v3663_v44  ;;  %v1682_v0 = vadd.f32 %v3648_v4, %v1615_v47  ;;  %v669_v59 = vmul.f32 %v2740_v22, %v668_v39 }
 0x121   :  { %v3676_v30 = vsub.f32 %v3333_v24, %v328_v50  ;;  %v1255_v23 = vmul.f32 0.5, %v1254_v25  ;;  %v690_v24 = vmul.f32 %v3661_v61, %v689_v53  ;;  %v682_v47 = vmul.f32 %v681_v55, %v3560_v33  ;;  %2699 = vmatpush.msrb.mxu3 %v3517_v13 }
 0x122   :  { %2749 = vrsqrt.f32 %v3669_v2  ;;  %1810 = vmatmul.f32.vlgmr.msra.gmra.mxu0 %v1682_v0  ;;  %2019 = vmatmul.f32.vlgmr.msra.gmra.mxu1 %v1682_v0  ;;  %v670_v12 = vmul.f32 %v669_v59, %v3569_v26  ;;  %v686_v7 = vand.u32 2147483648, %v3560_v33  ;;  %v3702_v62 = vmul.f32 %v3533_v57, %v3354_v10 }
 0x123   :  { %v456_v8 = vmul.f32 %v3676_v30, %v3676_v30  ;;  %2751 = vrcp.f32 %v1468_v37  ;;  %2228 = vmatmul.f32.vlgmr.msra.gmra.mxu2 %v1682_v0  ;;  %v1256_v25 = vsub.f32 1.5, %v1255_v23  ;;  %v691_v22 = vmul.f32 0.5, %v690_v24 }
 0x124   :  { %v672_v42 = vsel %vm671_vm8, %v3569_v26, %v670_v12  ;;  %2753 = vrcp.f32 %v1469_v43  ;;  %v684_v9 = vsel %vm683_vm7, %v3560_v33, %v682_v47  ;;  %v1262_v59 = vand.u32 2147483648, %v3562_v16 }
 0x125   :  { %580 = vadd.xlane.f32.xlu2 %v456_v8  ;;  %484 = vadd.xlane.f32.xlu1 %v408_v11  ;;  %v471_v1 = vpop.xlane.xlu2 %470  ;;  %v1257_v17 = vmul.f32 %v3624_v40, %v1256_v25  ;;  %v3706_v11 = vmul.f32 %v3533_v57, %v3386_v54  ;;  %v675_v37 = vsel %vm673_vm9, %v674_v46, %v672_v42  ;;  %v692_v26 = vsub.f32 1.5, %v691_v22 }
 0x126   :  { %v567_v14 = vpop.xlane.xlu0 %566  ;;  %v3698_v58 = vpop.eup %2747  ;;  %v1421_v18 = vadd.f32 1e-06, %v675_v37  ;;  %v687_v39 = vsel %vm685_vm10, %v686_v7, %v684_v9  ;;  %v3716_v54 = vmul.f32 0.007874016, %v471_v1  ;;  %vm697_vm14 = vcmp.eq.f32.partialorder %v3618_v3, 0.0 }
 0x127   :  { %v469_v50 = vpop.xlane.xlu1 %468  ;;  %v1258_v0 = vmul.f32 %v1257_v17, %v3562_v16  ;;  %v1277_v33 = vmul.f32 %v3698_v58, %v3663_v44  ;;  %v1422_v15 = vadd.f32 1e-06, %v687_v39  ;;  %v693_v23 = vmul.f32 %v3661_v61, %v692_v26 }
 0x128   :  { %v2750_v53 = vpop.eup %2749  ;;  %v3711_v40 = vmul.f32 0.007874016, %v469_v50  ;;  %v698_v61 = vand.u32 2147483648, %v3618_v3  ;;  %vm1271_vm15 = vcmp.eq.f32.partialorder %v3669_v2, inf  ;;  %vm1273_vm0 = vcmp.eq.f32.partialorder %v3669_v2, 0.0 }
 0x129   :  { %v2752_v10 = vpop.eup %2751  ;;  %v1265_v21 = vmul.f32 %v2750_v53, %v3669_v2  ;;  %v1260_v55 = vsel %vm1259_vm11, %v3562_v16, %v1258_v0  ;;  %v694_v13 = vmul.f32 %v693_v23, %v3618_v3  ;;  %v1278_v22 = vmul.f32 %v3698_v58, %v1277_v33 }
 0x12a   :  { %2755 = vrsqrt.f32 %v3711_v40  ;;  %v1663_v43 = vmul.f32 %v2752_v10, %v3558_v51  ;;  %v2754_v8 = vpop.eup %2753  ;;  %v1263_v12 = vsel %vm1261_vm12, %v1262_v59, %v1260_v55  ;;  %v3732_v51 = vmul.f32 0.007874016, %v567_v14 }
 0x12b   :  { %2757 = vrcp.f32 %v1421_v18  ;;  %v1266_v47 = vmul.f32 %v2750_v53, %v1265_v21  ;;  %v1470_v25 = vadd.f32 1e-06, %v1263_v12  ;;  %v1664_v42 = vmul.f32 %v2754_v8, %v3554_v32 }
 0x12c   :  { %v3729_v24 = vadd.f32 %v3648_v4, %v1663_v43  ;;  %2759 = vrsqrt.f32 %v3716_v54  ;;  %v696_v14 = vsel %vm695_vm13, %v3618_v3, %v694_v13  ;;  %v1279_v0 = vmul.f32 0.5, %v1278_v22 }
 0x12d   :  { %v258_v46 = vpop.xlane.xlu2 %257  ;;  %v1267_v7 = vmul.f32 0.5, %v1266_v47  ;;  %2761 = vrcp.f32 %v1470_v25  ;;  %v699_v50 = vsel %vm697_vm14, %v698_v61, %v696_v14  ;;  %v1274_v43 = vand.u32 2147483648, %v3669_v2 }
 0x12e   :  { %1954 = vmatmul.f32.vlgmr.msra.gmra.mxu3 %v3729_v24  ;;  %v473_v16 = vpop.xlane.xlu0 %472  ;;  %2763 = vrcp.f32 %v1422_v15  ;;  %v1423_v39 = vadd.f32 1e-06, %v699_v50  ;;  %v330_v10 = vmul.f32 %v3269_v28, %v258_v46  ;;  %v1280_v55 = vsub.f32 1.5, %v1279_v0 }
 0x12f   :  { %v256_v1 = vpop.xlane.xlu1 %255  ;;  %2700 = vmatpush.msra.mxu3 %v3426_v34  ;;  %v1268_v37 = vsub.f32 1.5, %v1267_v7  ;;  %2765 = vrsqrt.f32 %v3732_v51  ;;  %v3749_v32 = vmul.f32 0.007874016, %v473_v16  ;;  %vm707_vm1 = vcmp.eq.f32.partialorder %v3711_v40, inf }
 0x130   :  { %v3743_v9 = vpop.eup %2755  ;;  %v329_v17 = vmul.f32 %v3269_v28, %v256_v1  ;;  %2767 = vrcp.f32 %v1423_v39  ;;  %v3776_v8 = vsub.f32 %v3359_v36, %v330_v10  ;;  %v710_v61 = vand.u32 2147483648, %v3711_v40 }
 0x131   :  { %v701_v18 = vmul.f32 %v3743_v9, %v3711_v40  ;;  %2701 = vmatpush.msra.mxu3 %v3432_v35  ;;  %v2758_v3 = vpop.eup %2757  ;;  %v1269_v21 = vmul.f32 %v2750_v53, %v1268_v37  ;;  %v3763_v35 = vadd.f32 %v3648_v4, %v1664_v42  ;;  %2769 = vrsqrt.f32 %v3749_v32 }
 0x132   :  { %v3753_v34 = vsub.f32 %v3362_v38, %v329_v17  ;;  %v3756_v26 = vpop.eup %2759  ;;  %v1616_v33 = vmul.f32 %v2758_v3, %v3541_v6  ;;  %vm1283_vm2 = vcmp.eq.f32.partialorder %v3663_v44, inf  ;;  %v1281_v50 = vmul.f32 %v3698_v58, %v1280_v55 }
 0x133   :  { %2702 = vmatpush.msra.mxu3 %v3438_v45  ;;  %v1270_v53 = vmul.f32 %v1269_v21, %v3669_v2  ;;  %v2762_v59 = vpop.eup %2761  ;;  %v702_v15 = vmul.f32 %v3743_v9, %v701_v18  ;;  %v713_v23 = vmul.f32 %v3756_v26, %v3716_v54  ;;  %vm1285_vm3 = vcmp.eq.f32.partialorder %v3663_v44, 0.0 }
 0x134   :  { %v457_v38 = vmul.f32 %v3753_v34, %v3753_v34  ;;  %v1683_v6 = vadd.f32 %v3648_v4, %v1616_v33  ;;  %v2764_v45 = vpop.eup %2763  ;;  %v1665_v22 = vmul.f32 %v2762_v59, %v3566_v31  ;;  %v458_v31 = vmul.f32 %v3776_v8, %v3776_v8 }
 0x135   :  { %2703 = vmatpush.msra.mxu3 %v3444_v49  ;;  %v571_v12 = vpop.xlane.xlu2 %570  ;;  %v1272_v25 = vsel %vm1271_vm15, %v3669_v2, %v1270_v53  ;;  %v3783_v13 = vpop.eup %2765  ;;  %v703_v16 = vmul.f32 0.5, %v702_v15  ;;  %v1617_v2 = vmul.f32 %v2764_v45, %v3549_v29  ;;  %v714_v18 = vmul.f32 %v3756_v26, %v713_v23 }
 0x136   :  { %1957 = vmatmul.f32.gmra.mxu3 %v3763_v35  ;;  %582 = vadd.xlane.f32.xlu2 %v457_v38  ;;  %v160_v47 = vpop.xlane.xlu0 %159  ;;  %v1275_v36 = vsel %vm1273_vm0, %v1274_v43, %v1272_v25  ;;  %v2768_v42 = vpop.eup %2767  ;;  %v1289_v37 = vmul.f32 %v3783_v13, %v3732_v51  ;;  %v3814_v39 = vadd.f32 %v3648_v4, %v1665_v22  ;;  %v1286_v33 = vand.u32 2147483648, %v3663_v44 }
 0x137   :  { %1813 = vmatmul.f32.gmra.mxu0 %v1683_v6  ;;  %2022 = vmatmul.f32.gmra.mxu1 %v1683_v6  ;;  %v569_v49 = vpop.xlane.xlu1 %568  ;;  %v281_v46 = vmul.f32 %v3269_v28, %v160_v47  ;;  %v1471_v1 = vadd.f32 1e-06, %v1275_v36  ;;  %v704_v17 = vsub.f32 1.5, %v703_v16  ;;  %v1618_v3 = vmul.f32 %v2768_v42, %v3574_v41 }
 0x138   :  { %2231 = vmatmul.f32.gmra.mxu2 %v1683_v6  ;;  %v3789_v7 = vmul.f32 0.007874016, %v569_v49  ;;  %2704 = vmatpush.msra.mxu3 %v3450_v56  ;;  %v3806_v56 = vpop.eup %2769  ;;  %v1282_v10 = vmul.f32 %v1281_v50, %v3663_v44  ;;  %v715_v21 = vmul.f32 0.5, %v714_v18  ;;  %v1290_v43 = vmul.f32 %v3783_v13, %v1289_v37 }
 0x139   :  { %v3795_v14 = vsub.f32 %v3376_v52, %v281_v46  ;;  %v3808_v52 = vmul.f32 0.007874016, %v571_v12  ;;  %v705_v58 = vmul.f32 %v3743_v9, %v704_v17  ;;  %v725_v9 = vmul.f32 %v3806_v56, %v3749_v32 }
 0x13a   :  { %2771 = vrsqrt.f32 %v3789_v7  ;;  %2705 = vmatpush.msra.mxu3 %v3456_v60  ;;  %v1684_v60 = vadd.f32 %v3648_v4, %v1617_v2  ;;  %v716_v53 = vsub.f32 1.5, %v715_v21  ;;  %vm709_vm4 = vcmp.eq.f32.partialorder %v3711_v40, 0.0 }
 0x13b   :  { %v409_v29 = vmul.f32 %v3795_v14, %v3795_v14  ;;  %2773 = vrcp.f32 %v1471_v1  ;;  %v706_v0 = vmul.f32 %v705_v58, %v3711_v40  ;;  %v1685_v23 = vadd.f32 %v3648_v4, %v1618_v3 }
 0x13c   :  { %2706 = vmatpush.msra.mxu3 %v3462_v63  ;;  %v1284_v63 = vsel %vm1283_vm2, %v3663_v44, %v1282_v10  ;;  %2775 = vrsqrt.f32 %v3808_v52  ;;  %vm719_vm5 = vcmp.eq.f32.partialorder %v3716_v54, inf  ;;  %v717_v44 = vmul.f32 %v3756_v26, %v716_v53 }
 0x13d   :  { %486 = vadd.xlane.f32.xlu1 %v409_v29  ;;  %v477_v41 = vpop.xlane.xlu2 %476  ;;  %v708_v6 = vsel %vm707_vm1, %v3711_v40, %v706_v0  ;;  %v1287_v15 = vsel %vm1285_vm3, %v1286_v33, %v1284_v63  ;;  %v1291_v36 = vmul.f32 0.5, %v1290_v43  ;;  %v726_v16 = vmul.f32 %v3806_v56, %v725_v9  ;;  %v4907_v43 = vld [vmem:[#allocation25_spill] sm:$0xff] }
 0x13e   :  { %1960 = vmatmul.f32.gmra.mxu3 %v3814_v39  ;;  %584 = vadd.xlane.f32.xlu2 %v458_v31  ;;  %v573_v38 = vpop.xlane.xlu0 %572  ;;  %v711_v12 = vsel %vm709_vm4, %v710_v61, %v708_v6  ;;  %v1472_v49 = vadd.f32 1e-06, %v1287_v15  ;;  %v4905_v61 = vld [vmem:[#allocation23_spill] sm:$0xff]  ;;  %v3851_v22 = vmul.f32 0.007874016, %v477_v41  ;;  %vm721_vm6 = vcmp.eq.f32.partialorder %v3716_v54, 0.0 }
 0x13f   :  { %1816 = vmatmul.f32.gmra.mxu0 %v1684_v60  ;;  %2025 = vmatmul.f32.gmra.mxu1 %v1684_v60  ;;  %v475_v59 = vpop.xlane.xlu1 %474  ;;  %v1424_v40 = vadd.f32 1e-06, %v711_v12  ;;  %v722_v1 = vand.u32 2147483648, %v3716_v54  ;;  %v1292_v26 = vsub.f32 1.5, %v1291_v36  ;;  %v727_v2 = vmul.f32 0.5, %v726_v16  ;;  %v4908_v15 = vld [vmem:[#allocation19_spill] sm:$0xff] }
 0x140   :  { %v3837_v55 = vpop.eup %2771  ;;  %2234 = vmatmul.f32.gmra.mxu2 %v1684_v60  ;;  %v3839_v45 = vmul.f32 0.007874016, %v475_v59  ;;  %2707 = vmatpush.msra.mxu3 %v3468_v5  ;;  %v718_v5 = vmul.f32 %v717_v44, %v3716_v54  ;;  %v3862_v50 = vmul.f32 0.007874016, %v573_v38  ;;  %vm1295_vm7 = vcmp.eq.f32.partialorder %v3732_v51, inf }
 0x141   :  { %v2774_v47 = vpop.eup %2773  ;;  %v1301_v25 = vmul.f32 %v3837_v55, %v3789_v7  ;;  %v1293_v3 = vmul.f32 %v3783_v13, %v1292_v26  ;;  %v728_v10 = vsub.f32 1.5, %v727_v2  ;;  %vm1297_vm8 = vcmp.eq.f32.partialorder %v3732_v51, 0.0  ;;  %v2987_v26 = vld [vmem:[#allocation2 + $0x78] sm:$0xff] }
 0x142   :  { %2777 = vrsqrt.f32 %v3839_v45  ;;  %v1666_v46 = vmul.f32 %v2774_v47, %v3578_v19  ;;  %2708 = vmatpush.msra.mxu3 %v4905_v61  ;;  %v4906_v19 = vld [vmem:[#allocation24_spill] sm:$0xff]  ;;  %v3860_v17 = vpop.eup %2775  ;;  %v720_v37 = vsel %vm719_vm5, %v3716_v54, %v718_v5  ;;  %v1298_v41 = vand.u32 2147483648, %v3732_v51 }
 0x143   :  { %2779 = vrcp.f32 %v1424_v40  ;;  %v1302_v31 = vmul.f32 %v3837_v55, %v1301_v25  ;;  %v723_v58 = vsel %vm721_vm6, %v722_v1, %v720_v37  ;;  %v3877_v33 = vmul.f32 %v3860_v17, %v3808_v52  ;;  %v4909_v40 = vld [vmem:[#allocation26_spill] sm:$0xff]  ;;  %v4910_v1 = vld [vmem:[#allocation27_spill] sm:$0xff] }
 0x144   :  { %v3857_v42 = vadd.f32 %v3648_v4, %v1666_v46  ;;  %2709 = vmatpush.msra.mxu3 %v4906_v19  ;;  %2781 = vrcp.f32 %v1472_v49  ;;  %v1425_v60 = vadd.f32 1e-06, %v723_v58  ;;  %v1294_v9 = vmul.f32 %v1293_v3, %v3732_v51 }
 0x145   :  { %v164_v18 = vpop.xlane.xlu2 %163  ;;  %2783 = vrsqrt.f32 %v3851_v22  ;;  %v1303_v54 = vmul.f32 0.5, %v1302_v31  ;;  %v729_v63 = vmul.f32 %v3806_v56, %v728_v10  ;;  %vm731_vm9 = vcmp.eq.f32.partialorder %v3749_v32, inf }
 0x146   :  { %1963 = vmatmul.f32.gmra.mxu3 %v3857_v42  ;;  %v479_v29 = vpop.xlane.xlu0 %478  ;;  %2785 = vrsqrt.f32 %v3862_v50  ;;  %v283_v38 = vmul.f32 %v3269_v28, %v164_v18  ;;  %v1296_v12 = vsel %vm1295_vm7, %v3732_v51, %v1294_v9  ;;  %vm733_vm10 = vcmp.eq.f32.partialorder %v3749_v32, 0.0  ;;  %v2988_v9 = vld [vmem:[#allocation2 + $0x1f8] sm:$0xff] }
 0x147   :  { %1819 = vmatmul.f32.gmra.mxu0 %v1685_v23  ;;  %2028 = vmatmul.f32.gmra.mxu1 %v1685_v23  ;;  %v162_v21 = vpop.xlane.xlu1 %161  ;;  %v1304_v53 = vsub.f32 1.5, %v1303_v54  ;;  %2787 = vrcp.f32 %v1425_v60  ;;  %v1299_v56 = vsel %vm1297_vm8, %v1298_v41, %v1296_v12  ;;  %v734_v36 = vand.u32 2147483648, %v3749_v32 }
 0x148   :  { %v3873_v0 = vpop.eup %2777  ;;  %2237 = vmatmul.f32.gmra.mxu2 %v1685_v23  ;;  %v282_v13 = vmul.f32 %v3269_v28, %v162_v21  ;;  %2710 = vmatpush.msra.mxu3 %v4907_v43  ;;  %v1473_v46 = vadd.f32 1e-06, %v1299_v56  ;;  %v730_v61 = vmul.f32 %v729_v63, %v3749_v32  ;;  %vm1307_vm11 = vcmp.eq.f32.partialorder %v3789_v7, inf }
 0x149   :  { %v2780_v59 = vpop.eup %2779  ;;  %v737_v6 = vmul.f32 %v3873_v0, %v3839_v45  ;;  %v1305_v5 = vmul.f32 %v3837_v55, %v1304_v53  ;;  %v4911_v53 = vld [vmem:[#allocation28_spill] sm:$0xff]  ;;  %vm1309_vm12 = vcmp.eq.f32.partialorder %v3789_v7, 0.0  ;;  %vm743_vm13 = vcmp.eq.f32.partialorder %v3839_v45, inf }
 0x14a   :  { %v3889_v23 = vsub.f32 %v4908_v15, %v282_v13  ;;  %v2782_v47 = vpop.eup %2781  ;;  %v1619_v25 = vmul.f32 %v2780_v59, %v3584_v48  ;;  %2711 = vmatpush.msra.mxu3 %v4909_v40  ;;  %v3906_v48 = vmul.f32 0.007874016, %v479_v29  ;;  %2789 = vrcp.f32 %v1473_v46  ;;  %v4912_v15 = vld [vmem:[#allocation17_spill] sm:$0xff] }
 0x14b   :  { %v1667_v49 = vmul.f32 %v2782_v47, %v3594_v20  ;;  %v3904_v16 = vpop.eup %2783  ;;  %v3912_v20 = vsub.f32 %v2987_v26, %v283_v38  ;;  %v738_v31 = vmul.f32 %v3873_v0, %v737_v6  ;;  %v732_v58 = vsel %vm731_vm9, %v3749_v32, %v730_v61 }
 0x14c   :  { %v410_v44 = vmul.f32 %v3889_v23, %v3889_v23  ;;  %v1686_v51 = vadd.f32 %v3648_v4, %v1619_v25  ;;  %2712 = vmatpush.msra.mxu3 %v4910_v1  ;;  %v3918_v18 = vpop.eup %2785  ;;  %v1306_v3 = vmul.f32 %v1305_v5, %v3789_v7  ;;  %v749_v21 = vmul.f32 %v3904_v16, %v3851_v22 }
 0x14d   :  { %v3915_v2 = vadd.f32 %v3648_v4, %v1667_v49  ;;  %v577_v19 = vpop.xlane.xlu2 %576  ;;  %v2788_v10 = vpop.eup %2787  ;;  %v735_v54 = vsel %vm733_vm10, %v734_v36, %v732_v58  ;;  %v739_v13 = vmul.f32 0.5, %v738_v31  ;;  %2791 = vrsqrt.f32 %v3906_v48 }
 0x14e   :  { %488 = vadd.xlane.f32.xlu1 %v410_v44  ;;  %v260_v37 = vpop.xlane.xlu0 %259  ;;  %v1620_v38 = vmul.f32 %v2788_v10, %v3598_v27  ;;  %v1426_v63 = vadd.f32 1e-06, %v735_v54  ;;  %2713 = vmatpush.msra.mxu3 %v4911_v53  ;;  %v411_v43 = vmul.f32 %v3912_v20, %v3912_v20  ;;  %v1308_v59 = vsel %vm1307_vm11, %v3789_v7, %v1306_v3  ;;  %v4913_v27 = vld [vmem:[#allocation29_spill] sm:$0xff] }
 0x14f   :  { %1822 = vmatmul.f32.gmra.mxu0 %v1686_v51  ;;  %2031 = vmatmul.f32.gmra.mxu1 %v1686_v51  ;;  %v575_v29 = vpop.xlane.xlu1 %574  ;;  %v331_v55 = vmul.f32 %v3269_v28, %v260_v37  ;;  %v1310_v6 = vand.u32 2147483648, %v3789_v7  ;;  %v740_v32 = vsub.f32 1.5, %v739_v13  ;;  %v3944_v12 = vmul.f32 %v3533_v57, %v4912_v15  ;;  %v4914_v57 = vld [vmem:[#allocation32_spill] sm:$0xff]  ;;  %v4915_v7 = vld [vmem:[#allocation30_spill] sm:$0xff] }
 0x150   :  { %1966 = vmatmul.f32.gmra.mxu3 %v3915_v2  ;;  %2240 = vmatmul.f32.gmra.mxu2 %v1686_v51  ;;  %v3929_v60 = vmul.f32 0.007874016, %v575_v29  ;;  %2793 = vrcp.f32 %v1426_v63  ;;  %v2790_v25 = vpop.eup %2789  ;;  %v3950_v56 = vmul.f32 0.007874016, %v577_v19  ;;  %v1687_v44 = vadd.f32 %v3648_v4, %v1620_v38  ;;  %v3982_v63 = vld [vmem:[#allocation2 + $0xb0] sm:$0xff] }
 0x151   :  { %v3934_v41 = vsub.f32 %v2988_v9, %v331_v55  ;;  %2714 = vmatpush.msra.mxu3 %v4913_v27  ;;  %v1311_v40 = vsel %vm1309_vm12, %v1310_v6, %v1308_v59  ;;  %v741_v49 = vmul.f32 %v3873_v0, %v740_v32  ;;  %v1668_v46 = vmul.f32 %v2790_v25, %v4914_v57 }
 0x152   :  { %2795 = vrsqrt.f32 %v3929_v60  ;;  %v1474_v36 = vadd.f32 1e-06, %v1311_v40  ;;  %v1314_v51 = vmul.f32 %v3860_v17, %v3877_v33  ;;  %v1325_v61 = vmul.f32 %v3918_v18, %v3862_v50 }
 0x153   :  { %v459_v47 = vmul.f32 %v3934_v41, %v3934_v41  ;;  %2715 = vmatpush.msra.mxu3 %v4915_v7  ;;  %v742_v26 = vmul.f32 %v741_v49, %v3839_v45  ;;  %v750_v0 = vmul.f32 %v3904_v16, %v749_v21  ;;  %v3964_v19 = vpop.eup %2791  ;;  %v3967_v37 = vadd.f32 %v3648_v4, %v1668_v46  ;;  %v2989_v21 = vld [vmem:[#allocation2 + $0x80] sm:$0xff]  ;;  %v4916_v49 = vld [vmem:[#allocation34_spill] sm:$0xff] }
 0x154   :  { %2797 = vrcp.f32 %v1474_v36  ;;  %v746_v31 = vand.u32 2147483648, %v3839_v45  ;;  %vm745_vm14 = vcmp.eq.f32.partialorder %v3839_v45, 0.0  ;;  %v1315_v55 = vmul.f32 0.5, %v1314_v51 }
 0x155   :  { %586 = vadd.xlane.f32.xlu2 %v459_v47  ;;  %v579_v5 = vpop.xlane.xlu2 %578  ;;  %v744_v29 = vsel %vm743_vm13, %v3839_v45, %v742_v26  ;;  %v751_v58 = vmul.f32 0.5, %v750_v0  ;;  %2799 = vrsqrt.f32 %v3950_v56  ;;  %v761_v59 = vmul.f32 %v3964_v19, %v3906_v48  ;;  %v2990_v0 = vld [vmem:[#allocation2 + $0x88] sm:$0xff] }
 0x156   :  { %490 = vadd.xlane.f32.xlu1 %v411_v43  ;;  %v166_v1 = vpop.xlane.xlu0 %165  ;;  %v2794_v3 = vpop.eup %2793  ;;  %v3975_v10 = vmul.f32 0.007874016, %v579_v5  ;;  %v747_v13 = vsel %vm745_vm14, %v746_v31, %v744_v29  ;;  %v1316_v53 = vsub.f32 1.5, %v1315_v55  ;;  %vm1319_vm15 = vcmp.eq.f32.partialorder %v3808_v52, inf }
 0x157   :  { %1825 = vmatmul.f32.gmra.mxu0 %v1687_v44  ;;  %2034 = vmatmul.f32.gmra.mxu1 %v1687_v44  ;;  %v284_v33 = vmul.f32 %v3269_v28, %v166_v1  ;;  %v1621_v38 = vmul.f32 %v2794_v3, %v3702_v62  ;;  %v1427_v45 = vadd.f32 1e-06, %v747_v13  ;;  %v752_v43 = vsub.f32 1.5, %v751_v58 }
 0x158   :  { %2243 = vmatmul.f32.gmra.mxu2 %v1687_v44  ;;  %1969 = vmatmul.f32.gmra.mxu3 %v3967_v37  ;;  %v3979_v9 = vpop.eup %2795  ;;  %vm1321_vm0 = vcmp.eq.f32.partialorder %v3808_v52, 0.0  ;;  %v1317_v32 = vmul.f32 %v3860_v17, %v1316_v53  ;;  %v1322_v62 = vand.u32 2147483648, %v3808_v52  ;;  %v1326_v40 = vmul.f32 %v3918_v18, %v1325_v61  ;;  %v4026_v53 = vld [vmem:[#allocation2 + $0xb8] sm:$0xff] }
 0x159   :  { %v3977_v54 = vsub.f32 %v2989_v21, %v284_v33  ;;  %2801 = vrcp.f32 %v1427_v45  ;;  %v753_v15 = vmul.f32 %v3904_v16, %v752_v43  ;;  %v1337_v27 = vmul.f32 %v3979_v9, %v3929_v60 }
 0x15a   :  { %v2798_v47 = vpop.eup %2797  ;;  %2803 = vrsqrt.f32 %v3975_v10  ;;  %v1688_v25 = vadd.f32 %v3648_v4, %v1621_v38  ;;  %v1318_v57 = vmul.f32 %v1317_v32, %v3808_v52  ;;  %vm755_vm1 = vcmp.eq.f32.partialorder %v3851_v22, inf }
 0x15b   :  { %v412_v6 = vmul.f32 %v3977_v54, %v3977_v54  ;;  %v1669_v44 = vmul.f32 %v2798_v47, %v4916_v49  ;;  %v754_v16 = vmul.f32 %v753_v15, %v3851_v22  ;;  %v4003_v46 = vpop.eup %2799  ;;  %v758_v51 = vand.u32 2147483648, %v3851_v22 }
 0x15c   :  { %v1327_v7 = vmul.f32 0.5, %v1326_v40  ;;  %v762_v61 = vmul.f32 %v3964_v19, %v761_v59  ;;  %v1320_v1 = vsel %vm1319_vm15, %v3808_v52, %v1318_v57  ;;  %vm757_vm2 = vcmp.eq.f32.partialorder %v3851_v22, 0.0 }
 0x15d   :  { %177 = vadd.xlane.f32.xlu2 %v3982_v63  ;;  %v4009_v5 = vadd.f32 %v3648_v4, %v1669_v44  ;;  %v756_v26 = vsel %vm755_vm1, %v3851_v22, %v754_v16  ;;  %v1323_v31 = vsel %vm1321_vm0, %v1322_v62, %v1320_v1  ;;  %v1349_v3 = vmul.f32 %v4003_v46, %v3950_v56  ;;  %v2991_v16 = vld [vmem:[#allocation2 + $0x90] sm:$0xff]  ;;  %v4055_v1 = vld [vmem:[#allocation2 + $0xc0] sm:$0xff] }
 0x15e   :  { %492 = vadd.xlane.f32.xlu1 %v412_v6  ;;  %v168_v17 = vpop.xlane.xlu0 %167  ;;  %v759_v29 = vsel %vm757_vm2, %v758_v51, %v756_v26  ;;  %v1328_v55 = vsub.f32 1.5, %v1327_v7  ;;  %v1475_v21 = vadd.f32 1e-06, %v1323_v31  ;;  %v763_v38 = vmul.f32 0.5, %v762_v61 }
 0x15f   :  { %1828 = vmatmul.f32.gmra.mxu0 %v1688_v25  ;;  %2037 = vmatmul.f32.gmra.mxu1 %v1688_v25  ;;  %v285_v36 = vmul.f32 %v3269_v28, %v168_v17  ;;  %v2802_v58 = vpop.eup %2801  ;;  %v1428_v13 = vadd.f32 1e-06, %v759_v29  ;;  %vm1331_vm3 = vcmp.eq.f32.partialorder %v3862_v50, inf  ;;  %vm1333_vm4 = vcmp.eq.f32.partialorder %v3862_v50, 0.0  ;;  %v4917_v29 = vld [vmem:[#allocation33_spill] sm:$0xff] }
 0x160   :  { %2246 = vmatmul.f32.gmra.mxu2 %v1688_v25  ;;  %1972 = vmatmul.f32.gmra.mxu3 %v4009_v5  ;;  %v4023_v45 = vpop.eup %2803  ;;  %v1622_v22 = vmul.f32 %v2802_v58, %v3944_v12  ;;  %v1329_v43 = vmul.f32 %v3918_v18, %v1328_v55  ;;  %2805 = vrcp.f32 %v1475_v21  ;;  %v764_v59 = vsub.f32 1.5, %v763_v38 }
 0x161   :  { %v4016_v33 = vsub.f32 %v2990_v0, %v285_v36  ;;  %v1338_v6 = vmul.f32 %v3979_v9, %v1337_v27  ;;  %2807 = vrcp.f32 %v1428_v13  ;;  %v1334_v62 = vand.u32 2147483648, %v3862_v50 }
 0x162   :  { %v1689_v32 = vadd.f32 %v3648_v4, %v1622_v22  ;;  %v1330_v12 = vmul.f32 %v1329_v43, %v3862_v50  ;;  %v1361_v15 = vmul.f32 %v4023_v45, %v3975_v10  ;;  %v765_v47 = vmul.f32 %v3964_v19, %v764_v59 }
 0x163   :  { %v413_v52 = vmul.f32 %v4016_v33, %v4016_v33  ;;  %vm767_vm5 = vcmp.eq.f32.partialorder %v3906_v48, inf  ;;  %v1339_v25 = vmul.f32 0.5, %v1338_v6  ;;  %vm769_vm6 = vcmp.eq.f32.partialorder %v3906_v48, 0.0 }
 0x164   :  { %v1332_v40 = vsel %vm1331_vm3, %v3862_v50, %v1330_v12  ;;  %v1350_v49 = vmul.f32 %v4003_v46, %v1349_v3  ;;  %v766_v19 = vmul.f32 %v765_v47, %v3906_v48  ;;  %v770_v17 = vand.u32 2147483648, %v3906_v48  ;;  %v4918_v47 = vld [vmem:[#allocation16_spill] sm:$0xff] }
 0x165   :  { %494 = vadd.xlane.f32.xlu0 %v413_v52  ;;  %v1335_v44 = vsel %vm1333_vm4, %v1334_v62, %v1332_v40  ;;  %v1340_v57 = vsub.f32 1.5, %v1339_v25  ;;  %vm1343_vm7 = vcmp.eq.f32.partialorder %v3929_v60, inf  ;;  %vm1345_vm8 = vcmp.eq.f32.partialorder %v3929_v60, 0.0 }
 0x166   :  { %179 = vadd.xlane.f32.xlu1 %v4026_v53  ;;  %v170_v18 = vpop.xlane.xlu0 %169  ;;  %v1476_v51 = vadd.f32 1e-06, %v1335_v44  ;;  %v1351_v7 = vmul.f32 0.5, %v1350_v49  ;;  %v2806_v61 = vpop.eup %2805  ;;  %v768_v50 = vsel %vm767_vm5, %v3906_v48, %v766_v19  ;;  %v1362_v0 = vmul.f32 %v4023_v45, %v1361_v15  ;;  %v2993_v49 = vld [vmem:[#allocation2 + $0x98] sm:$0xff] }
 0x167   :  { %1831 = vmatmul.f32.gmra.mxu0 %v1689_v32  ;;  %2040 = vmatmul.f32.gmra.mxu1 %v1689_v32  ;;  %v286_v27 = vmul.f32 %v3269_v28, %v170_v18  ;;  %v1341_v26 = vmul.f32 %v3979_v9, %v1340_v57  ;;  %v2808_v31 = vpop.eup %2807  ;;  %v1670_v55 = vmul.f32 %v2806_v61, %v4917_v29  ;;  %v1346_v3 = vand.u32 2147483648, %v3929_v60  ;;  %v4086_v18 = vld [vmem:[#allocation5] ss:$0 sm:$0xff]  ;;  %v4919_v61 = vld [vmem:[#allocation18_spill] sm:$0xff] }
 0x168   :  { %2249 = vmatmul.f32.gmra.mxu2 %v1689_v32  ;;  %2809 = vrcp.f32 %v1476_v51  ;;  %v1623_v21 = vmul.f32 %v2808_v31, %v3706_v11  ;;  %v771_v13 = vsel %vm769_vm6, %v770_v17, %v768_v50  ;;  %v1352_v38 = vsub.f32 1.5, %v1351_v7  ;;  %v4095_v17 = vld [vmem:[#allocation2 + $0xc8] sm:$0xff] }
 0x169   :  { %v4052_v36 = vsub.f32 %v2991_v16, %v286_v27  ;;  %v1342_v9 = vmul.f32 %v1341_v26, %v3929_v60  ;;  %v4072_v22 = vadd.f32 %v3648_v4, %v1670_v55  ;;  %v1429_v52 = vadd.f32 1e-06, %v771_v13 }
 0x16a   :  { %vm1355_vm9 = vcmp.eq.f32.partialorder %v3950_v56, inf  ;;  %v1363_v43 = vmul.f32 0.5, %v1362_v0  ;;  %v1690_v59 = vadd.f32 %v3648_v4, %v1623_v21  ;;  %v1353_v48 = vmul.f32 %v4003_v46, %v1352_v38 }
 0x16b   :  { %v414_v58 = vmul.f32 %v4052_v36, %v4052_v36  ;;  %v1344_v11 = vsel %vm1343_vm7, %v3929_v60, %v1342_v9  ;;  %v1358_v32 = vand.u32 2147483648, %v3950_v56  ;;  %1975 = vmatmul.f32.gmra.mxu3 %v4072_v22  ;;  %2811 = vrcp.f32 %v1429_v52  ;;  %v2994_v52 = vld [vmem:[#allocation2 + $0xa0] sm:$0xff] }
 0x16c   :  { %v1347_v62 = vsel %vm1345_vm8, %v1346_v3, %v1344_v11  ;;  %v1364_v15 = vsub.f32 1.5, %v1363_v43  ;;  %v1607_v25 = vmul.f32 %v4086_v18, %v4918_v47  ;;  %v1354_v46 = vmul.f32 %v1353_v48, %v3950_v56 }
 0x16d   :  { %181 = vadd.xlane.f32.xlu0 %v4055_v1  ;;  %496 = vadd.xlane.f32.xlu2 %v414_v58  ;;  %v1477_v27 = vadd.f32 1e-06, %v1347_v62  ;;  %vm1357_vm10 = vcmp.eq.f32.partialorder %v3950_v56, 0.0  ;;  %vm1367_vm11 = vcmp.eq.f32.partialorder %v3975_v10, inf  ;;  %v1560_v50 = vmul.f32 %v4086_v18, %v4919_v61  ;;  %v4920_v58 = vld [vmem:[#allocation21_spill] sm:$0xff]  ;;  %v4921_v62 = vld [vmem:[#allocation20_spill] sm:$0xff] }
 0x16e   :  { %v172_v6 = vpop.xlane.xlu0 %171  ;;  %v2810_v40 = vpop.eup %2809  ;;  %v1365_v60 = vmul.f32 %v4023_v45, %v1364_v15  ;;  %v1356_v57 = vsel %vm1355_vm9, %v3950_v56, %v1354_v46  ;;  %v1370_v56 = vand.u32 2147483648, %v3975_v10  ;;  %vm1369_vm12 = vcmp.eq.f32.partialorder %v3975_v10, 0.0 }
 0x16f   :  { %v287_v12 = vmul.f32 %v3269_v28, %v172_v6  ;;  %1834 = vmatmul.f32.gmra.mxu0 %v1690_v59  ;;  %2043 = vmatmul.f32.gmra.mxu1 %v1690_v59  ;;  %v1671_v19 = vmul.f32 %v2810_v40, %v1607_v25  ;;  %2813 = vrcp.f32 %v1477_v27  ;;  %v1359_v51 = vsel %vm1357_vm10, %v1358_v32, %v1356_v57  ;;  %v4120_v6 = vld [vmem:[#allocation2 + $0xd0] sm:$0xff]  ;;  %v2995_v27 = vld [vmem:[#allocation2 + $0xa8] sm:$0xff] }
 0x170   :  { %2252 = vmatmul.f32.gmra.mxu2 %v1690_v59  ;;  %v1366_v7 = vmul.f32 %v1365_v60, %v3975_v10  ;;  %v1478_v45 = vadd.f32 1e-06, %v1359_v51  ;;  %v1608_v3 = vmul.f32 %v4086_v18, %v4920_v58  ;;  %v1609_v15 = vmul.f32 %v4086_v18, %v4921_v62  ;;  %v4922_v51 = vld [vmem:[#allocation22_spill] sm:$0xff] }
 0x171   :  { %v4092_v44 = vsub.f32 %v2993_v49, %v287_v12  ;;  %v2812_v26 = vpop.eup %2811  ;;  %v4107_v0 = vadd.f32 %v3648_v4, %v1671_v19  ;;  %v4134_v49 = vld [vmem:[#allocation2 + $0xd8] sm:$0xff]  ;;  %v4141_v19 = vld [vmem:[%s4861_s2] ss:$0 sm:$0xff] }
 0x172   :  { %v1624_v31 = vmul.f32 %v2812_v26, %v1560_v50  ;;  %v1368_v55 = vsel %vm1367_vm11, %v3975_v10, %v1366_v7  ;;  %2815 = vrcp.f32 %v1478_v45  ;;  %v1610_v7 = vmul.f32 %v4086_v18, %v4922_v51  ;;  %v4150_v26 = vld [vmem:[#allocation2 + $0xe0] sm:$0xff] }
 0x173   :  { %v415_v16 = vmul.f32 %v4092_v44, %v4092_v44  ;;  %1978 = vmatmul.f32.gmra.mxu3 %v4107_v0  ;;  %v1371_v59 = vsel %vm1369_vm12, %v1370_v56, %v1368_v55 }
 0x174   :  { %v1691_v9 = vadd.f32 %v3648_v4, %v1624_v31  ;;  %v1479_v48 = vadd.f32 1e-06, %v1371_v59 }
 0x175   :  { %183 = vadd.xlane.f32.xlu2 %v4095_v17  ;;  %498 = vadd.xlane.f32.xlu1 %v415_v16  ;;  %v2814_v13 = vpop.eup %2813 }
 0x176   :  { %v174_v29 = vpop.xlane.xlu0 %173  ;;  %v1672_v38 = vmul.f32 %v2814_v13, %v1608_v3  ;;  %2817 = vrcp.f32 %v1479_v48 }
 0x177   :  { %v288_v21 = vmul.f32 %v3269_v28, %v174_v29  ;;  %1837 = vmatmul.f32.gmra.mxu0 %v1691_v9  ;;  %2046 = vmatmul.f32.gmra.mxu1 %v1691_v9 }
 0x178   :  { %v4123_v10 = vadd.f32 %v3648_v4, %v1672_v38  ;;  %2255 = vmatmul.f32.gmra.mxu2 %v1691_v9  ;;  %v2816_v32 = vpop.eup %2815 }
 0x179   :  { %v4118_v43 = vsub.f32 %v2994_v52, %v288_v21  ;;  %v1673_v4 = vmul.f32 %v2816_v32, %v1609_v15 }
 0x17b   :  { %v416_v11 = vmul.f32 %v4118_v43, %v4118_v43  ;;  %1981 = vmatmul.f32.gmra.mxu3 %v4123_v10  ;;  %v4144_v57 = vadd.f32 %v4141_v19, %v1673_v4 }
 0x17c   :  { %v2818_v16 = vpop.eup %2817 }
 0x17d   :  { %185 = vadd.xlane.f32.xlu1 %v4120_v6  ;;  %500 = vadd.xlane.f32.xlu0 %v416_v11  ;;  %v1674_v50 = vmul.f32 %v2818_v16, %v1610_v7 }
 0x17e   :  { %v176_v12 = vpop.xlane.xlu0 %175 }
 0x17f   :  { %v289_v47 = vmul.f32 %v3269_v28, %v176_v12  ;;  %v481_v25 = vpop.xlane.xlu1 %480  ;;  %v4153_v31 = vadd.f32 %v4141_v19, %v1674_v50 }
 0x180   :  { %v598_v40 = vmul.f32 0.007874016, %v481_v25  ;;  %v4923_v25 = vld [vmem:[#allocation31_spill] sm:$0xff] }
 0x181   :  { %v4132_v46 = vsub.f32 %v2995_v27, %v289_v47  ;;  %v1561_v4 = vmul.f32 %v4086_v18, %v4923_v25 }
 0x182   :  { %2819 = vrsqrt.f32 %v598_v40  ;;  %vm779_vm13 = vcmp.eq.f32.partialorder %v598_v40, inf  ;;  %v782_v9 = vand.u32 2147483648, %v598_v40  ;;  %vm781_vm14 = vcmp.eq.f32.partialorder %v598_v40, 0.0 }
 0x183   :  { %v417_v60 = vmul.f32 %v4132_v46, %v4132_v46  ;;  %1984 = vmatmul.f32.gmra.mxu3 %v4144_v57 }
 0x185   :  { %187 = vadd.xlane.f32.xlu0 %v4134_v49  ;;  %502 = vadd.xlane.f32.xlu2 %v417_v60 }
 0x188   :  { %v2820_v61 = vpop.eup %2819 }
 0x189   :  { %v773_v45 = vmul.f32 %v2820_v61, %v598_v40 }
 0x18b   :  { %v774_v56 = vmul.f32 %v2820_v61, %v773_v45  ;;  %1987 = vmatmul.f32.gmra.mxu3 %v4153_v31 }
 0x18d   :  { %189 = vadd.xlane.f32.xlu2 %v4150_v26  ;;  %v775_v29 = vmul.f32 0.5, %v774_v56 }
 0x18f   :  { %v776_v55 = vsub.f32 1.5, %v775_v29 }
 0x190   :  { %v483_v58 = vpop.xlane.xlu1 %482 }
 0x191   :  { %v599_v3 = vmul.f32 0.007874016, %v483_v58  ;;  %v777_v21 = vmul.f32 %v2820_v61, %v776_v55 }
 0x193   :  { %2821 = vrsqrt.f32 %v599_v3  ;;  %v778_v13 = vmul.f32 %v777_v21, %v598_v40  ;;  %vm791_vm15 = vcmp.eq.f32.partialorder %v599_v3, inf  ;;  %vm793_vm0 = vcmp.eq.f32.partialorder %v599_v3, 0.0 }
 0x195   :  { %v780_v38 = vsel %vm779_vm13, %v598_v40, %v778_v13 }
 0x196   :  { %v783_v52 = vsel %vm781_vm14, %v782_v9, %v780_v38  ;;  %v794_v9 = vand.u32 2147483648, %v599_v3 }
 0x197   :  { %v1430_v11 = vadd.f32 1e-06, %v783_v52 }
 0x198   :  { %v581_v59 = vpop.xlane.xlu2 %580  ;;  %v485_v48 = vpop.xlane.xlu1 %484 }
 0x199   :  { %v648_v32 = vmul.f32 0.007874016, %v581_v59  ;;  %v2822_v12 = vpop.eup %2821  ;;  %v600_v62 = vmul.f32 0.007874016, %v485_v48  ;;  %2823 = vrcp.f32 %v1430_v11 }
 0x19a   :  { %v785_v15 = vmul.f32 %v2822_v12, %v599_v3 }
 0x19b   :  { %2825 = vrsqrt.f32 %v648_v32  ;;  %vm1379_vm1 = vcmp.eq.f32.partialorder %v648_v32, inf  ;;  %vm803_vm2 = vcmp.eq.f32.partialorder %v600_v62, inf  ;;  %vm1381_vm3 = vcmp.eq.f32.partialorder %v648_v32, 0.0 }
 0x19c   :  { %2827 = vrsqrt.f32 %v600_v62  ;;  %v786_v47 = vmul.f32 %v2822_v12, %v785_v15  ;;  %vm805_vm4 = vcmp.eq.f32.partialorder %v600_v62, 0.0 }
 0x19e   :  { %v787_v27 = vmul.f32 0.5, %v786_v47 }
 0x19f   :  { %v2824_v60 = vpop.eup %2823  ;;  %v1811_v16 = vpop.f32.mrf.mxu0 }
 0x1a0   :  { %v2020_v51 = vpop.f32.mrf.mxu1  ;;  %2421 = vst [vmem:[#allocation8] sm:$0xff] %v1811_v16  ;;  %v1625_v7 = vmul.f32 %v2824_v60, %v1561_v4  ;;  %v788_v61 = vsub.f32 1.5, %v787_v27 }
 0x1a1   :  { %v2826_v40 = vpop.eup %2825  ;;  %2485 = vst [vmem:[#allocation9] sm:$0xff] %v2020_v51 }
 0x1a2   :  { %v2828_v50 = vpop.eup %2827  ;;  %v1373_v45 = vmul.f32 %v2826_v40, %v648_v32  ;;  %v1692_v29 = vadd.f32 %v4141_v19, %v1625_v7  ;;  %v789_v55 = vmul.f32 %v2822_v12, %v788_v61  ;;  %v1382_v7 = vand.u32 2147483648, %v648_v32 }
 0x1a3   :  { %v797_v56 = vmul.f32 %v2828_v50, %v600_v62 }
 0x1a4   :  { %v1374_v58 = vmul.f32 %v2826_v40, %v1373_v45  ;;  %1840 = vmatmul.f32.gmra.mxu0 %v1692_v29  ;;  %2049 = vmatmul.f32.gmra.mxu1 %v1692_v29  ;;  %v790_v21 = vmul.f32 %v789_v55, %v599_v3 }
 0x1a5   :  { %v798_v13 = vmul.f32 %v2828_v50, %v797_v56  ;;  %2258 = vmatmul.f32.gmra.mxu2 %v1692_v29  ;;  %v4924_v29 = vld [vmem:[#allocation36_spill] sm:$0xff] }
 0x1a6   :  { %v1375_v38 = vmul.f32 0.5, %v1374_v58  ;;  %v2229_v52 = vpop.f32.mrf.mxu2  ;;  %v792_v59 = vsel %vm791_vm15, %v599_v3, %v790_v21  ;;  %v806_v3 = vand.u32 2147483648, %v600_v62  ;;  %v1562_v55 = vmul.f32 %v4086_v18, %v4924_v29 }
 0x1a7   :  { %v799_v11 = vmul.f32 0.5, %v798_v13  ;;  %2549 = vst [vmem:[#allocation11] sm:$0xff] %v2229_v52  ;;  %v795_v48 = vsel %vm793_vm0, %v794_v9, %v792_v59 }
 0x1a8   :  { %v1376_v15 = vsub.f32 1.5, %v1375_v38  ;;  %v1431_v25 = vadd.f32 1e-06, %v795_v48 }
 0x1a9   :  { %v583_v47 = vpop.xlane.xlu2 %582  ;;  %v800_v4 = vsub.f32 1.5, %v799_v11 }
 0x1aa   :  { %v4160_v12 = vmul.f32 0.007874016, %v583_v47  ;;  %v1377_v27 = vmul.f32 %v2826_v40, %v1376_v15  ;;  %2829 = vrcp.f32 %v1431_v25 }
 0x1ab   :  { %v801_v60 = vmul.f32 %v2828_v50, %v800_v4  ;;  %v1611_v4 = vmul.f32 %v4086_v18, %v3676_v30 }
 0x1ac   :  { %2831 = vrsqrt.f32 %v4160_v12  ;;  %v1378_v16 = vmul.f32 %v1377_v27, %v648_v32  ;;  %vm1391_vm5 = vcmp.eq.f32.partialorder %v4160_v12, inf  ;;  %vm1393_vm6 = vcmp.eq.f32.partialorder %v4160_v12, 0.0 }
 0x1ad   :  { %v802_v51 = vmul.f32 %v801_v60, %v600_v62 }
 0x1ae   :  { %v1380_v61 = vsel %vm1379_vm1, %v648_v32, %v1378_v16 }
 0x1af   :  { %v804_v45 = vsel %vm803_vm2, %v600_v62, %v802_v51  ;;  %v1383_v56 = vsel %vm1381_vm3, %v1382_v7, %v1380_v61 }
 0x1b0   :  { %v487_v58 = vpop.xlane.xlu1 %486  ;;  %v807_v40 = vsel %vm805_vm4, %v806_v3, %v804_v45  ;;  %v1480_v21 = vadd.f32 1e-06, %v1383_v56  ;;  %v2830_v50 = vpop.eup %2829  ;;  %v4925_v45 = vld [vmem:[#allocation35_spill] sm:$0xff] }
 0x1b1   :  { %v1955_v13 = vpop.f32.mrf.mxu3  ;;  %v585_v9 = vpop.xlane.xlu2 %584  ;;  %v4165_v38 = vmul.f32 0.007874016, %v487_v58  ;;  %v1432_v52 = vadd.f32 1e-06, %v807_v40  ;;  %v1626_v32 = vmul.f32 %v2830_v50, %v1562_v55  ;;  %v1563_v56 = vmul.f32 %v4086_v18, %v4925_v45 }
 0x1b2   :  { %v2832_v59 = vpop.eup %2831  ;;  %2469 = vst [vmem:[#allocation8 + $0x180] sm:$0xff] %v1955_v13  ;;  %v4167_v11 = vmul.f32 0.007874016, %v585_v9  ;;  %2833 = vrcp.f32 %v1480_v21 }
 0x1b3   :  { %v1385_v62 = vmul.f32 %v2832_v59, %v4160_v12  ;;  %2835 = vrsqrt.f32 %v4165_v38  ;;  %v1693_v47 = vadd.f32 %v4141_v19, %v1626_v32  ;;  %vm815_vm7 = vcmp.eq.f32.partialorder %v4165_v38, inf }
 0x1b4   :  { %v1814_v48 = vpop.f32.mrf.mxu0  ;;  %v2023_v15 = vpop.f32.mrf.mxu1  ;;  %2837 = vrsqrt.f32 %v4167_v11  ;;  %vm817_vm8 = vcmp.eq.f32.partialorder %v4165_v38, 0.0  ;;  %vm1403_vm9 = vcmp.eq.f32.partialorder %v4167_v11, inf  ;;  %vm1405_vm10 = vcmp.eq.f32.partialorder %v4167_v11, 0.0 }
 0x1b5   :  { %2422 = vst [vmem:[#allocation8 + $0x8] sm:$0xff] %v1814_v48  ;;  %2839 = vrcp.f32 %v1432_v52  ;;  %v1386_v25 = vmul.f32 %v2832_v59, %v1385_v62  ;;  %1843 = vmatmul.f32.gmra.mxu0 %v1693_v47  ;;  %2052 = vmatmul.f32.gmra.mxu1 %v1693_v47 }
 0x1b6   :  { %2486 = vst [vmem:[#allocation9 + $0x8] sm:$0xff] %v2023_v15  ;;  %2261 = vmatmul.f32.gmra.mxu2 %v1693_v47  ;;  %v1394_v15 = vand.u32 2147483648, %v4160_v12 }
 0x1b7   :  { %v1387_v27 = vmul.f32 0.5, %v1386_v25 }
 0x1b8   :  { %v2834_v60 = vpop.eup %2833 }
 0x1b9   :  { %v2836_v16 = vpop.eup %2835  ;;  %v1958_v51 = vpop.f32.mrf.mxu3  ;;  %v1675_v7 = vmul.f32 %v2834_v60, %v1611_v4  ;;  %v1388_v3 = vsub.f32 1.5, %v1387_v27 }
 0x1ba   :  { %v2838_v61 = vpop.eup %2837  ;;  %v809_v29 = vmul.f32 %v2836_v16, %v4165_v38  ;;  %2470 = vst [vmem:[#allocation8 + $0x188] sm:$0xff] %v1958_v51 }
 0x1bb   :  { %v2840_v55 = vpop.eup %2839  ;;  %v1397_v58 = vmul.f32 %v2838_v61, %v4167_v11  ;;  %v2232_v40 = vpop.f32.mrf.mxu2  ;;  %v4180_v30 = vadd.f32 %v4141_v19, %v1675_v7  ;;  %v1389_v21 = vmul.f32 %v2832_v59, %v1388_v3 }
 0x1bc   :  { %2550 = vst [vmem:[#allocation11 + $0x8] sm:$0xff] %v2232_v40  ;;  %v1817_v50 = vpop.f32.mrf.mxu0  ;;  %v2026_v13 = vpop.f32.mrf.mxu1  ;;  %v1627_v9 = vmul.f32 %v2840_v55, %v1563_v56  ;;  %v810_v52 = vmul.f32 %v2836_v16, %v809_v29 }
 0x1bd   :  { %2423 = vst [vmem:[#allocation8 + $0x10] sm:$0xff] %v1817_v50  ;;  %1990 = vmatmul.f32.gmra.mxu3 %v4180_v30  ;;  %v1390_v32 = vmul.f32 %v1389_v21, %v4160_v12  ;;  %v1398_v62 = vmul.f32 %v2838_v61, %v1397_v58  ;;  %v818_v21 = vand.u32 2147483648, %v4165_v38 }
 0x1be   :  { %2487 = vst [vmem:[#allocation9 + $0x10] sm:$0xff] %v2026_v13  ;;  %v1694_v48 = vadd.f32 %v4141_v19, %v1627_v9  ;;  %v811_v47 = vmul.f32 0.5, %v810_v52  ;;  %v1612_v52 = vmul.f32 %v4086_v18, %v3753_v34 }
 0x1bf   :  { %v1392_v59 = vsel %vm1391_vm5, %v4160_v12, %v1390_v32  ;;  %v1399_v25 = vmul.f32 0.5, %v1398_v62 }
 0x1c0   :  { %1846 = vmatmul.f32.gmra.mxu0 %v1694_v48  ;;  %2055 = vmatmul.f32.gmra.mxu1 %v1694_v48  ;;  %v1395_v4 = vsel %vm1393_vm6, %v1394_v15, %v1392_v59  ;;  %v812_v27 = vsub.f32 1.5, %v811_v47 }
 0x1c1   :  { %2264 = vmatmul.f32.gmra.mxu2 %v1694_v48  ;;  %v1961_v60 = vpop.f32.mrf.mxu3  ;;  %v489_v51 = vpop.xlane.xlu1 %488  ;;  %v1481_v7 = vadd.f32 1e-06, %v1395_v4  ;;  %v1400_v3 = vsub.f32 1.5, %v1399_v25 }
 0x1c2   :  { %2471 = vst [vmem:[#allocation8 + $0x190] sm:$0xff] %v1961_v60  ;;  %v4189_v45 = vmul.f32 0.007874016, %v489_v51  ;;  %v813_v56 = vmul.f32 %v2836_v16, %v812_v27 }
 0x1c3   :  { %v2235_v29 = vpop.f32.mrf.mxu2  ;;  %2841 = vrcp.f32 %v1481_v7  ;;  %v1401_v55 = vmul.f32 %v2838_v61, %v1400_v3  ;;  %v1406_v61 = vand.u32 2147483648, %v4167_v11 }
 0x1c4   :  { %2551 = vst [vmem:[#allocation11 + $0x10] sm:$0xff] %v2235_v29  ;;  %v1820_v58 = vpop.f32.mrf.mxu0  ;;  %v2029_v12 = vpop.f32.mrf.mxu1  ;;  %2843 = vrsqrt.f32 %v4189_v45  ;;  %v814_v40 = vmul.f32 %v813_v56, %v4165_v38  ;;  %v1564_v29 = vmul.f32 %v4086_v18, %v3795_v14  ;;  %vm827_vm11 = vcmp.eq.f32.partialorder %v4189_v45, inf }
 0x1c5   :  { %2424 = vst [vmem:[#allocation8 + $0x18] sm:$0xff] %v1820_v58  ;;  %v1402_v50 = vmul.f32 %v1401_v55, %v4167_v11  ;;  %vm829_vm12 = vcmp.eq.f32.partialorder %v4189_v45, 0.0 }
 0x1c6   :  { %2488 = vst [vmem:[#allocation9 + $0x18] sm:$0xff] %v2029_v12  ;;  %v816_v16 = vsel %vm815_vm7, %v4165_v38, %v814_v40 }
 0x1c7   :  { %v819_v13 = vsel %vm817_vm8, %v818_v21, %v816_v16  ;;  %v1404_v9 = vsel %vm1403_vm9, %v4167_v11, %v1402_v50 }
 0x1c8   :  { %v587_v32 = vpop.xlane.xlu2 %586  ;;  %v1433_v62 = vadd.f32 1e-06, %v819_v13  ;;  %v1407_v48 = vsel %vm1405_vm10, %v1406_v61, %v1404_v9  ;;  %v1613_v9 = vmul.f32 %v4086_v18, %v3776_v8 }
 0x1c9   :  { %v2842_v15 = vpop.eup %2841  ;;  %v1964_v47 = vpop.f32.mrf.mxu3  ;;  %v4204_v25 = vmul.f32 0.007874016, %v587_v32  ;;  %v1482_v38 = vadd.f32 1e-06, %v1407_v48 }
 0x1ca   :  { %v491_v59 = vpop.xlane.xlu1 %490  ;;  %v2844_v4 = vpop.eup %2843  ;;  %2472 = vst [vmem:[#allocation8 + $0x198] sm:$0xff] %v1964_v47  ;;  %v1676_v60 = vmul.f32 %v2842_v15, %v1612_v52  ;;  %2845 = vrcp.f32 %v1433_v62 }
 0x1cb   :  { %v4206_v27 = vmul.f32 0.007874016, %v491_v59  ;;  %v821_v11 = vmul.f32 %v2844_v4, %v4189_v45  ;;  %v2238_v51 = vpop.f32.mrf.mxu2  ;;  %2847 = vrsqrt.f32 %v4204_v25  ;;  %vm1415_vm13 = vcmp.eq.f32.partialorder %v4204_v25, inf }
 0x1cc   :  { %2552 = vst [vmem:[#allocation11 + $0x18] sm:$0xff] %v2238_v51  ;;  %v1823_v34 = vpop.f32.mrf.mxu0  ;;  %v2032_v7 = vpop.f32.mrf.mxu1  ;;  %v4212_v3 = vadd.f32 %v4141_v19, %v1676_v60  ;;  %vm1417_vm14 = vcmp.eq.f32.partialorder %v4204_v25, 0.0 }
 0x1cd   :  { %2849 = vrsqrt.f32 %v4206_v27  ;;  %2425 = vst [vmem:[#allocation8 + $0x20] sm:$0xff] %v1823_v34  ;;  %v822_v56 = vmul.f32 %v2844_v4, %v821_v11  ;;  %vm839_vm15 = vcmp.eq.f32.partialorder %v4206_v27, inf  ;;  %vm841_vm0 = vcmp.eq.f32.partialorder %v4206_v27, 0.0 }
 0x1ce   :  { %2851 = vrcp.f32 %v1482_v38  ;;  %2489 = vst [vmem:[#allocation9 + $0x20] sm:$0xff] %v2032_v7  ;;  %1993 = vmatmul.f32.gmra.mxu3 %v4212_v3 }
 0x1cf   :  { %v823_v55 = vmul.f32 0.5, %v822_v56 }
 0x1d0   :  { %v2846_v58 = vpop.eup %2845  ;;  %v178_v12 = vpop.xlane.xlu2 %177 }
 0x1d1   :  { %v2848_v40 = vpop.eup %2847  ;;  %v290_v21 = vmul.f32 %v3269_v28, %v178_v12  ;;  %v1628_v16 = vmul.f32 %v2846_v58, %v1564_v29  ;;  %v824_v61 = vsub.f32 1.5, %v823_v55 }
 0x1d2   :  { %v493_v50 = vpop.xlane.xlu1 %492  ;;  %v1409_v52 = vmul.f32 %v2848_v40, %v4204_v25 }
 0x1d3   :  { %v2850_v13 = vpop.eup %2849  ;;  %v4221_v32 = vmul.f32 0.007874016, %v493_v50  ;;  %v1967_v48 = vpop.f32.mrf.mxu3  ;;  %v4225_v47 = vsub.f32 %v3982_v63, %v290_v21  ;;  %v1695_v59 = vadd.f32 %v4141_v19, %v1628_v16  ;;  %v825_v38 = vmul.f32 %v2844_v4, %v824_v61 }
 0x1d4   :  { %v2852_v62 = vpop.eup %2851  ;;  %v833_v14 = vmul.f32 %v2850_v13, %v4206_v27  ;;  %v2241_v15 = vpop.f32.mrf.mxu2  ;;  %2473 = vst [vmem:[#allocation8 + $0x1a0] sm:$0xff] %v1967_v48  ;;  %v1410_v51 = vmul.f32 %v2848_v40, %v1409_v52  ;;  %v830_v4 = vand.u32 2147483648, %v4189_v45 }
 0x1d5   :  { %v1826_v60 = vpop.f32.mrf.mxu0  ;;  %v2035_v11 = vpop.f32.mrf.mxu1  ;;  %2853 = vrsqrt.f32 %v4221_v32  ;;  %v1677_v8 = vmul.f32 %v2852_v62, %v1613_v9  ;;  %2553 = vst [vmem:[#allocation11 + $0x20] sm:$0xff] %v2241_v15  ;;  %1849 = vmatmul.f32.gmra.mxu0 %v1695_v59  ;;  %2058 = vmatmul.f32.gmra.mxu1 %v1695_v59  ;;  %v418_v34 = vmul.f32 %v4225_v47, %v4225_v47  ;;  %vm851_vm1 = vcmp.eq.f32.partialorder %v4221_v32, inf }
 0x1d6   :  { %v826_v7 = vmul.f32 %v825_v38, %v4189_v45  ;;  %2426 = vst [vmem:[#allocation8 + $0x28] sm:$0xff] %v1826_v60  ;;  %2267 = vmatmul.f32.gmra.mxu2 %v1695_v59  ;;  %v834_v56 = vmul.f32 %v2850_v13, %v833_v14  ;;  %v1411_v29 = vmul.f32 0.5, %v1410_v51  ;;  %vm853_vm2 = vcmp.eq.f32.partialorder %v4221_v32, 0.0 }
 0x1d7   :  { %v4234_v63 = vadd.f32 %v4141_v19, %v1677_v8  ;;  %2490 = vst [vmem:[#allocation9 + $0x28] sm:$0xff] %v2035_v11  ;;  %504 = vadd.xlane.f32.xlu1 %v418_v34  ;;  %v4248_v11 = vld [vmem:[#allocation2 + $0xe8] sm:$0xff] }
 0x1d8   :  { %v828_v55 = vsel %vm827_vm11, %v4189_v45, %v826_v7  ;;  %v495_v58 = vpop.xlane.xlu0 %494  ;;  %v835_v21 = vmul.f32 0.5, %v834_v56  ;;  %v1412_v50 = vsub.f32 1.5, %v1411_v29 }
 0x1d9   :  { %1996 = vmatmul.f32.gmra.mxu3 %v4234_v63  ;;  %v831_v12 = vsel %vm829_vm12, %v830_v4, %v828_v55  ;;  %v4240_v61 = vmul.f32 0.007874016, %v495_v58  ;;  %v1565_v58 = vmul.f32 %v4086_v18, %v3889_v23 }
 0x1da   :  { %v180_v16 = vpop.xlane.xlu1 %179  ;;  %v1434_v9 = vadd.f32 1e-06, %v831_v12  ;;  %v836_v14 = vsub.f32 1.5, %v835_v21  ;;  %v1413_v48 = vmul.f32 %v2848_v40, %v1412_v50  ;;  %v1418_v40 = vand.u32 2147483648, %v4204_v25 }
 0x1db   :  { %v2854_v52 = vpop.eup %2853  ;;  %v291_v62 = vmul.f32 %v3269_v28, %v180_v16  ;;  %2855 = vrsqrt.f32 %v4240_v61  ;;  %v1970_v45 = vpop.f32.mrf.mxu3  ;;  %vm863_vm3 = vcmp.eq.f32.partialorder %v4240_v61, inf  ;;  %vm865_vm4 = vcmp.eq.f32.partialorder %v4240_v61, 0.0 }
 0x1dc   :  { %v845_v15 = vmul.f32 %v2854_v52, %v4221_v32  ;;  %v2244_v59 = vpop.f32.mrf.mxu2  ;;  %2857 = vrcp.f32 %v1434_v9  ;;  %v837_v8 = vmul.f32 %v2850_v13, %v836_v14  ;;  %v1414_v51 = vmul.f32 %v1413_v48, %v4204_v25  ;;  %2474 = vst [vmem:[#allocation8 + $0x1a8] sm:$0xff] %v1970_v45 }
 0x1dd   :  { %2554 = vst [vmem:[#allocation11 + $0x28] sm:$0xff] %v2244_v59  ;;  %v1829_v38 = vpop.f32.mrf.mxu0  ;;  %v4246_v60 = vsub.f32 %v4026_v53, %v291_v62  ;;  %v2038_v34 = vpop.f32.mrf.mxu1  ;;  %v842_v13 = vand.u32 2147483648, %v4206_v27 }
 0x1de   :  { %v846_v7 = vmul.f32 %v2854_v52, %v845_v15  ;;  %2427 = vst [vmem:[#allocation8 + $0x30] sm:$0xff] %v1829_v38  ;;  %v838_v53 = vmul.f32 %v837_v8, %v4206_v27  ;;  %v1416_v56 = vsel %vm1415_vm13, %v4204_v25, %v1414_v51 }
 0x1df   :  { %v419_v4 = vmul.f32 %v4246_v60, %v4246_v60  ;;  %2491 = vst [vmem:[#allocation9 + $0x30] sm:$0xff] %v2038_v34  ;;  %191 = vadd.xlane.f32.xlu1 %v4248_v11  ;;  %v1419_v29 = vsel %vm1417_vm14, %v1418_v40, %v1416_v56 }
 0x1e0   :  { %v847_v55 = vmul.f32 0.5, %v846_v7  ;;  %v497_v12 = vpop.xlane.xlu2 %496  ;;  %v182_v21 = vpop.xlane.xlu0 %181  ;;  %v840_v50 = vsel %vm839_vm15, %v4206_v27, %v838_v53  ;;  %v1483_v25 = vadd.f32 1e-06, %v1419_v29  ;;  %v4274_v53 = vld [vmem:[#allocation2 + $0xf0] sm:$0xff]  ;;  %v1614_v29 = vmul.f32 %v4086_v18, %v3934_v41 }
 0x1e1   :  { %506 = vadd.xlane.f32.xlu0 %v419_v4  ;;  %v2856_v16 = vpop.eup %2855  ;;  %v4265_v9 = vmul.f32 0.007874016, %v497_v12  ;;  %v292_v62 = vmul.f32 %v3269_v28, %v182_v21  ;;  %v843_v14 = vsel %vm841_vm0, %v842_v13, %v840_v50  ;;  %v1566_v12 = vmul.f32 %v4086_v18, %v3912_v20 }
 0x1e2   :  { %v848_v48 = vsub.f32 1.5, %v847_v55  ;;  %v2858_v15 = vpop.eup %2857  ;;  %v857_v59 = vmul.f32 %v2856_v16, %v4240_v61  ;;  %v1435_v45 = vadd.f32 1e-06, %v843_v14  ;;  %2859 = vrcp.f32 %v1483_v25 }
 0x1e3   :  { %2861 = vrsqrt.f32 %v4265_v9  ;;  %v4271_v38 = vsub.f32 %v4055_v1, %v292_v62  ;;  %v1629_v27 = vmul.f32 %v2858_v15, %v1565_v58  ;;  %v1973_v40 = vpop.f32.mrf.mxu3  ;;  %v854_v1 = vand.u32 2147483648, %v4221_v32 }
 0x1e4   :  { %v2247_v23 = vpop.f32.mrf.mxu2  ;;  %v849_v8 = vmul.f32 %v2854_v52, %v848_v48  ;;  %2863 = vrcp.f32 %v1435_v45  ;;  %v858_v34 = vmul.f32 %v2856_v16, %v857_v59  ;;  %2475 = vst [vmem:[#allocation8 + $0x1b0] sm:$0xff] %v1973_v40  ;;  %vm875_vm5 = vcmp.eq.f32.partialorder %v4265_v9, inf }
 0x1e5   :  { %2555 = vst [vmem:[#allocation11 + $0x30] sm:$0xff] %v2247_v23  ;;  %v1832_v51 = vpop.f32.mrf.mxu0  ;;  %v2041_v7 = vpop.f32.mrf.mxu1  ;;  %v1696_v4 = vadd.f32 %v4141_v19, %v1629_v27  ;;  %v420_v56 = vmul.f32 %v4271_v38, %v4271_v38  ;;  %vm877_vm6 = vcmp.eq.f32.partialorder %v4265_v9, 0.0 }
 0x1e6   :  { %2428 = vst [vmem:[#allocation8 + $0x38] sm:$0xff] %v1832_v51  ;;  %v850_v13 = vmul.f32 %v849_v8, %v4221_v32  ;;  %v859_v52 = vmul.f32 0.5, %v858_v34 }
 0x1e7   :  { %2492 = vst [vmem:[#allocation9 + $0x38] sm:$0xff] %v2041_v7  ;;  %1852 = vmatmul.f32.gmra.mxu0 %v1696_v4  ;;  %2061 = vmatmul.f32.gmra.mxu1 %v1696_v4 }
 0x1e8   :  { %v852_v55 = vsel %vm851_vm1, %v4221_v32, %v850_v13  ;;  %v2860_v58 = vpop.eup %2859  ;;  %2270 = vmatmul.f32.gmra.mxu2 %v1696_v4  ;;  %v184_v21 = vpop.xlane.xlu2 %183  ;;  %v860_v62 = vsub.f32 1.5, %v859_v52  ;;  %508 = vadd.xlane.f32.xlu2 %v420_v56  ;;  %v4306_v13 = vld [vmem:[#allocation2 + $0xf8] sm:$0xff] }
 0x1e9   :  { %193 = vadd.xlane.f32.xlu0 %v4274_v53  ;;  %v499_v50 = vpop.xlane.xlu1 %498  ;;  %v855_v25 = vsel %vm853_vm2, %v854_v1, %v852_v55  ;;  %v2862_v14 = vpop.eup %2861  ;;  %v293_v41 = vmul.f32 %v3269_v28, %v184_v21  ;;  %v1678_v15 = vmul.f32 %v2860_v58, %v1614_v29 }
 0x1ea   :  { %v4289_v48 = vmul.f32 0.007874016, %v499_v50  ;;  %v1436_v59 = vadd.f32 1e-06, %v855_v25  ;;  %v2864_v32 = vpop.eup %2863  ;;  %v869_v45 = vmul.f32 %v2862_v14, %v4265_v9  ;;  %v861_v23 = vmul.f32 %v2856_v16, %v860_v62 }
 0x1eb   :  { %v4293_v27 = vsub.f32 %v4095_v17, %v293_v41  ;;  %v1630_v8 = vmul.f32 %v2864_v32, %v1566_v12  ;;  %v4297_v51 = vadd.f32 %v4141_v19, %v1678_v15  ;;  %v866_v16 = vand.u32 2147483648, %v4240_v61 }
 0x1ec   :  { %v2250_v20 = vpop.f32.mrf.mxu2  ;;  %2865 = vrsqrt.f32 %v4289_v48  ;;  %v862_v34 = vmul.f32 %v861_v23, %v4240_v61  ;;  %v870_v40 = vmul.f32 %v2862_v14, %v869_v45  ;;  %v1567_v25 = vmul.f32 %v4086_v18, %v3977_v54 }
 0x1ed   :  { %2556 = vst [vmem:[#allocation11 + $0x38] sm:$0xff] %v2250_v20  ;;  %2867 = vrcp.f32 %v1436_v59  ;;  %v1835_v7 = vpop.f32.mrf.mxu0  ;;  %v2044_v4 = vpop.f32.mrf.mxu1  ;;  %v1697_v56 = vadd.f32 %v4141_v19, %v1630_v8  ;;  %1999 = vmatmul.f32.gmra.mxu3 %v4297_v51  ;;  %v421_v17 = vmul.f32 %v4293_v27, %v4293_v27  ;;  %vm887_vm7 = vcmp.eq.f32.partialorder %v4289_v48, inf }
 0x1ee   :  { %2429 = vst [vmem:[#allocation8 + $0x40] sm:$0xff] %v1835_v7  ;;  %v864_v1 = vsel %vm863_vm3, %v4240_v61, %v862_v34  ;;  %v871_v52 = vmul.f32 0.5, %v870_v40  ;;  %v1976_v15 = vpop.f32.mrf.mxu3  ;;  %v4324_v40 = vld [vmem:[#allocation2 + $0x100] sm:$0xff]  ;;  %vm889_vm8 = vcmp.eq.f32.partialorder %v4289_v48, 0.0 }
 0x1ef   :  { %2493 = vst [vmem:[#allocation9 + $0x40] sm:$0xff] %v2044_v4  ;;  %1855 = vmatmul.f32.gmra.mxu0 %v1697_v56  ;;  %2064 = vmatmul.f32.gmra.mxu1 %v1697_v56  ;;  %v867_v29 = vsel %vm865_vm4, %v866_v16, %v864_v1 }
 0x1f0   :  { %2273 = vmatmul.f32.gmra.mxu2 %v1697_v56  ;;  %510 = vadd.xlane.f32.xlu1 %v421_v17  ;;  %v501_v58 = vpop.xlane.xlu0 %500  ;;  %v1437_v12 = vadd.f32 1e-06, %v867_v29  ;;  %v872_v21 = vsub.f32 1.5, %v871_v52  ;;  %2476 = vst [vmem:[#allocation8 + $0x1b8] sm:$0xff] %v1976_v15  ;;  %v1568_v56 = vmul.f32 %v4086_v18, %v4016_v33 }
 0x1f1   :  { %v186_v55 = vpop.xlane.xlu1 %185  ;;  %195 = vadd.xlane.f32.xlu2 %v4306_v13  ;;  %v4314_v61 = vmul.f32 0.007874016, %v501_v58 }
 0x1f2   :  { %v2866_v50 = vpop.eup %2865  ;;  %v294_v62 = vmul.f32 %v3269_v28, %v186_v55  ;;  %2869 = vrcp.f32 %v1437_v12  ;;  %v873_v32 = vmul.f32 %v2862_v14, %v872_v21 }
 0x1f3   :  { %v2868_v41 = vpop.eup %2867  ;;  %v881_v59 = vmul.f32 %v2866_v50, %v4289_v48  ;;  %2871 = vrsqrt.f32 %v4314_v61  ;;  %vm899_vm9 = vcmp.eq.f32.partialorder %v4314_v61, inf  ;;  %vm901_vm10 = vcmp.eq.f32.partialorder %v4314_v61, 0.0 }
 0x1f4   :  { %v4318_v45 = vsub.f32 %v4120_v6, %v294_v62  ;;  %v1631_v23 = vmul.f32 %v2868_v41, %v1567_v25  ;;  %v2253_v54 = vpop.f32.mrf.mxu2  ;;  %v874_v20 = vmul.f32 %v873_v32, %v4265_v9  ;;  %v878_v6 = vand.u32 2147483648, %v4265_v9 }
 0x1f5   :  { %v882_v8 = vmul.f32 %v2866_v50, %v881_v59  ;;  %2557 = vst [vmem:[#allocation11 + $0x40] sm:$0xff] %v2253_v54  ;;  %2163 = vmatmul.f32.vlgmr.msrb.gmra.mxu3 %v3729_v24  ;;  %v1838_v17 = vpop.f32.mrf.mxu0  ;;  %v2047_v16 = vpop.f32.mrf.mxu1 }
 0x1f6   :  { %v1698_v34 = vadd.f32 %v4141_v19, %v1631_v23  ;;  %v422_v14 = vmul.f32 %v4318_v45, %v4318_v45  ;;  %v876_v7 = vsel %vm875_vm5, %v4265_v9, %v874_v20  ;;  %2430 = vst [vmem:[#allocation8 + $0x48] sm:$0xff] %v1838_v17  ;;  %v1979_v62 = vpop.f32.mrf.mxu3 }
 0x1f7   :  { %v883_v4 = vmul.f32 0.5, %v882_v8  ;;  %v879_v1 = vsel %vm877_vm6, %v878_v6, %v876_v7  ;;  %2494 = vst [vmem:[#allocation9 + $0x48] sm:$0xff] %v2047_v16  ;;  %v1569_v6 = vmul.f32 %v4086_v18, %v4052_v36 }
 0x1f8   :  { %1858 = vmatmul.f32.gmra.mxu0 %v1698_v34  ;;  %2067 = vmatmul.f32.gmra.mxu1 %v1698_v34  ;;  %v2870_v52 = vpop.eup %2869  ;;  %v503_v29 = vpop.xlane.xlu2 %502  ;;  %v1438_v58 = vadd.f32 1e-06, %v879_v1  ;;  %2477 = vst [vmem:[#allocation8 + $0x1c0] sm:$0xff] %v1979_v62  ;;  %v4370_v62 = vld [vmem:[#allocation2 + $0x110] sm:$0xff] }
 0x1f9   :  { %2276 = vmatmul.f32.gmra.mxu2 %v1698_v34  ;;  %197 = vadd.xlane.f32.xlu1 %v4324_v40  ;;  %v188_v55 = vpop.xlane.xlu0 %187  ;;  %v884_v12 = vsub.f32 1.5, %v883_v4  ;;  %v2872_v21 = vpop.eup %2871  ;;  %v4335_v9 = vmul.f32 0.007874016, %v503_v29  ;;  %v1632_v25 = vmul.f32 %v2870_v52, %v1568_v56  ;;  %v4350_v34 = vld [vmem:[#allocation2 + $0x108] sm:$0xff] }
 0x1fa   :  { %512 = vadd.xlane.f32.xlu0 %v422_v14  ;;  %v295_v33 = vmul.f32 %v3269_v28, %v188_v55  ;;  %v893_v41 = vmul.f32 %v2872_v21, %v4314_v61  ;;  %2873 = vrcp.f32 %v1438_v58 }
 0x1fb   :  { %v885_v15 = vmul.f32 %v2866_v50, %v884_v12  ;;  %2875 = vrsqrt.f32 %v4335_v9  ;;  %v1699_v32 = vadd.f32 %v4141_v19, %v1632_v25  ;;  %v890_v50 = vand.u32 2147483648, %v4289_v48 }
 0x1fc   :  { %v4341_v59 = vsub.f32 %v4134_v49, %v295_v33  ;;  %v894_v54 = vmul.f32 %v2872_v21, %v893_v41  ;;  %v2256_v8 = vpop.f32.mrf.mxu2  ;;  %v902_v12 = vand.u32 2147483648, %v4314_v61  ;;  %vm911_vm11 = vcmp.eq.f32.partialorder %v4335_v9, inf }
 0x1fd   :  { %v886_v23 = vmul.f32 %v885_v15, %v4289_v48  ;;  %2166 = vmatmul.f32.gmra.mxu3 %v3763_v35  ;;  %2558 = vst [vmem:[#allocation11 + $0x48] sm:$0xff] %v2256_v8  ;;  %v4373_v15 = vld [vmem:[#allocation5] ss:$0 sm:$0xff]  ;;  %vm913_vm12 = vcmp.eq.f32.partialorder %v4335_v9, 0.0 }
 0x1fe   :  { %v423_v20 = vmul.f32 %v4341_v59, %v4341_v59  ;;  %v895_v14 = vmul.f32 0.5, %v894_v54  ;;  %v1982_v29 = vpop.f32.mrf.mxu3 }
 0x1ff   :  { %v888_v49 = vsel %vm887_vm7, %v4289_v48, %v886_v23  ;;  %2478 = vst [vmem:[#allocation8 + $0x1c8] sm:$0xff] %v1982_v29 }
 0x200   :  { %1861 = vmatmul.f32.gmra.mxu0 %v1699_v32  ;;  %2070 = vmatmul.f32.gmra.mxu1 %v1699_v32  ;;  %v891_v7 = vsel %vm889_vm8, %v890_v50, %v888_v49  ;;  %v2874_v4 = vpop.eup %2873  ;;  %v190_v56 = vpop.xlane.xlu2 %189  ;;  %v896_v16 = vsub.f32 1.5, %v895_v14 }
 0x201   :  { %2279 = vmatmul.f32.gmra.mxu2 %v1699_v32  ;;  %514 = vadd.xlane.f32.xlu2 %v423_v20  ;;  %v1439_v17 = vadd.f32 1e-06, %v891_v7  ;;  %v2876_v1 = vpop.eup %2875  ;;  %v296_v52 = vmul.f32 %v3269_v28, %v190_v56  ;;  %v1633_v48 = vmul.f32 %v2874_v4, %v1569_v6  ;;  %v1570_v32 = vmul.f32 %v4373_v15, %v4092_v44  ;;  %v4384_v7 = vld [vmem:[#allocation2 + $0x118] sm:$0xff] }
 0x202   :  { %199 = vadd.xlane.f32.xlu0 %v4350_v34  ;;  %v905_v55 = vmul.f32 %v2876_v1, %v4335_v9  ;;  %v897_v36 = vmul.f32 %v2872_v21, %v896_v16  ;;  %v914_v44 = vand.u32 2147483648, %v4335_v9  ;;  %v1571_v56 = vmul.f32 %v4373_v15, %v4118_v43 }
 0x203   :  { %2877 = vrcp.f32 %v1439_v17  ;;  %v4360_v18 = vsub.f32 %v4150_v26, %v296_v52  ;;  %v1700_v58 = vadd.f32 %v4141_v19, %v1633_v48 }
 0x204   :  { %v898_v33 = vmul.f32 %v897_v36, %v4314_v61  ;;  %v906_v25 = vmul.f32 %v2876_v1, %v905_v55  ;;  %v4397_v36 = vld [vmem:[%s4861_s2] ss:$0 sm:$0xff] }
 0x205   :  { %2169 = vmatmul.f32.gmra.mxu3 %v3814_v39  ;;  %v424_v21 = vmul.f32 %v4360_v18, %v4360_v18 }
 0x206   :  { %v900_v26 = vsel %vm899_vm9, %v4314_v61, %v898_v33  ;;  %v907_v41 = vmul.f32 0.5, %v906_v25  ;;  %v1985_v49 = vpop.f32.mrf.mxu3 }
 0x207   :  { %v903_v23 = vsel %vm901_vm10, %v902_v12, %v900_v26  ;;  %516 = vadd.xlane.f32.xlu1 %v424_v21  ;;  %2479 = vst [vmem:[#allocation8 + $0x1d0] sm:$0xff] %v1985_v49 }
 0x208   :  { %1864 = vmatmul.f32.gmra.mxu0 %v1700_v58  ;;  %2073 = vmatmul.f32.gmra.mxu1 %v1700_v58  ;;  %v1440_v20 = vadd.f32 1e-06, %v903_v23  ;;  %v908_v50 = vsub.f32 1.5, %v907_v41 }
 0x209   :  { %v2878_v54 = vpop.eup %2877  ;;  %2282 = vmatmul.f32.gmra.mxu2 %v1700_v58  ;;  %201 = vadd.xlane.f32.xlu2 %v4370_v62 }
 0x20a   :  { %v1634_v8 = vmul.f32 %v2878_v54, %v1570_v32  ;;  %2879 = vrcp.f32 %v1440_v20  ;;  %v909_v61 = vmul.f32 %v2876_v1, %v908_v50 }
 0x20c   :  { %v1701_v14 = vadd.f32 %v4141_v19, %v1634_v8  ;;  %v910_v6 = vmul.f32 %v909_v61, %v4335_v9 }
 0x20d   :  { %2172 = vmatmul.f32.gmra.mxu3 %v3857_v42 }
 0x20e   :  { %v912_v4 = vsel %vm911_vm11, %v4335_v9, %v910_v6  ;;  %v1988_v48 = vpop.f32.mrf.mxu3  ;;  %v1572_v9 = vmul.f32 %v4373_v15, %v4132_v46 }
 0x20f   :  { %v915_v17 = vsel %vm913_vm12, %v914_v44, %v912_v4  ;;  %203 = vadd.xlane.f32.xlu1 %v4384_v7  ;;  %2480 = vst [vmem:[#allocation8 + $0x1d8] sm:$0xff] %v1988_v48 }
 0x210   :  { %1867 = vmatmul.f32.gmra.mxu0 %v1701_v14  ;;  %2076 = vmatmul.f32.gmra.mxu1 %v1701_v14  ;;  %v2880_v16 = vpop.eup %2879  ;;  %v1441_v1 = vadd.f32 1e-06, %v915_v17 }
 0x211   :  { %2285 = vmatmul.f32.gmra.mxu2 %v1701_v14  ;;  %v1635_v52 = vmul.f32 %v2880_v16, %v1571_v56 }
 0x212   :  { %2881 = vrcp.f32 %v1441_v1 }
 0x213   :  { %v1702_v29 = vadd.f32 %v4141_v19, %v1635_v52 }
 0x215   :  { %2175 = vmatmul.f32.gmra.mxu3 %v3915_v2 }
 0x218   :  { %1870 = vmatmul.f32.gmra.mxu0 %v1702_v29  ;;  %2079 = vmatmul.f32.gmra.mxu1 %v1702_v29  ;;  %v2882_v43 = vpop.eup %2881 }
 0x219   :  { %2288 = vmatmul.f32.gmra.mxu2 %v1702_v29  ;;  %v1636_v55 = vmul.f32 %v2882_v43, %v1572_v9 }
 0x21b   :  { %v1703_v58 = vadd.f32 %v4397_v36, %v1636_v55 }
 0x21d   :  { %2178 = vmatmul.f32.gmra.mxu3 %v3967_v37 }
 0x220   :  { %1873 = vmatmul.f32.gmra.mxu0 %v1703_v58  ;;  %2082 = vmatmul.f32.gmra.mxu1 %v1703_v58 }
 0x221   :  { %2291 = vmatmul.f32.gmra.mxu2 %v1703_v58  ;;  %v1841_v19 = vpop.f32.mrf.mxu0  ;;  %v2050_v12 = vpop.f32.mrf.mxu1 }
 0x222   :  { %2431 = vst [vmem:[#allocation8 + $0x50] sm:$0xff] %v1841_v19 }
 0x223   :  { %2495 = vst [vmem:[#allocation9 + $0x50] sm:$0xff] %v2050_v12 }
 0x225   :  { %2181 = vmatmul.f32.gmra.mxu3 %v4009_v5 }
 0x228   :  { %v2259_v46 = vpop.f32.mrf.mxu2 }
 0x229   :  { %2559 = vst [vmem:[#allocation11 + $0x50] sm:$0xff] %v2259_v46 }
 0x22d   :  { %2184 = vmatmul.f32.gmra.mxu3 %v4072_v22 }
 0x232   :  { %v1844_v33 = vpop.f32.mrf.mxu0  ;;  %v2053_v25 = vpop.f32.mrf.mxu1 }
 0x233   :  { %2432 = vst [vmem:[#allocation8 + $0x58] sm:$0xff] %v1844_v33 }
 0x234   :  { %2496 = vst [vmem:[#allocation9 + $0x58] sm:$0xff] %v2053_v25 }
 0x235   :  { %2187 = vmatmul.f32.gmra.mxu3 %v4107_v0 }
 0x239   :  { %v2262_v21 = vpop.f32.mrf.mxu2 }
 0x23a   :  { %2560 = vst [vmem:[#allocation11 + $0x58] sm:$0xff] %v2262_v21  ;;  %v4426_v21 = vld [vmem:[#allocation2 + $0x120] sm:$0xff] }
 0x23d   :  { %v1847_v26 = vpop.f32.mrf.mxu0  ;;  %v2056_v41 = vpop.f32.mrf.mxu1  ;;  %2190 = vmatmul.f32.gmra.mxu3 %v4123_v10 }
 0x23e   :  { %2433 = vst [vmem:[#allocation8 + $0x60] sm:$0xff] %v1847_v26 }
 0x23f   :  { %2497 = vst [vmem:[#allocation9 + $0x60] sm:$0xff] %v2056_v41 }
 0x240   :  { %v1991_v32 = vpop.f32.mrf.mxu3 }
 0x241   :  { %2481 = vst [vmem:[#allocation8 + $0x1e0] sm:$0xff] %v1991_v32 }
 0x244   :  { %v2265_v23 = vpop.f32.mrf.mxu2 }
 0x245   :  { %2561 = vst [vmem:[#allocation11 + $0x60] sm:$0xff] %v2265_v23  ;;  %2193 = vmatmul.f32.gmra.mxu3 %v4144_v57 }
 0x24a   :  { %v505_v54 = vpop.xlane.xlu1 %504 }
 0x24b   :  { %v610_v20 = vmul.f32 0.007874016, %v505_v54 }
 0x24d   :  { %2883 = vrsqrt.f32 %v610_v20  ;;  %2196 = vmatmul.f32.gmra.mxu3 %v4153_v31  ;;  %vm923_vm13 = vcmp.eq.f32.partialorder %v610_v20, inf  ;;  %v926_v26 = vand.u32 2147483648, %v610_v20  ;;  %vm925_vm14 = vcmp.eq.f32.partialorder %v610_v20, 0.0 }
 0x251   :  { %v1994_v50 = vpop.f32.mrf.mxu3 }
 0x252   :  { %2482 = vst [vmem:[#allocation8 + $0x1e8] sm:$0xff] %v1994_v50  ;;  %v1850_v8 = vpop.f32.mrf.mxu0  ;;  %v2059_v49 = vpop.f32.mrf.mxu1 }
 0x253   :  { %v2884_v61 = vpop.eup %2883  ;;  %2434 = vst [vmem:[#allocation8 + $0x68] sm:$0xff] %v1850_v8  ;;  %v192_v14 = vpop.xlane.xlu1 %191 }
 0x254   :  { %v507_v44 = vpop.xlane.xlu0 %506  ;;  %v917_v6 = vmul.f32 %v2884_v61, %v610_v20  ;;  %2498 = vst [vmem:[#allocation9 + $0x68] sm:$0xff] %v2059_v49  ;;  %v297_v4 = vmul.f32 %v3269_v28, %v192_v14 }
 0x255   :  { %v4408_v56 = vmul.f32 0.007874016, %v507_v44  ;;  %2199 = vmatmul.f32.gmra.mxu3 %v4180_v30 }
 0x256   :  { %v4412_v17 = vsub.f32 %v4248_v11, %v297_v4  ;;  %v918_v16 = vmul.f32 %v2884_v61, %v917_v6 }
 0x257   :  { %2885 = vrsqrt.f32 %v4408_v56  ;;  %vm935_vm15 = vcmp.eq.f32.partialorder %v4408_v56, inf  ;;  %vm937_vm0 = vcmp.eq.f32.partialorder %v4408_v56, 0.0 }
 0x258   :  { %v425_v1 = vmul.f32 %v4412_v17, %v4412_v17  ;;  %v919_v52 = vmul.f32 0.5, %v918_v16 }
 0x259   :  { %v2268_v48 = vpop.f32.mrf.mxu2 }
 0x25a   :  { %2562 = vst [vmem:[#allocation11 + $0x68] sm:$0xff] %v2268_v48  ;;  %518 = vadd.xlane.f32.xlu0 %v425_v1  ;;  %v920_v29 = vsub.f32 1.5, %v919_v52  ;;  %v4437_v52 = vld [vmem:[#allocation2 + $0x128] sm:$0xff] }
 0x25b   :  { %v509_v58 = vpop.xlane.xlu2 %508 }
 0x25c   :  { %v1997_v9 = vpop.f32.mrf.mxu3  ;;  %v194_v43 = vpop.xlane.xlu0 %193  ;;  %v921_v11 = vmul.f32 %v2884_v61, %v920_v29  ;;  %v4419_v46 = vmul.f32 0.007874016, %v509_v58 }
 0x25d   :  { %v2886_v55 = vpop.eup %2885  ;;  %2483 = vst [vmem:[#allocation8 + $0x1f0] sm:$0xff] %v1997_v9  ;;  %v298_v19 = vmul.f32 %v3269_v28, %v194_v43  ;;  %2202 = vmatmul.f32.gmra.mxu3 %v4212_v3  ;;  %v938_v9 = vand.u32 2147483648, %v4408_v56 }
 0x25e   :  { %v929_v12 = vmul.f32 %v2886_v55, %v4408_v56  ;;  %v922_v25 = vmul.f32 %v921_v11, %v610_v20  ;;  %2887 = vrsqrt.f32 %v4419_v46  ;;  %vm947_vm1 = vcmp.eq.f32.partialorder %v4419_v46, inf }
 0x25f   :  { %v4423_v33 = vsub.f32 %v4274_v53, %v298_v19  ;;  %vm949_vm2 = vcmp.eq.f32.partialorder %v4419_v46, 0.0 }
 0x260   :  { %v930_v41 = vmul.f32 %v2886_v55, %v929_v12  ;;  %v924_v23 = vsel %vm923_vm13, %v610_v20, %v922_v25 }
 0x261   :  { %v426_v32 = vmul.f32 %v4423_v33, %v4423_v33  ;;  %v927_v54 = vsel %vm925_vm14, %v926_v26, %v924_v23 }
 0x262   :  { %v931_v50 = vmul.f32 0.5, %v930_v41  ;;  %205 = vadd.xlane.f32.xlu0 %v4426_v21  ;;  %v1442_v53 = vadd.f32 1e-06, %v927_v54 }
 0x263   :  { %520 = vadd.xlane.f32.xlu2 %v426_v32  ;;  %v511_v8 = vpop.xlane.xlu1 %510 }
 0x264   :  { %v932_v49 = vsub.f32 1.5, %v931_v50  ;;  %v1853_v61 = vpop.f32.mrf.mxu0  ;;  %v2062_v14 = vpop.f32.mrf.mxu1  ;;  %v4431_v44 = vmul.f32 0.007874016, %v511_v8  ;;  %2889 = vrcp.f32 %v1442_v53 }
 0x265   :  { %v2888_v6 = vpop.eup %2887  ;;  %2435 = vst [vmem:[#allocation8 + $0x70] sm:$0xff] %v1853_v61  ;;  %v196_v4 = vpop.xlane.xlu2 %195  ;;  %2205 = vmatmul.f32.gmra.mxu3 %v4234_v63 }
 0x266   :  { %v933_v16 = vmul.f32 %v2886_v55, %v932_v49  ;;  %v941_v20 = vmul.f32 %v2888_v6, %v4419_v46  ;;  %2499 = vst [vmem:[#allocation9 + $0x70] sm:$0xff] %v2062_v14  ;;  %2891 = vrsqrt.f32 %v4431_v44  ;;  %v299_v1 = vmul.f32 %v3269_v28, %v196_v4 }
 0x267   :  { %v1573_v55 = vmul.f32 %v4373_v15, %v4225_v47  ;;  %vm959_vm3 = vcmp.eq.f32.partialorder %v4431_v44, inf  ;;  %vm961_vm4 = vcmp.eq.f32.partialorder %v4431_v44, 0.0 }
 0x268   :  { %v934_v48 = vmul.f32 %v933_v16, %v4408_v56  ;;  %v4441_v29 = vsub.f32 %v4306_v13, %v299_v1  ;;  %v942_v43 = vmul.f32 %v2888_v6, %v941_v20 }
 0x26a   :  { %v936_v58 = vsel %vm935_vm15, %v4408_v56, %v934_v48  ;;  %v2890_v19 = vpop.eup %2889  ;;  %v427_v11 = vmul.f32 %v4441_v29, %v4441_v29  ;;  %v943_v12 = vmul.f32 0.5, %v942_v43  ;;  %v1574_v43 = vmul.f32 %v4373_v15, %v4246_v60 }
 0x26b   :  { %207 = vadd.xlane.f32.xlu2 %v4437_v52  ;;  %v939_v13 = vsel %vm937_vm0, %v938_v9, %v936_v58  ;;  %v2271_v25 = vpop.f32.mrf.mxu2  ;;  %v1637_v41 = vmul.f32 %v2890_v19, %v1573_v55  ;;  %v4465_v9 = vld [vmem:[#allocation2 + $0x130] sm:$0xff] }
 0x26c   :  { %v198_v26 = vpop.xlane.xlu1 %197  ;;  %v1443_v32 = vadd.f32 1e-06, %v939_v13  ;;  %v2892_v23 = vpop.eup %2891  ;;  %2563 = vst [vmem:[#allocation11 + $0x70] sm:$0xff] %v2271_v25  ;;  %522 = vadd.xlane.f32.xlu1 %v427_v11  ;;  %v944_v56 = vsub.f32 1.5, %v943_v12 }
 0x26d   :  { %v1856_v47 = vpop.f32.mrf.mxu0  ;;  %v2065_v54 = vpop.f32.mrf.mxu1  ;;  %v300_v50 = vmul.f32 %v3269_v28, %v198_v26  ;;  %v953_v53 = vmul.f32 %v2892_v23, %v4431_v44  ;;  %2208 = vmatmul.f32.gmra.mxu3 %v4297_v51  ;;  %v1704_v49 = vadd.f32 %v4397_v36, %v1637_v41 }
 0x26e   :  { %2436 = vst [vmem:[#allocation8 + $0x78] sm:$0xff] %v1856_v47  ;;  %v513_v8 = vpop.xlane.xlu0 %512  ;;  %2893 = vrcp.f32 %v1443_v32  ;;  %v945_v4 = vmul.f32 %v2888_v6, %v944_v56 }
 0x26f   :  { %2500 = vst [vmem:[#allocation9 + $0x78] sm:$0xff] %v2065_v54  ;;  %v4457_v61 = vsub.f32 %v4324_v40, %v300_v50  ;;  %v4459_v14 = vmul.f32 0.007874016, %v513_v8  ;;  %1876 = vmatmul.f32.gmra.mxu0 %v1704_v49  ;;  %2085 = vmatmul.f32.gmra.mxu1 %v1704_v49  ;;  %v954_v16 = vmul.f32 %v2892_v23, %v953_v53  ;;  %v950_v40 = vand.u32 2147483648, %v4419_v46  ;;  %v4481_v8 = vld [vmem:[#allocation2 + $0x138] sm:$0xff] }
 0x270   :  { %2294 = vmatmul.f32.gmra.mxu2 %v1704_v49  ;;  %v2000_v20 = vpop.f32.mrf.mxu3  ;;  %v946_v48 = vmul.f32 %v945_v4, %v4419_v46 }
 0x271   :  { %2895 = vrsqrt.f32 %v4459_v14  ;;  %v428_v1 = vmul.f32 %v4457_v61, %v4457_v61  ;;  %2484 = vst [vmem:[#allocation8 + $0x1f8] sm:$0xff] %v2000_v20  ;;  %v955_v6 = vmul.f32 0.5, %v954_v16  ;;  %vm971_vm5 = vcmp.eq.f32.partialorder %v4459_v14, inf }
 0x272   :  { %v948_v55 = vsel %vm947_vm1, %v4419_v46, %v946_v48  ;;  %vm973_vm6 = vcmp.eq.f32.partialorder %v4459_v14, 0.0 }
 0x273   :  { %524 = vadd.xlane.f32.xlu0 %v428_v1  ;;  %v2274_v19 = vpop.f32.mrf.mxu2  ;;  %v951_v13 = vsel %vm949_vm2, %v950_v40, %v948_v55  ;;  %v956_v12 = vsub.f32 1.5, %v955_v6 }
 0x274   :  { %v2894_v58 = vpop.eup %2893  ;;  %v515_v11 = vpop.xlane.xlu2 %514  ;;  %2564 = vst [vmem:[#allocation11 + $0x78] sm:$0xff] %v2274_v19  ;;  %209 = vadd.xlane.f32.xlu1 %v4465_v9  ;;  %v1444_v47 = vadd.f32 1e-06, %v951_v13 }
 0x275   :  { %v1859_v25 = vpop.f32.mrf.mxu0  ;;  %v2068_v26 = vpop.f32.mrf.mxu1  ;;  %v4474_v41 = vmul.f32 0.007874016, %v515_v11  ;;  %v1638_v32 = vmul.f32 %v2894_v58, %v1574_v43  ;;  %2372 = vmatmul.f32.vlgmr.msra.gmra.mxu3 %v3729_v24  ;;  %v957_v54 = vmul.f32 %v2892_v23, %v956_v12  ;;  %v962_v23 = vand.u32 2147483648, %v4431_v44 }
 0x276   :  { %2437 = vst [vmem:[#allocation8 + $0x80] sm:$0xff] %v1859_v25  ;;  %v200_v60 = vpop.xlane.xlu0 %199  ;;  %v1575_v58 = vmul.f32 %v4373_v15, %v4271_v38 }
 0x277   :  { %v2896_v46 = vpop.eup %2895  ;;  %2501 = vst [vmem:[#allocation9 + $0x80] sm:$0xff] %v2068_v26  ;;  %2897 = vrsqrt.f32 %v4474_v41  ;;  %v301_v50 = vmul.f32 %v3269_v28, %v200_v60  ;;  %v1705_v56 = vadd.f32 %v4397_v36, %v1638_v32  ;;  %v958_v49 = vmul.f32 %v957_v54, %v4431_v44 }
 0x278   :  { %v965_v53 = vmul.f32 %v2896_v46, %v4459_v14  ;;  %2899 = vrcp.f32 %v1444_v47  ;;  %v2164_v24 = vpop.f32.mrf.mxu3  ;;  %vm983_vm7 = vcmp.eq.f32.partialorder %v4474_v41, inf  ;;  %vm985_vm8 = vcmp.eq.f32.partialorder %v4474_v41, 0.0 }
 0x279   :  { %v4485_v4 = vsub.f32 %v4350_v34, %v301_v50  ;;  %1879 = vmatmul.f32.gmra.mxu0 %v1705_v56  ;;  %2088 = vmatmul.f32.gmra.mxu1 %v1705_v56  ;;  %2533 = vst [vmem:[#allocation9 + $0x180] sm:$0xff] %v2164_v24  ;;  %v960_v16 = vsel %vm959_vm3, %v4431_v44, %v958_v49 }
 0x27a   :  { %2297 = vmatmul.f32.gmra.mxu2 %v1705_v56  ;;  %v966_v20 = vmul.f32 %v2896_v46, %v965_v53  ;;  %v963_v1 = vsel %vm961_vm4, %v962_v23, %v960_v16  ;;  %v517_v40 = vpop.xlane.xlu1 %516  ;;  %v4506_v53 = vld [vmem:[#allocation2 + $0x140] sm:$0xff]  ;;  %v1576_v24 = vmul.f32 %v4373_v15, %v4293_v27 }
 0x27b   :  { %211 = vadd.xlane.f32.xlu0 %v4481_v8  ;;  %v429_v34 = vmul.f32 %v4485_v4, %v4485_v4  ;;  %v1445_v6 = vadd.f32 1e-06, %v963_v1  ;;  %v4496_v19 = vmul.f32 0.007874016, %v517_v40 }
 0x27c   :  { %v2277_v48 = vpop.f32.mrf.mxu2  ;;  %v967_v43 = vmul.f32 0.5, %v966_v20  ;;  %v202_v25 = vpop.xlane.xlu2 %201 }
 0x27d   :  { %v2898_v55 = vpop.eup %2897  ;;  %2565 = vst [vmem:[#allocation11 + $0x80] sm:$0xff] %v2277_v48  ;;  %526 = vadd.xlane.f32.xlu2 %v429_v34  ;;  %v1862_v44 = vpop.f32.mrf.mxu0  ;;  %2375 = vmatmul.f32.gmra.mxu3 %v3763_v35  ;;  %2901 = vrcp.f32 %v1445_v6  ;;  %v302_v38 = vmul.f32 %v3269_v28, %v202_v25  ;;  %v986_v25 = vand.u32 2147483648, %v4474_v41  ;;  %vm995_vm9 = vcmp.eq.f32.partialorder %v4496_v19, inf }
 0x27e   :  { %v2071_v11 = vpop.f32.mrf.mxu1  ;;  %v2900_v13 = vpop.eup %2899  ;;  %v977_v12 = vmul.f32 %v2898_v55, %v4474_v41  ;;  %2438 = vst [vmem:[#allocation8 + $0x88] sm:$0xff] %v1862_v44  ;;  %v968_v26 = vsub.f32 1.5, %v967_v43  ;;  %2903 = vrsqrt.f32 %v4496_v19  ;;  %vm997_vm10 = vcmp.eq.f32.partialorder %v4496_v19, 0.0 }
 0x27f   :  { %2502 = vst [vmem:[#allocation9 + $0x88] sm:$0xff] %v2071_v11  ;;  %v1639_v32 = vmul.f32 %v2900_v13, %v1575_v58  ;;  %v4503_v54 = vsub.f32 %v4370_v62, %v302_v38  ;;  %v974_v62 = vand.u32 2147483648, %v4459_v14 }
 0x280   :  { %v969_v47 = vmul.f32 %v2896_v46, %v968_v26  ;;  %v978_v60 = vmul.f32 %v2898_v55, %v977_v12  ;;  %v2167_v56 = vpop.f32.mrf.mxu3 }
 0x281   :  { %v1706_v50 = vadd.f32 %v4397_v36, %v1639_v32  ;;  %2534 = vst [vmem:[#allocation9 + $0x188] sm:$0xff] %v2167_v56  ;;  %v430_v46 = vmul.f32 %v4503_v54, %v4503_v54 }
 0x282   :  { %v970_v35 = vmul.f32 %v969_v47, %v4459_v14  ;;  %v979_v49 = vmul.f32 0.5, %v978_v60  ;;  %v204_v20 = vpop.xlane.xlu1 %203 }
 0x283   :  { %1882 = vmatmul.f32.gmra.mxu0 %v1706_v50  ;;  %2091 = vmatmul.f32.gmra.mxu1 %v1706_v50  ;;  %v2902_v23 = vpop.eup %2901  ;;  %v303_v27 = vmul.f32 %v3269_v28, %v204_v20 }
 0x284   :  { %2300 = vmatmul.f32.gmra.mxu2 %v1706_v50  ;;  %v2280_v16 = vpop.f32.mrf.mxu2  ;;  %v972_v34 = vsel %vm971_vm5, %v4459_v14, %v970_v35  ;;  %v980_v1 = vsub.f32 1.5, %v979_v49  ;;  %v2904_v48 = vpop.eup %2903  ;;  %528 = vadd.xlane.f32.xlu1 %v430_v46  ;;  %v1640_v43 = vmul.f32 %v2902_v23, %v1576_v24  ;;  %v1577_v49 = vmul.f32 %v4373_v15, %v4318_v45 }
 0x285   :  { %2566 = vst [vmem:[#allocation11 + $0x88] sm:$0xff] %v2280_v16  ;;  %213 = vadd.xlane.f32.xlu2 %v4506_v53  ;;  %v1865_v40 = vpop.f32.mrf.mxu0  ;;  %v975_v58 = vsel %vm973_vm6, %v974_v62, %v972_v34  ;;  %v989_v44 = vmul.f32 %v2904_v48, %v4496_v19  ;;  %2378 = vmatmul.f32.gmra.mxu3 %v3814_v39  ;;  %v998_v16 = vand.u32 2147483648, %v4496_v19 }
 0x286   :  { %v2074_v6 = vpop.f32.mrf.mxu1  ;;  %2439 = vst [vmem:[#allocation8 + $0x90] sm:$0xff] %v1865_v40  ;;  %v1446_v11 = vadd.f32 1e-06, %v975_v58  ;;  %v981_v13 = vmul.f32 %v2898_v55, %v980_v1  ;;  %v4522_v14 = vsub.f32 %v4384_v7, %v303_v27  ;;  %v1707_v12 = vadd.f32 %v4397_v36, %v1640_v43  ;;  %v4531_v7 = vld [vmem:[#allocation2 + $0x148] sm:$0xff]  ;;  %v4543_v1 = vld [vmem:[#allocation2 + $0x150] sm:$0xff] }
 0x287   :  { %2503 = vst [vmem:[#allocation9 + $0x90] sm:$0xff] %v2074_v6  ;;  %v990_v38 = vmul.f32 %v2904_v48, %v989_v44 }
 0x288   :  { %2905 = vrcp.f32 %v1446_v11  ;;  %v982_v26 = vmul.f32 %v981_v13, %v4474_v41  ;;  %v2170_v32 = vpop.f32.mrf.mxu3  ;;  %v431_v39 = vmul.f32 %v4522_v14, %v4522_v14  ;;  %v1579_v13 = vmul.f32 %v4373_v15, %v4360_v18 }
 0x289   :  { %2535 = vst [vmem:[#allocation9 + $0x190] sm:$0xff] %v2170_v32  ;;  %v991_v47 = vmul.f32 0.5, %v990_v38 }
 0x28a   :  { %v984_v55 = vsel %vm983_vm7, %v4474_v41, %v982_v26  ;;  %530 = vadd.xlane.f32.xlu0 %v431_v39 }
 0x28b   :  { %1885 = vmatmul.f32.gmra.mxu0 %v1707_v12  ;;  %2094 = vmatmul.f32.gmra.mxu1 %v1707_v12  ;;  %v987_v60 = vsel %vm985_vm8, %v986_v25, %v984_v55  ;;  %v992_v35 = vsub.f32 1.5, %v991_v47 }
 0x28c   :  { %2303 = vmatmul.f32.gmra.mxu2 %v1707_v12  ;;  %v2283_v50 = vpop.f32.mrf.mxu2  ;;  %v1447_v56 = vadd.f32 1e-06, %v987_v60  ;;  %215 = vadd.xlane.f32.xlu1 %v4531_v7 }
 0x28d   :  { %2567 = vst [vmem:[#allocation11 + $0x90] sm:$0xff] %v2283_v50  ;;  %v1868_v24 = vpop.f32.mrf.mxu0  ;;  %2381 = vmatmul.f32.gmra.mxu3 %v3857_v42  ;;  %v993_v41 = vmul.f32 %v2904_v48, %v992_v35  ;;  %v1578_v48 = vmul.f32 %v4373_v15, %v4341_v59 }
 0x28e   :  { %v2077_v46 = vpop.f32.mrf.mxu1  ;;  %v2906_v62 = vpop.eup %2905  ;;  %2440 = vst [vmem:[#allocation8 + $0x98] sm:$0xff] %v1868_v24  ;;  %2907 = vrcp.f32 %v1447_v56 }
 0x28f   :  { %2504 = vst [vmem:[#allocation9 + $0x98] sm:$0xff] %v2077_v46  ;;  %v1641_v23 = vmul.f32 %v2906_v62, %v1577_v49  ;;  %v994_v20 = vmul.f32 %v993_v41, %v4496_v19 }
 0x290   :  { %v2173_v34 = vpop.f32.mrf.mxu3 }
 0x291   :  { %v1708_v45 = vadd.f32 %v4397_v36, %v1641_v23  ;;  %2536 = vst [vmem:[#allocation9 + $0x198] sm:$0xff] %v2173_v34  ;;  %v996_v42 = vsel %vm995_vm9, %v4496_v19, %v994_v20 }
 0x292   :  { %v999_v27 = vsel %vm997_vm10, %v998_v16, %v996_v42  ;;  %217 = vadd.xlane.f32.xlu0 %v4543_v1 }
 0x293   :  { %1888 = vmatmul.f32.gmra.mxu0 %v1708_v45  ;;  %2097 = vmatmul.f32.gmra.mxu1 %v1708_v45  ;;  %v1448_v43 = vadd.f32 1e-06, %v999_v27 }
 0x294   :  { %v2908_v40 = vpop.eup %2907  ;;  %2306 = vmatmul.f32.gmra.mxu2 %v1708_v45  ;;  %v2286_v6 = vpop.f32.mrf.mxu2 }
 0x295   :  { %2568 = vst [vmem:[#allocation11 + $0x98] sm:$0xff] %v2286_v6  ;;  %v1871_v58 = vpop.f32.mrf.mxu0  ;;  %v1642_v11 = vmul.f32 %v2908_v40, %v1578_v48  ;;  %2384 = vmatmul.f32.gmra.mxu3 %v3915_v2  ;;  %2909 = vrcp.f32 %v1448_v43  ;;  %v4579_v6 = vld [vmem:[#allocation2 + $0x158] sm:$0xff] }
 0x296   :  { %v2080_v44 = vpop.f32.mrf.mxu1  ;;  %2441 = vst [vmem:[#allocation8 + $0xa0] sm:$0xff] %v1871_v58 }
 0x297   :  { %2505 = vst [vmem:[#allocation9 + $0xa0] sm:$0xff] %v2080_v44  ;;  %v1709_v59 = vadd.f32 %v4397_v36, %v1642_v11 }
 0x298   :  { %v2176_v19 = vpop.f32.mrf.mxu3 }
 0x299   :  { %2537 = vst [vmem:[#allocation9 + $0x1a0] sm:$0xff] %v2176_v19 }
 0x29b   :  { %1891 = vmatmul.f32.gmra.mxu0 %v1709_v59  ;;  %2100 = vmatmul.f32.gmra.mxu1 %v1709_v59  ;;  %v2910_v12 = vpop.eup %2909 }
 0x29c   :  { %2309 = vmatmul.f32.gmra.mxu2 %v1709_v59  ;;  %v2289_v25 = vpop.f32.mrf.mxu2  ;;  %v1643_v32 = vmul.f32 %v2910_v12, %v1579_v13 }
 0x29d   :  { %2569 = vst [vmem:[#allocation11 + $0xa0] sm:$0xff] %v2289_v25  ;;  %v1874_v26 = vpop.f32.mrf.mxu0  ;;  %2387 = vmatmul.f32.gmra.mxu3 %v3967_v37 }
 0x29e   :  { %v2083_v38 = vpop.f32.mrf.mxu1  ;;  %2442 = vst [vmem:[#allocation8 + $0xa8] sm:$0xff] %v1874_v26  ;;  %v1710_v2 = vadd.f32 %v4397_v36, %v1643_v32 }
 0x29f   :  { %2506 = vst [vmem:[#allocation9 + $0xa8] sm:$0xff] %v2083_v38 }
 0x2a0   :  { %v2179_v39 = vpop.f32.mrf.mxu3 }
 0x2a1   :  { %2538 = vst [vmem:[#allocation9 + $0x1a8] sm:$0xff] %v2179_v39 }
 0x2a3   :  { %1894 = vmatmul.f32.gmra.mxu0 %v1710_v2  ;;  %2103 = vmatmul.f32.gmra.mxu1 %v1710_v2 }
 0x2a4   :  { %2312 = vmatmul.f32.gmra.mxu2 %v1710_v2  ;;  %v2292_v18 = vpop.f32.mrf.mxu2 }
 0x2a5   :  { %2570 = vst [vmem:[#allocation11 + $0xa8] sm:$0xff] %v2292_v18  ;;  %2390 = vmatmul.f32.gmra.mxu3 %v4009_v5 }
 0x2a8   :  { %v2182_v55 = vpop.f32.mrf.mxu3 }
 0x2a9   :  { %2539 = vst [vmem:[#allocation9 + $0x1b0] sm:$0xff] %v2182_v55  ;;  %v4591_v55 = vld [vmem:[#allocation2 + $0x160] sm:$0xff] }
 0x2ad   :  { %2393 = vmatmul.f32.gmra.mxu3 %v4072_v22 }
 0x2b0   :  { %v2185_v47 = vpop.f32.mrf.mxu3 }
 0x2b1   :  { %2540 = vst [vmem:[#allocation9 + $0x1b8] sm:$0xff] %v2185_v47 }
 0x2b5   :  { %2396 = vmatmul.f32.gmra.mxu3 %v4107_v0 }
 0x2b8   :  { %v2188_v37 = vpop.f32.mrf.mxu3 }
 0x2b9   :  { %2541 = vst [vmem:[#allocation9 + $0x1c0] sm:$0xff] %v2188_v37 }
 0x2bd   :  { %2399 = vmatmul.f32.gmra.mxu3 %v4123_v10 }
 0x2c0   :  { %v2191_v60 = vpop.f32.mrf.mxu3 }
 0x2c1   :  { %2542 = vst [vmem:[#allocation9 + $0x1c8] sm:$0xff] %v2191_v60 }
 0x2c5   :  { %2402 = vmatmul.f32.gmra.mxu3 %v4144_v57 }
 0x2c8   :  { %v2194_v50 = vpop.f32.mrf.mxu3 }
 0x2c9   :  { %2543 = vst [vmem:[#allocation9 + $0x1d0] sm:$0xff] %v2194_v50 }
 0x2cd   :  { %v519_v56 = vpop.xlane.xlu0 %518  ;;  %2405 = vmatmul.f32.gmra.mxu3 %v4153_v31 }
 0x2ce   :  { %v617_v5 = vmul.f32 0.007874016, %v519_v56  ;;  %v1580_v56 = vmul.f32 %v4373_v15, %v4412_v17 }
 0x2d0   :  { %2911 = vrsqrt.f32 %v617_v5  ;;  %v2197_v22 = vpop.f32.mrf.mxu3  ;;  %vm1007_vm11 = vcmp.eq.f32.partialorder %v617_v5, inf  ;;  %v1010_v44 = vand.u32 2147483648, %v617_v5  ;;  %vm1009_vm12 = vcmp.eq.f32.partialorder %v617_v5, 0.0 }
 0x2d1   :  { %2544 = vst [vmem:[#allocation9 + $0x1d8] sm:$0xff] %v2197_v22 }
 0x2d5   :  { %v206_v49 = vpop.xlane.xlu0 %205  ;;  %2408 = vmatmul.f32.gmra.mxu3 %v4180_v30 }
 0x2d6   :  { %v521_v35 = vpop.xlane.xlu2 %520  ;;  %v2912_v0 = vpop.eup %2911  ;;  %v304_v10 = vmul.f32 %v3269_v28, %v206_v49 }
 0x2d7   :  { %v4562_v24 = vmul.f32 0.007874016, %v521_v35  ;;  %v1001_v46 = vmul.f32 %v2912_v0, %v617_v5 }
 0x2d8   :  { %v4567_v57 = vsub.f32 %v4426_v21, %v304_v10  ;;  %v2200_v31 = vpop.f32.mrf.mxu3 }
 0x2d9   :  { %2913 = vrsqrt.f32 %v4562_v24  ;;  %2545 = vst [vmem:[#allocation9 + $0x1e0] sm:$0xff] %v2200_v31  ;;  %v1002_v62 = vmul.f32 %v2912_v0, %v1001_v46  ;;  %vm1019_vm13 = vcmp.eq.f32.partialorder %v4562_v24, inf  ;;  %v1022_v37 = vand.u32 2147483648, %v4562_v24 }
 0x2da   :  { %v432_v41 = vmul.f32 %v4567_v57, %v4567_v57  ;;  %vm1021_vm14 = vcmp.eq.f32.partialorder %v4562_v24, 0.0 }
 0x2db   :  { %v1003_v23 = vmul.f32 0.5, %v1002_v62 }
 0x2dc   :  { %532 = vadd.xlane.f32.xlu2 %v432_v41 }
 0x2dd   :  { %2411 = vmatmul.f32.gmra.mxu3 %v4212_v3  ;;  %v1004_v16 = vsub.f32 1.5, %v1003_v23 }
 0x2de   :  { %v208_v30 = vpop.xlane.xlu2 %207 }
 0x2df   :  { %v2914_v20 = vpop.eup %2913  ;;  %v305_v45 = vmul.f32 %v3269_v28, %v208_v30  ;;  %v523_v42 = vpop.xlane.xlu1 %522  ;;  %v1005_v21 = vmul.f32 %v2912_v0, %v1004_v16 }
 0x2e0   :  { %v1013_v34 = vmul.f32 %v2914_v20, %v4562_v24  ;;  %v4574_v48 = vmul.f32 0.007874016, %v523_v42  ;;  %v2203_v40 = vpop.f32.mrf.mxu3 }
 0x2e1   :  { %v4577_v27 = vsub.f32 %v4437_v52, %v305_v45  ;;  %2546 = vst [vmem:[#allocation9 + $0x1e8] sm:$0xff] %v2203_v40  ;;  %v1006_v43 = vmul.f32 %v1005_v21, %v617_v5  ;;  %v4618_v40 = vld [vmem:[#allocation2 + $0x168] sm:$0xff] }
 0x2e2   :  { %v1014_v58 = vmul.f32 %v2914_v20, %v1013_v34  ;;  %2915 = vrsqrt.f32 %v4574_v48  ;;  %vm1031_vm15 = vcmp.eq.f32.partialorder %v4574_v48, inf  ;;  %vm1033_vm0 = vcmp.eq.f32.partialorder %v4574_v48, 0.0 }
 0x2e3   :  { %v433_v3 = vmul.f32 %v4577_v27, %v4577_v27  ;;  %v1008_v11 = vsel %vm1007_vm11, %v617_v5, %v1006_v43 }
 0x2e4   :  { %v1015_v59 = vmul.f32 0.5, %v1014_v58  ;;  %219 = vadd.xlane.f32.xlu2 %v4579_v6  ;;  %v1011_v52 = vsel %vm1009_vm12, %v1010_v44, %v1008_v11  ;;  %v1581_v58 = vmul.f32 %v4373_v15, %v4423_v33 }
 0x2e5   :  { %534 = vadd.xlane.f32.xlu1 %v433_v3  ;;  %2414 = vmatmul.f32.gmra.mxu3 %v4234_v63  ;;  %v1449_v13 = vadd.f32 1e-06, %v1011_v52  ;;  %v1034_v3 = vand.u32 2147483648, %v4574_v48 }
 0x2e6   :  { %v525_v19 = vpop.xlane.xlu0 %524  ;;  %v1016_v12 = vsub.f32 1.5, %v1015_v59 }
 0x2e7   :  { %v4586_v25 = vmul.f32 0.007874016, %v525_v19  ;;  %v210_v26 = vpop.xlane.xlu1 %209  ;;  %2917 = vrcp.f32 %v1449_v13 }
 0x2e8   :  { %v1017_v38 = vmul.f32 %v2914_v20, %v1016_v12  ;;  %v2916_v32 = vpop.eup %2915  ;;  %v306_v2 = vmul.f32 %v3269_v28, %v210_v26  ;;  %v2206_v39 = vpop.f32.mrf.mxu3 }
 0x2e9   :  { %2919 = vrsqrt.f32 %v4586_v25  ;;  %v1025_v18 = vmul.f32 %v2916_v32, %v4574_v48  ;;  %2547 = vst [vmem:[#allocation9 + $0x1f0] sm:$0xff] %v2206_v39  ;;  %vm1043_vm1 = vcmp.eq.f32.partialorder %v4586_v25, inf  ;;  %vm1045_vm2 = vcmp.eq.f32.partialorder %v4586_v25, 0.0 }
 0x2ea   :  { %v1018_v63 = vmul.f32 %v1017_v38, %v4562_v24  ;;  %v4595_v47 = vsub.f32 %v4465_v9, %v306_v2 }
 0x2eb   :  { %v1026_v50 = vmul.f32 %v2916_v32, %v1025_v18 }
 0x2ec   :  { %v1020_v60 = vsel %vm1019_vm13, %v4562_v24, %v1018_v63  ;;  %v434_v5 = vmul.f32 %v4595_v47, %v4595_v47  ;;  %v1877_v22 = vpop.f32.mrf.mxu0  ;;  %v2086_v9 = vpop.f32.mrf.mxu1 }
 0x2ed   :  { %221 = vadd.xlane.f32.xlu1 %v4591_v55  ;;  %v1023_v35 = vsel %vm1021_vm14, %v1022_v37, %v1020_v60  ;;  %v2918_v49 = vpop.eup %2917  ;;  %2443 = vst [vmem:[#allocation8 + $0xb0] sm:$0xff] %v1877_v22  ;;  %2417 = vmatmul.f32.gmra.mxu3 %v4297_v51  ;;  %v1027_v46 = vmul.f32 0.5, %v1026_v50  ;;  %v4633_v37 = vld [vmem:[#allocation2 + $0x170] sm:$0xff] }
 0x2ee   :  { %v212_v0 = vpop.xlane.xlu0 %211  ;;  %v1450_v10 = vadd.f32 1e-06, %v1023_v35  ;;  %536 = vadd.xlane.f32.xlu0 %v434_v5  ;;  %2507 = vst [vmem:[#allocation9 + $0xb0] sm:$0xff] %v2086_v9  ;;  %v1644_v31 = vmul.f32 %v2918_v49, %v1580_v56  ;;  %v1046_v56 = vand.u32 2147483648, %v4586_v25 }
 0x2ef   :  { %v2920_v24 = vpop.eup %2919  ;;  %v307_v17 = vmul.f32 %v3269_v28, %v212_v0  ;;  %v1028_v23 = vsub.f32 1.5, %v1027_v46  ;;  %v4647_v0 = vld [vmem:[#allocation5] ss:$0 sm:$0xff] }
 0x2f0   :  { %v1037_v62 = vmul.f32 %v2920_v24, %v4586_v25  ;;  %v527_v41 = vpop.xlane.xlu2 %526  ;;  %2921 = vrcp.f32 %v1450_v10  ;;  %v2209_v20 = vpop.f32.mrf.mxu3  ;;  %v1711_v51 = vadd.f32 %v4397_v36, %v1644_v31  ;;  %v1582_v10 = vmul.f32 %v4647_v0, %v4441_v29 }
 0x2f1   :  { %v4609_v30 = vmul.f32 0.007874016, %v527_v41  ;;  %v4612_v16 = vsub.f32 %v4481_v8, %v307_v17  ;;  %2548 = vst [vmem:[#allocation9 + $0x1f8] sm:$0xff] %v2209_v20  ;;  %v1029_v45 = vmul.f32 %v2916_v32, %v1028_v23 }
 0x2f2   :  { %v1038_v34 = vmul.f32 %v2920_v24, %v1037_v62  ;;  %1897 = vmatmul.f32.gmra.mxu0 %v1711_v51  ;;  %2106 = vmatmul.f32.gmra.mxu1 %v1711_v51 }
 0x2f3   :  { %2923 = vrsqrt.f32 %v4609_v30  ;;  %v435_v42 = vmul.f32 %v4612_v16, %v4612_v16  ;;  %2315 = vmatmul.f32.gmra.mxu2 %v1711_v51  ;;  %v2295_v21 = vpop.f32.mrf.mxu2  ;;  %v1030_v8 = vmul.f32 %v1029_v45, %v4574_v48  ;;  %vm1055_vm3 = vcmp.eq.f32.partialorder %v4609_v30, inf }
 0x2f4   :  { %v1039_v43 = vmul.f32 0.5, %v1038_v34  ;;  %2571 = vst [vmem:[#allocation11 + $0xb0] sm:$0xff] %v2295_v21  ;;  %v4662_v21 = vld [vmem:[%s4861_s2] ss:$0 sm:$0xff]  ;;  %vm1057_vm4 = vcmp.eq.f32.partialorder %v4609_v30, 0.0  ;;  %s3162_s2 = smov [#allocation8]  }
 0x2f5   :  { %538 = vadd.xlane.f32.xlu2 %v435_v42  ;;  %v1032_v52 = vsel %vm1031_vm15, %v4574_v48, %v1030_v8  ;;  %s2617_s21 = sshll.u32 %s3162_s2, 4  ;;  %s2618_s21 = int_to_ptr.vmem [resolvable:$true] %s2617_s21 }
 0x2f6   :  { %v2922_v44 = vpop.eup %2921  ;;  %v1880_v11 = vpop.f32.mrf.mxu0  ;;  %v1040_v19 = vsub.f32 1.5, %v1039_v43  ;;  %223 = vadd.xlane.f32.xlu0 %v4618_v40  ;;  %v1035_v12 = vsel %vm1033_vm0, %v1034_v3, %v1032_v52  ;;  %v4665_v43 = vld [vmem:[#allocation2 + $0x178] sm:$0xff] }
 0x2f7   :  { %v2089_v59 = vpop.f32.mrf.mxu1  ;;  %2444 = vst [vmem:[#allocation8 + $0xb8] sm:$0xff] %v1880_v11  ;;  %v1645_v13 = vmul.f32 %v2922_v44, %v1581_v58  ;;  %v529_v15 = vpop.xlane.xlu1 %528  ;;  %v1451_v26 = vadd.f32 1e-06, %v1035_v12  ;;  %v1583_v44 = vmul.f32 %v4647_v0, %v4457_v61  ;;  %v1058_v11 = vand.u32 2147483648, %v4609_v30 }
 0x2f8   :  { %2508 = vst [vmem:[#allocation9 + $0xb8] sm:$0xff] %v2089_v59  ;;  %v214_v33 = vpop.xlane.xlu2 %213  ;;  %v1041_v38 = vmul.f32 %v2920_v24, %v1040_v19  ;;  %v4628_v2 = vmul.f32 0.007874016, %v529_v15  ;;  %v2373_v18 = vpop.f32.mrf.mxu3 }
 0x2f9   :  { %v2924_v32 = vpop.eup %2923  ;;  %v308_v39 = vmul.f32 %v3269_v28, %v214_v33  ;;  %v1712_v63 = vadd.f32 %v4397_v36, %v1645_v13  ;;  %2597 = vst [vmem:[#allocation11 + $0x180] sm:$0xff] %v2373_v18  ;;  %2925 = vrcp.f32 %v1451_v26 }
 0x2fa   :  { %v1049_v48 = vmul.f32 %v2924_v32, %v4609_v30  ;;  %v1042_v60 = vmul.f32 %v1041_v38, %v4586_v25  ;;  %2927 = vrsqrt.f32 %v4628_v2  ;;  %vm1067_vm5 = vcmp.eq.f32.partialorder %v4628_v2, inf }
 0x2fb   :  { %v4638_v50 = vsub.f32 %v4506_v53, %v308_v39  ;;  %1900 = vmatmul.f32.gmra.mxu0 %v1712_v63  ;;  %2109 = vmatmul.f32.gmra.mxu1 %v1712_v63  ;;  %vm1069_vm6 = vcmp.eq.f32.partialorder %v4628_v2, 0.0 }
 0x2fc   :  { %2318 = vmatmul.f32.gmra.mxu2 %v1712_v63  ;;  %v1044_v36 = vsel %vm1043_vm1, %v4586_v25, %v1042_v60  ;;  %v1050_v5 = vmul.f32 %v2924_v32, %v1049_v48 }
 0x2fd   :  { %v2298_v22 = vpop.f32.mrf.mxu2  ;;  %v436_v9 = vmul.f32 %v4638_v50, %v4638_v50  ;;  %225 = vadd.xlane.f32.xlu2 %v4633_v37  ;;  %v1047_v53 = vsel %vm1045_vm2, %v1046_v56, %v1044_v36  ;;  %v531_v46 = vpop.xlane.xlu0 %530  ;;  %v1070_v36 = vand.u32 2147483648, %v4628_v2 }
 0x2fe   :  { %2572 = vst [vmem:[#allocation11 + $0xb8] sm:$0xff] %v2298_v22  ;;  %v1452_v35 = vadd.f32 1e-06, %v1047_v53  ;;  %v1051_v49 = vmul.f32 0.5, %v1050_v5  ;;  %v4651_v31 = vmul.f32 0.007874016, %v531_v46 }
 0x2ff   :  { %540 = vadd.xlane.f32.xlu1 %v436_v9  ;;  %v2926_v24 = vpop.eup %2925  ;;  %v216_v25 = vpop.xlane.xlu1 %215 }
 0x300   :  { %v1883_v17 = vpop.f32.mrf.mxu0  ;;  %2929 = vrcp.f32 %v1452_v35  ;;  %v1052_v62 = vsub.f32 1.5, %v1051_v49  ;;  %v2928_v41 = vpop.eup %2927  ;;  %v309_v23 = vmul.f32 %v3269_v28, %v216_v25  ;;  %v1646_v45 = vmul.f32 %v2926_v24, %v1582_v10 }
 0x301   :  { %2445 = vst [vmem:[#allocation8 + $0xc0] sm:$0xff] %v1883_v17  ;;  %v2092_v20 = vpop.f32.mrf.mxu1  ;;  %v2376_v51 = vpop.f32.mrf.mxu3  ;;  %v1061_v34 = vmul.f32 %v2928_v41, %v4628_v2  ;;  %2931 = vrsqrt.f32 %v4651_v31  ;;  %v1584_v35 = vmul.f32 %v4647_v0, %v4485_v4  ;;  %vm1079_vm7 = vcmp.eq.f32.partialorder %v4651_v31, inf }
 0x302   :  { %2509 = vst [vmem:[#allocation9 + $0xc0] sm:$0xff] %v2092_v20  ;;  %v1053_v29 = vmul.f32 %v2924_v32, %v1052_v62  ;;  %v4657_v42 = vsub.f32 %v4531_v7, %v309_v23  ;;  %v1713_v8 = vadd.f32 %v4662_v21, %v1646_v45  ;;  %vm1081_vm8 = vcmp.eq.f32.partialorder %v4651_v31, 0.0 }
 0x303   :  { %2598 = vst [vmem:[#allocation11 + $0x188] sm:$0xff] %v2376_v51  ;;  %v1062_v3 = vmul.f32 %v2928_v41, %v1061_v34 }
 0x304   :  { %v1054_v58 = vmul.f32 %v1053_v29, %v4609_v30  ;;  %1903 = vmatmul.f32.gmra.mxu0 %v1713_v8  ;;  %2112 = vmatmul.f32.gmra.mxu1 %v1713_v8  ;;  %v437_v7 = vmul.f32 %v4657_v42, %v4657_v42  ;;  %v1585_v29 = vmul.f32 %v4647_v0, %v4503_v54 }
 0x305   :  { %2321 = vmatmul.f32.gmra.mxu2 %v1713_v8  ;;  %v1063_v19 = vmul.f32 0.5, %v1062_v3  ;;  %v218_v61 = vpop.xlane.xlu0 %217 }
 0x306   :  { %v2930_v59 = vpop.eup %2929  ;;  %v1056_v52 = vsel %vm1055_vm3, %v4609_v30, %v1054_v58  ;;  %542 = vadd.xlane.f32.xlu0 %v437_v7  ;;  %v310_v38 = vmul.f32 %v3269_v28, %v218_v61 }
 0x307   :  { %v2301_v13 = vpop.f32.mrf.mxu2  ;;  %227 = vadd.xlane.f32.xlu1 %v4665_v43  ;;  %v1647_v12 = vmul.f32 %v2930_v59, %v1583_v44  ;;  %v1059_v15 = vsel %vm1057_vm4, %v1058_v11, %v1056_v52  ;;  %v2932_v33 = vpop.eup %2931  ;;  %v1064_v39 = vsub.f32 1.5, %v1063_v19 }
 0x308   :  { %2573 = vst [vmem:[#allocation11 + $0xc0] sm:$0xff] %v2301_v13  ;;  %v1886_v26 = vpop.f32.mrf.mxu0  ;;  %v1453_v32 = vadd.f32 1e-06, %v1059_v15  ;;  %v1073_v18 = vmul.f32 %v2932_v33, %v4651_v31  ;;  %v4681_v60 = vsub.f32 %v4543_v1, %v310_v38 }
 0x309   :  { %2446 = vst [vmem:[#allocation8 + $0xc8] sm:$0xff] %v1886_v26  ;;  %v2095_v63 = vpop.f32.mrf.mxu1  ;;  %v2379_v30 = vpop.f32.mrf.mxu3  ;;  %v1714_v48 = vadd.f32 %v4662_v21, %v1647_v12  ;;  %v1065_v56 = vmul.f32 %v2928_v41, %v1064_v39 }
 0x30a   :  { %2510 = vst [vmem:[#allocation9 + $0xc8] sm:$0xff] %v2095_v63  ;;  %2933 = vrcp.f32 %v1453_v32  ;;  %v1074_v5 = vmul.f32 %v2932_v33, %v1073_v18  ;;  %v438_v22 = vmul.f32 %v4681_v60, %v4681_v60 }
 0x30b   :  { %2599 = vst [vmem:[#allocation11 + $0x190] sm:$0xff] %v2379_v30  ;;  %v1066_v9 = vmul.f32 %v1065_v56, %v4628_v2 }
 0x30c   :  { %1906 = vmatmul.f32.gmra.mxu0 %v1714_v48  ;;  %2115 = vmatmul.f32.gmra.mxu1 %v1714_v48  ;;  %v1075_v53 = vmul.f32 0.5, %v1074_v5 }
 0x30d   :  { %2324 = vmatmul.f32.gmra.mxu2 %v1714_v48  ;;  %544 = vadd.xlane.f32.xlu2 %v438_v22  ;;  %v1068_v1 = vsel %vm1067_vm5, %v4628_v2, %v1066_v9  ;;  %v1082_v2 = vand.u32 2147483648, %v4651_v31 }
 0x30e   :  { %v1071_v10 = vsel %vm1069_vm6, %v1070_v36, %v1068_v1  ;;  %v1076_v46 = vsub.f32 1.5, %v1075_v53 }
 0x30f   :  { %v2304_v49 = vpop.f32.mrf.mxu2  ;;  %v1454_v17 = vadd.f32 1e-06, %v1071_v10 }
 0x310   :  { %v2934_v24 = vpop.eup %2933  ;;  %2574 = vst [vmem:[#allocation11 + $0xc8] sm:$0xff] %v2304_v49  ;;  %v1889_v25 = vpop.f32.mrf.mxu0  ;;  %v1077_v20 = vmul.f32 %v2932_v33, %v1076_v46 }
 0x311   :  { %2447 = vst [vmem:[#allocation8 + $0xd0] sm:$0xff] %v1889_v25  ;;  %v2098_v62 = vpop.f32.mrf.mxu1  ;;  %v2382_v41 = vpop.f32.mrf.mxu3  ;;  %v1648_v23 = vmul.f32 %v2934_v24, %v1584_v35  ;;  %2935 = vrcp.f32 %v1454_v17 }
 0x312   :  { %2511 = vst [vmem:[#allocation9 + $0xd0] sm:$0xff] %v2098_v62  ;;  %v1078_v51 = vmul.f32 %v1077_v20, %v4651_v31 }
 0x313   :  { %2600 = vst [vmem:[#allocation11 + $0x198] sm:$0xff] %v2382_v41  ;;  %v1715_v4 = vadd.f32 %v4662_v21, %v1648_v23 }
 0x314   :  { %v1080_v45 = vsel %vm1079_vm7, %v4651_v31, %v1078_v51  ;;  %v1586_v31 = vmul.f32 %v4647_v0, %v4522_v14 }
 0x315   :  { %1909 = vmatmul.f32.gmra.mxu0 %v1715_v4  ;;  %2118 = vmatmul.f32.gmra.mxu1 %v1715_v4  ;;  %v1083_v34 = vsel %vm1081_vm8, %v1082_v2, %v1080_v45 }
 0x316   :  { %2327 = vmatmul.f32.gmra.mxu2 %v1715_v4  ;;  %v1455_v58 = vadd.f32 1e-06, %v1083_v34 }
 0x317   :  { %v2307_v8 = vpop.f32.mrf.mxu2  ;;  %v2936_v3 = vpop.eup %2935 }
 0x318   :  { %2575 = vst [vmem:[#allocation11 + $0xd0] sm:$0xff] %v2307_v8  ;;  %v1892_v44 = vpop.f32.mrf.mxu0  ;;  %v1649_v59 = vmul.f32 %v2936_v3, %v1585_v29  ;;  %2937 = vrcp.f32 %v1455_v58 }
 0x319   :  { %2448 = vst [vmem:[#allocation8 + $0xd8] sm:$0xff] %v1892_v44  ;;  %v2101_v7 = vpop.f32.mrf.mxu1  ;;  %v2385_v11 = vpop.f32.mrf.mxu3 }
 0x31a   :  { %2512 = vst [vmem:[#allocation9 + $0xd8] sm:$0xff] %v2101_v7  ;;  %v1716_v52 = vadd.f32 %v4662_v21, %v1649_v59 }
 0x31b   :  { %2601 = vst [vmem:[#allocation11 + $0x1a0] sm:$0xff] %v2385_v11 }
 0x31d   :  { %1912 = vmatmul.f32.gmra.mxu0 %v1716_v52  ;;  %2121 = vmatmul.f32.gmra.mxu1 %v1716_v52 }
 0x31e   :  { %2330 = vmatmul.f32.gmra.mxu2 %v1716_v52  ;;  %v2938_v54 = vpop.eup %2937 }
 0x31f   :  { %v2310_v19 = vpop.f32.mrf.mxu2  ;;  %v1650_v61 = vmul.f32 %v2938_v54, %v1586_v31 }
 0x320   :  { %2576 = vst [vmem:[#allocation11 + $0xd8] sm:$0xff] %v2310_v19  ;;  %v1895_v13 = vpop.f32.mrf.mxu0 }
 0x321   :  { %2449 = vst [vmem:[#allocation8 + $0xe0] sm:$0xff] %v1895_v13  ;;  %v2104_v12 = vpop.f32.mrf.mxu1  ;;  %v2388_v15 = vpop.f32.mrf.mxu3  ;;  %v1717_v33 = vadd.f32 %v4662_v21, %v1650_v61 }
 0x322   :  { %2513 = vst [vmem:[#allocation9 + $0xe0] sm:$0xff] %v2104_v12 }
 0x323   :  { %2602 = vst [vmem:[#allocation11 + $0x1a8] sm:$0xff] %v2388_v15 }
 0x325   :  { %1915 = vmatmul.f32.gmra.mxu0 %v1717_v33  ;;  %2124 = vmatmul.f32.gmra.mxu1 %v1717_v33 }
 0x326   :  { %2333 = vmatmul.f32.gmra.mxu2 %v1717_v33 }
 0x327   :  { %v2313_v26 = vpop.f32.mrf.mxu2 }
 0x328   :  { %2577 = vst [vmem:[#allocation11 + $0xe0] sm:$0xff] %v2313_v26 }
 0x329   :  { %v2391_v38 = vpop.f32.mrf.mxu3 }
 0x32a   :  { %2603 = vst [vmem:[#allocation11 + $0x1b0] sm:$0xff] %v2391_v38  ;;  %v1587_v38 = vmul.f32 %v4647_v0, %v4567_v57 }
 0x331   :  { %v2394_v14 = vpop.f32.mrf.mxu3 }
 0x332   :  { %2604 = vst [vmem:[#allocation11 + $0x1b8] sm:$0xff] %v2394_v14 }
 0x339   :  { %v2397_v32 = vpop.f32.mrf.mxu3 }
 0x33a   :  { %2605 = vst [vmem:[#allocation11 + $0x1c0] sm:$0xff] %v2397_v32 }
 0x341   :  { %v2400_v39 = vpop.f32.mrf.mxu3 }
 0x342   :  { %2606 = vst [vmem:[#allocation11 + $0x1c8] sm:$0xff] %v2400_v39 }
 0x349   :  { %v2403_v18 = vpop.f32.mrf.mxu3 }
 0x34a   :  { %2607 = vst [vmem:[#allocation11 + $0x1d0] sm:$0xff] %v2403_v18 }
 0x34f   :  { %v533_v63 = vpop.xlane.xlu2 %532 }
 0x350   :  { %v624_v30 = vmul.f32 0.007874016, %v533_v63 }
 0x351   :  { %v2406_v48 = vpop.f32.mrf.mxu3 }
 0x352   :  { %2608 = vst [vmem:[#allocation11 + $0x1d8] sm:$0xff] %v2406_v48  ;;  %2939 = vrsqrt.f32 %v624_v30  ;;  %vm1091_vm9 = vcmp.eq.f32.partialorder %v624_v30, inf  ;;  %v1094_v29 = vand.u32 2147483648, %v624_v30  ;;  %vm1093_vm10 = vcmp.eq.f32.partialorder %v624_v30, 0.0 }
 0x357   :  { %v220_v36 = vpop.xlane.xlu2 %219 }
 0x358   :  { %v535_v56 = vpop.xlane.xlu1 %534  ;;  %v2940_v5 = vpop.eup %2939  ;;  %v311_v9 = vmul.f32 %v3269_v28, %v220_v36 }
 0x359   :  { %v625_v22 = vmul.f32 0.007874016, %v535_v56  ;;  %v2409_v53 = vpop.f32.mrf.mxu3  ;;  %v1085_v1 = vmul.f32 %v2940_v5, %v624_v30 }
 0x35a   :  { %2609 = vst [vmem:[#allocation11 + $0x1e0] sm:$0xff] %v2409_v53  ;;  %v4706_v35 = vsub.f32 %v4579_v6, %v311_v9 }
 0x35b   :  { %2941 = vrsqrt.f32 %v625_v22  ;;  %v1086_v49 = vmul.f32 %v2940_v5, %v1085_v1  ;;  %vm1103_vm11 = vcmp.eq.f32.partialorder %v625_v22, inf  ;;  %v1106_v15 = vand.u32 2147483648, %v625_v22 }
 0x35c   :  { %v439_v10 = vmul.f32 %v4706_v35, %v4706_v35  ;;  %vm1105_vm12 = vcmp.eq.f32.partialorder %v625_v22, 0.0 }
 0x35d   :  { %v1087_v46 = vmul.f32 0.5, %v1086_v49 }
 0x35e   :  { %546 = vadd.xlane.f32.xlu0 %v439_v10 }
 0x35f   :  { %v1088_v25 = vsub.f32 1.5, %v1087_v46 }
 0x360   :  { %v222_v24 = vpop.xlane.xlu1 %221 }
 0x361   :  { %v2942_v17 = vpop.eup %2941  ;;  %v312_v62 = vmul.f32 %v3269_v28, %v222_v24  ;;  %v2412_v41 = vpop.f32.mrf.mxu3  ;;  %v1089_v2 = vmul.f32 %v2940_v5, %v1088_v25 }
 0x362   :  { %v1097_v23 = vmul.f32 %v2942_v17, %v625_v22  ;;  %v537_v20 = vpop.xlane.xlu0 %536  ;;  %2610 = vst [vmem:[#allocation11 + $0x1e8] sm:$0xff] %v2412_v41  ;;  %v1588_v41 = vmul.f32 %v4647_v0, %v4577_v27 }
 0x363   :  { %v4712_v4 = vsub.f32 %v4591_v55, %v312_v62  ;;  %v4714_v6 = vmul.f32 0.007874016, %v537_v20  ;;  %v1090_v51 = vmul.f32 %v1089_v2, %v624_v30 }
 0x364   :  { %v1098_v45 = vmul.f32 %v2942_v17, %v1097_v23 }
 0x365   :  { %2943 = vrsqrt.f32 %v4714_v6  ;;  %v440_v34 = vmul.f32 %v4712_v4, %v4712_v4  ;;  %v1092_v8 = vsel %vm1091_vm9, %v624_v30, %v1090_v51  ;;  %vm1115_vm13 = vcmp.eq.f32.partialorder %v4714_v6, inf }
 0x366   :  { %v1099_v58 = vmul.f32 0.5, %v1098_v45  ;;  %v1095_v3 = vsel %vm1093_vm10, %v1094_v29, %v1092_v8  ;;  %vm1117_vm14 = vcmp.eq.f32.partialorder %v4714_v6, 0.0 }
 0x367   :  { %548 = vadd.xlane.f32.xlu1 %v440_v34  ;;  %v1456_v7 = vadd.f32 1e-06, %v1095_v3 }
 0x368   :  { %v539_v44 = vpop.xlane.xlu2 %538  ;;  %v1100_v55 = vsub.f32 1.5, %v1099_v58 }
 0x369   :  { %v4719_v11 = vmul.f32 0.007874016, %v539_v44  ;;  %v2415_v59 = vpop.f32.mrf.mxu3  ;;  %2945 = vrcp.f32 %v1456_v7 }
 0x36a   :  { %v224_v52 = vpop.xlane.xlu0 %223  ;;  %2611 = vst [vmem:[#allocation11 + $0x1f0] sm:$0xff] %v2415_v59  ;;  %v1101_v31 = vmul.f32 %v2942_v17, %v1100_v55 }
 0x36b   :  { %v2944_v54 = vpop.eup %2943  ;;  %2947 = vrsqrt.f32 %v4719_v11  ;;  %v313_v19 = vmul.f32 %v3269_v28, %v224_v52  ;;  %vm1127_vm15 = vcmp.eq.f32.partialorder %v4719_v11, inf  ;;  %vm1129_vm0 = vcmp.eq.f32.partialorder %v4719_v11, 0.0 }
 0x36c   :  { %v1109_v13 = vmul.f32 %v2944_v54, %v4714_v6  ;;  %v1102_v61 = vmul.f32 %v1101_v31, %v625_v22 }
 0x36d   :  { %v4725_v12 = vsub.f32 %v4618_v40, %v313_v19 }
 0x36e   :  { %v1104_v33 = vsel %vm1103_vm11, %v625_v22, %v1102_v61  ;;  %v1110_v26 = vmul.f32 %v2944_v54, %v1109_v13 }
 0x36f   :  { %v441_v14 = vmul.f32 %v4725_v12, %v4725_v12  ;;  %v1107_v32 = vsel %vm1105_vm12, %v1106_v15, %v1104_v33  ;;  %v2946_v39 = vpop.eup %2945  ;;  %v1898_v18 = vpop.f32.mrf.mxu0 }
 0x370   :  { %v2107_v63 = vpop.f32.mrf.mxu1  ;;  %v1457_v30 = vadd.f32 1e-06, %v1107_v32  ;;  %v1111_v48 = vmul.f32 0.5, %v1110_v26  ;;  %2450 = vst [vmem:[#allocation8 + $0xe8] sm:$0xff] %v1898_v18  ;;  %v226_v40 = vpop.xlane.xlu2 %225  ;;  %v1651_v5 = vmul.f32 %v2946_v39, %v1587_v38  ;;  %v1589_v38 = vmul.f32 %v4647_v0, %v4595_v47 }
 0x371   :  { %v2948_v56 = vpop.eup %2947  ;;  %550 = vadd.xlane.f32.xlu2 %v441_v14  ;;  %v2418_v36 = vpop.f32.mrf.mxu3  ;;  %2514 = vst [vmem:[#allocation9 + $0xe8] sm:$0xff] %v2107_v63  ;;  %v314_v57 = vmul.f32 %v3269_v28, %v226_v40 }
 0x372   :  { %v1121_v22 = vmul.f32 %v2948_v56, %v4719_v11  ;;  %v541_v9 = vpop.xlane.xlu1 %540  ;;  %2949 = vrcp.f32 %v1457_v30  ;;  %v1112_v53 = vsub.f32 1.5, %v1111_v48  ;;  %2612 = vst [vmem:[#allocation11 + $0x1f8] sm:$0xff] %v2418_v36  ;;  %v1718_v49 = vadd.f32 %v4662_v21, %v1651_v5 }
 0x373   :  { %v4733_v1 = vmul.f32 0.007874016, %v541_v9  ;;  %v4737_v10 = vsub.f32 %v4633_v37, %v314_v57  ;;  %v1118_v37 = vand.u32 2147483648, %v4714_v6 }
 0x374   :  { %v1113_v46 = vmul.f32 %v2944_v54, %v1112_v53  ;;  %v1122_v24 = vmul.f32 %v2948_v56, %v1121_v22  ;;  %1918 = vmatmul.f32.gmra.mxu0 %v1718_v49  ;;  %2127 = vmatmul.f32.gmra.mxu1 %v1718_v49  ;;  %v1590_v22 = vmul.f32 %v4647_v0, %v4612_v16 }
 0x375   :  { %2951 = vrsqrt.f32 %v4733_v1  ;;  %2336 = vmatmul.f32.gmra.mxu2 %v1718_v49  ;;  %v442_v25 = vmul.f32 %v4737_v10, %v4737_v10  ;;  %vm1139_vm1 = vcmp.eq.f32.partialorder %v4733_v1, inf  ;;  %v1142_v9 = vand.u32 2147483648, %v4733_v1 }
 0x376   :  { %v1114_v17 = vmul.f32 %v1113_v46, %v4714_v6  ;;  %v1123_v62 = vmul.f32 0.5, %v1122_v24  ;;  %v2316_v23 = vpop.f32.mrf.mxu2  ;;  %vm1141_vm2 = vcmp.eq.f32.partialorder %v4733_v1, 0.0 }
 0x377   :  { %2578 = vst [vmem:[#allocation11 + $0xe8] sm:$0xff] %v2316_v23  ;;  %552 = vadd.xlane.f32.xlu0 %v442_v25 }
 0x378   :  { %v2950_v20 = vpop.eup %2949  ;;  %v1901_v2 = vpop.f32.mrf.mxu0  ;;  %v1116_v45 = vsel %vm1115_vm13, %v4714_v6, %v1114_v17  ;;  %v1124_v34 = vsub.f32 1.5, %v1123_v62 }
 0x379   :  { %v2110_v51 = vpop.f32.mrf.mxu1  ;;  %2451 = vst [vmem:[#allocation8 + $0xf0] sm:$0xff] %v1901_v2  ;;  %v1652_v29 = vmul.f32 %v2950_v20, %v1588_v41  ;;  %v1119_v8 = vsel %vm1117_vm14, %v1118_v37, %v1116_v45  ;;  %v543_v27 = vpop.xlane.xlu0 %542 }
 0x37a   :  { %v228_v58 = vpop.xlane.xlu1 %227  ;;  %2515 = vst [vmem:[#allocation9 + $0xf0] sm:$0xff] %v2110_v51  ;;  %v1458_v3 = vadd.f32 1e-06, %v1119_v8  ;;  %v1125_v44 = vmul.f32 %v2948_v56, %v1124_v34  ;;  %v4750_v59 = vmul.f32 0.007874016, %v543_v27  ;;  %v1591_v8 = vmul.f32 %v4647_v0, %v4638_v50 }
 0x37b   :  { %v2952_v7 = vpop.eup %2951  ;;  %v315_v55 = vmul.f32 %v3269_v28, %v228_v58  ;;  %v1719_v52 = vadd.f32 %v4662_v21, %v1652_v29  ;;  %v1130_v28 = vand.u32 2147483648, %v4719_v11 }
 0x37c   :  { %v1133_v31 = vmul.f32 %v2952_v7, %v4733_v1  ;;  %2953 = vrcp.f32 %v1458_v3  ;;  %v1126_v6 = vmul.f32 %v1125_v44, %v4719_v11  ;;  %vm1151_vm3 = vcmp.eq.f32.partialorder %v4750_v59, inf }
 0x37d   :  { %v4756_v54 = vsub.f32 %v4665_v43, %v315_v55  ;;  %2955 = vrsqrt.f32 %v4750_v59  ;;  %1921 = vmatmul.f32.gmra.mxu0 %v1719_v52  ;;  %2130 = vmatmul.f32.gmra.mxu1 %v1719_v52  ;;  %vm1153_vm4 = vcmp.eq.f32.partialorder %v4750_v59, 0.0 }
 0x37e   :  { %2339 = vmatmul.f32.gmra.mxu2 %v1719_v52  ;;  %v1128_v19 = vsel %vm1127_vm15, %v4719_v11, %v1126_v6  ;;  %v1134_v13 = vmul.f32 %v2952_v7, %v1133_v31 }
 0x37f   :  { %v2319_v61 = vpop.f32.mrf.mxu2  ;;  %v443_v15 = vmul.f32 %v4756_v54, %v4756_v54  ;;  %v1131_v43 = vsel %vm1129_vm0, %v1130_v28, %v1128_v19 }
 0x380   :  { %2579 = vst [vmem:[#allocation11 + $0xf0] sm:$0xff] %v2319_v61  ;;  %v1459_v33 = vadd.f32 1e-06, %v1131_v43  ;;  %v1135_v26 = vmul.f32 0.5, %v1134_v13  ;;  %v545_v14 = vpop.xlane.xlu2 %544  ;;  %v1592_v61 = vmul.f32 %v4647_v0, %v4657_v42 }
 0x381   :  { %554 = vadd.xlane.f32.xlu1 %v443_v15  ;;  %v1904_v39 = vpop.f32.mrf.mxu0  ;;  %v2113_v18 = vpop.f32.mrf.mxu1  ;;  %v4767_v63 = vmul.f32 0.007874016, %v545_v14 }
 0x382   :  { %v2954_v32 = vpop.eup %2953  ;;  %2957 = vrcp.f32 %v1459_v33  ;;  %v1136_v11 = vsub.f32 1.5, %v1135_v26  ;;  %2452 = vst [vmem:[#allocation8 + $0xf8] sm:$0xff] %v1904_v39  ;;  %v1593_v39 = vmul.f32 %v4647_v0, %v4681_v60 }
 0x383   :  { %v2956_v30 = vpop.eup %2955  ;;  %v1653_v48 = vmul.f32 %v2954_v32, %v1589_v38  ;;  %2516 = vst [vmem:[#allocation9 + $0xf8] sm:$0xff] %v2113_v18  ;;  %2959 = vrsqrt.f32 %v4767_v63  ;;  %vm1163_vm5 = vcmp.eq.f32.partialorder %v4767_v63, inf  ;;  %vm1165_vm6 = vcmp.eq.f32.partialorder %v4767_v63, 0.0 }
 0x384   :  { %v1145_v56 = vmul.f32 %v2956_v30, %v4750_v59  ;;  %v1137_v40 = vmul.f32 %v2952_v7, %v1136_v11 }
 0x385   :  { %v1720_v47 = vadd.f32 %v4662_v21, %v1653_v48 }
 0x386   :  { %v1138_v36 = vmul.f32 %v1137_v40, %v4733_v1  ;;  %v1146_v5 = vmul.f32 %v2956_v30, %v1145_v56 }
 0x387   :  { %1924 = vmatmul.f32.gmra.mxu0 %v1720_v47  ;;  %2133 = vmatmul.f32.gmra.mxu1 %v1720_v47 }
 0x388   :  { %v2958_v57 = vpop.eup %2957  ;;  %2342 = vmatmul.f32.gmra.mxu2 %v1720_v47  ;;  %v1140_v53 = vsel %vm1139_vm1, %v4733_v1, %v1138_v36  ;;  %v1147_v49 = vmul.f32 0.5, %v1146_v5  ;;  %v2322_v46 = vpop.f32.mrf.mxu2  ;;  %v1154_v1 = vand.u32 2147483648, %v4750_v59 }
 0x389   :  { %v1654_v24 = vmul.f32 %v2958_v57, %v1590_v22  ;;  %v1143_v25 = vsel %vm1141_vm2, %v1142_v9, %v1140_v53  ;;  %v2960_v17 = vpop.eup %2959  ;;  %2580 = vst [vmem:[#allocation11 + $0xf8] sm:$0xff] %v2322_v46  ;;  %v1907_v62 = vpop.f32.mrf.mxu0 }
 0x38a   :  { %v2116_v16 = vpop.f32.mrf.mxu1  ;;  %v1460_v41 = vadd.f32 1e-06, %v1143_v25  ;;  %v1148_v23 = vsub.f32 1.5, %v1147_v49  ;;  %v1157_v37 = vmul.f32 %v2960_v17, %v4767_v63  ;;  %2453 = vst [vmem:[#allocation8 + $0x100] sm:$0xff] %v1907_v62 }
 0x38b   :  { %v1721_v20 = vadd.f32 %v4662_v21, %v1654_v24  ;;  %2517 = vst [vmem:[#allocation9 + $0x100] sm:$0xff] %v2116_v16 }
 0x38c   :  { %2961 = vrcp.f32 %v1460_v41  ;;  %v1149_v2 = vmul.f32 %v2956_v30, %v1148_v23  ;;  %v1158_v51 = vmul.f32 %v2960_v17, %v1157_v37 }
 0x38e   :  { %v1150_v45 = vmul.f32 %v1149_v2, %v4750_v59  ;;  %v1159_v34 = vmul.f32 0.5, %v1158_v51 }
 0x38f   :  { %1927 = vmatmul.f32.gmra.mxu0 %v1721_v20  ;;  %2136 = vmatmul.f32.gmra.mxu1 %v1721_v20 }
 0x390   :  { %2345 = vmatmul.f32.gmra.mxu2 %v1721_v20  ;;  %v1152_v29 = vsel %vm1151_vm3, %v4750_v59, %v1150_v45  ;;  %v2325_v58 = vpop.f32.mrf.mxu2  ;;  %v1160_v3 = vsub.f32 1.5, %v1159_v34  ;;  %v1166_v59 = vand.u32 2147483648, %v4767_v63 }
 0x391   :  { %v1155_v27 = vsel %vm1153_vm4, %v1154_v1, %v1152_v29  ;;  %2581 = vst [vmem:[#allocation11 + $0x100] sm:$0xff] %v2325_v58 }
 0x392   :  { %v2962_v44 = vpop.eup %2961  ;;  %v1910_v7 = vpop.f32.mrf.mxu0  ;;  %v1461_v52 = vadd.f32 1e-06, %v1155_v27  ;;  %v1161_v6 = vmul.f32 %v2960_v17, %v1160_v3 }
 0x393   :  { %v2119_v55 = vpop.f32.mrf.mxu1  ;;  %2454 = vst [vmem:[#allocation8 + $0x108] sm:$0xff] %v1910_v7  ;;  %v1655_v31 = vmul.f32 %v2962_v44, %v1591_v8  ;;  %v1594_v7 = vmul.f32 %v4647_v0, %v4706_v35 }
 0x394   :  { %2518 = vst [vmem:[#allocation9 + $0x108] sm:$0xff] %v2119_v55  ;;  %2963 = vrcp.f32 %v1461_v52  ;;  %v1162_v50 = vmul.f32 %v1161_v6, %v4767_v63 }
 0x395   :  { %v1722_v28 = vadd.f32 %v4662_v21, %v1655_v31 }
 0x396   :  { %v1164_v19 = vsel %vm1163_vm5, %v4767_v63, %v1162_v50 }
 0x397   :  { %1930 = vmatmul.f32.gmra.mxu0 %v1722_v28  ;;  %2139 = vmatmul.f32.gmra.mxu1 %v1722_v28  ;;  %v1167_v13 = vsel %vm1165_vm6, %v1166_v59, %v1164_v19 }
 0x398   :  { %2348 = vmatmul.f32.gmra.mxu2 %v1722_v28  ;;  %v1462_v43 = vadd.f32 1e-06, %v1167_v13 }
 0x399   :  { %v2328_v15 = vpop.f32.mrf.mxu2 }
 0x39a   :  { %v2964_v33 = vpop.eup %2963  ;;  %2582 = vst [vmem:[#allocation11 + $0x108] sm:$0xff] %v2328_v15  ;;  %v1913_v26 = vpop.f32.mrf.mxu0  ;;  %2965 = vrcp.f32 %v1462_v43 }
 0x39b   :  { %v2122_v38 = vpop.f32.mrf.mxu1  ;;  %2455 = vst [vmem:[#allocation8 + $0x110] sm:$0xff] %v1913_v26  ;;  %v1656_v14 = vmul.f32 %v2964_v33, %v1592_v61 }
 0x39c   :  { %2519 = vst [vmem:[#allocation9 + $0x110] sm:$0xff] %v2122_v38 }
 0x39d   :  { %v1723_v32 = vadd.f32 %v4662_v21, %v1656_v14  ;;  %v1595_v14 = vmul.f32 %v4647_v0, %v4712_v4 }
 0x39f   :  { %1933 = vmatmul.f32.gmra.mxu0 %v1723_v32  ;;  %2142 = vmatmul.f32.gmra.mxu1 %v1723_v32 }
 0x3a0   :  { %2351 = vmatmul.f32.gmra.mxu2 %v1723_v32  ;;  %v2966_v18 = vpop.eup %2965 }
 0x3a1   :  { %v2331_v42 = vpop.f32.mrf.mxu2  ;;  %v1657_v30 = vmul.f32 %v2966_v18, %v1593_v39 }
 0x3a2   :  { %2583 = vst [vmem:[#allocation11 + $0x110] sm:$0xff] %v2331_v42  ;;  %v1916_v63 = vpop.f32.mrf.mxu0 }
 0x3a3   :  { %v2125_v11 = vpop.f32.mrf.mxu1  ;;  %2456 = vst [vmem:[#allocation8 + $0x118] sm:$0xff] %v1916_v63  ;;  %v1724_v48 = vadd.f32 %v4662_v21, %v1657_v30 }
 0x3a4   :  { %2520 = vst [vmem:[#allocation9 + $0x118] sm:$0xff] %v2125_v11 }
 0x3a7   :  { %1936 = vmatmul.f32.gmra.mxu0 %v1724_v48  ;;  %2145 = vmatmul.f32.gmra.mxu1 %v1724_v48 }
 0x3a8   :  { %2354 = vmatmul.f32.gmra.mxu2 %v1724_v48 }
 0x3a9   :  { %v2334_v56 = vpop.f32.mrf.mxu2 }
 0x3aa   :  { %2584 = vst [vmem:[#allocation11 + $0x118] sm:$0xff] %v2334_v56 }
 0x3d1   :  { %v547_v40 = vpop.xlane.xlu0 %546 }
 0x3d2   :  { %v631_v47 = vmul.f32 0.007874016, %v547_v40 }
 0x3d4   :  { %2967 = vrsqrt.f32 %v631_v47  ;;  %vm1175_vm7 = vcmp.eq.f32.partialorder %v631_v47, inf  ;;  %v1178_v41 = vand.u32 2147483648, %v631_v47  ;;  %vm1177_vm8 = vcmp.eq.f32.partialorder %v631_v47, 0.0 }
 0x3da   :  { %v549_v60 = vpop.xlane.xlu1 %548  ;;  %v2968_v36 = vpop.eup %2967 }
 0x3db   :  { %v632_v5 = vmul.f32 0.007874016, %v549_v60  ;;  %v1169_v22 = vmul.f32 %v2968_v36, %v631_v47 }
 0x3dd   :  { %2969 = vrsqrt.f32 %v632_v5  ;;  %v1170_v9 = vmul.f32 %v2968_v36, %v1169_v22  ;;  %vm1187_vm9 = vcmp.eq.f32.partialorder %v632_v5, inf  ;;  %v1190_v27 = vand.u32 2147483648, %v632_v5 }
 0x3de   :  { %vm1189_vm10 = vcmp.eq.f32.partialorder %v632_v5, 0.0 }
 0x3df   :  { %v1171_v57 = vmul.f32 0.5, %v1170_v9 }
 0x3e1   :  { %v1172_v53 = vsub.f32 1.5, %v1171_v57 }
 0x3e3   :  { %v2970_v49 = vpop.eup %2969  ;;  %v1173_v25 = vmul.f32 %v2968_v36, %v1172_v53 }
 0x3e4   :  { %v1181_v46 = vmul.f32 %v2970_v49, %v632_v5  ;;  %v551_v24 = vpop.xlane.xlu2 %550 }
 0x3e5   :  { %v4800_v17 = vmul.f32 0.007874016, %v551_v24  ;;  %v1174_v62 = vmul.f32 %v1173_v25, %v631_v47  ;;  %v1596_v25 = vmul.f32 %v4647_v0, %v4725_v12 }
 0x3e6   :  { %v1182_v16 = vmul.f32 %v2970_v49, %v1181_v46 }
 0x3e7   :  { %2971 = vrsqrt.f32 %v4800_v17  ;;  %v1176_v23 = vsel %vm1175_vm7, %v631_v47, %v1174_v62  ;;  %vm1199_vm11 = vcmp.eq.f32.partialorder %v4800_v17, inf  ;;  %v1202_v39 = vand.u32 2147483648, %v4800_v17 }
 0x3e8   :  { %v1183_v37 = vmul.f32 0.5, %v1182_v16  ;;  %v1179_v20 = vsel %vm1177_vm8, %v1178_v41, %v1176_v23  ;;  %vm1201_vm12 = vcmp.eq.f32.partialorder %v4800_v17, 0.0 }
 0x3e9   :  { %v1463_v2 = vadd.f32 1e-06, %v1179_v20 }
 0x3ea   :  { %v1184_v1 = vsub.f32 1.5, %v1183_v37  ;;  %v553_v51 = vpop.xlane.xlu0 %552 }
 0x3eb   :  { %v4803_v45 = vmul.f32 0.007874016, %v553_v51  ;;  %2973 = vrcp.f32 %v1463_v2  ;;  %v1597_v51 = vmul.f32 %v4647_v0, %v4737_v10  ;;  %v3001_v0 = vld [vmem:[#allocation5] ss:$0 sm:$0xff] }
 0x3ec   :  { %v1185_v34 = vmul.f32 %v2970_v49, %v1184_v1  ;;  %v1598_v10 = vmul.f32 %v3001_v0, %v4756_v54 }
 0x3ed   :  { %v2972_v29 = vpop.eup %2971  ;;  %2975 = vrsqrt.f32 %v4803_v45  ;;  %vm1211_vm13 = vcmp.eq.f32.partialorder %v4803_v45, inf  ;;  %v1214_v9 = vand.u32 2147483648, %v4803_v45  ;;  %vm1213_vm14 = vcmp.eq.f32.partialorder %v4803_v45, 0.0 }
 0x3ee   :  { %v1193_v8 = vmul.f32 %v2972_v29, %v4800_v17  ;;  %v1186_v58 = vmul.f32 %v1185_v34, %v632_v5 }
 0x3f0   :  { %v1188_v3 = vsel %vm1187_vm9, %v632_v5, %v1186_v58  ;;  %v1194_v44 = vmul.f32 %v2972_v29, %v1193_v8 }
 0x3f1   :  { %v1191_v55 = vsel %vm1189_vm10, %v1190_v27, %v1188_v3  ;;  %v2974_v52 = vpop.eup %2973  ;;  %v1919_v31 = vpop.f32.mrf.mxu0 }
 0x3f2   :  { %v2128_v6 = vpop.f32.mrf.mxu1  ;;  %v1464_v59 = vadd.f32 1e-06, %v1191_v55  ;;  %v1195_v28 = vmul.f32 0.5, %v1194_v44  ;;  %2457 = vst [vmem:[#allocation8 + $0x120] sm:$0xff] %v1919_v31  ;;  %v1658_v50 = vmul.f32 %v2974_v52, %v1594_v7 }
 0x3f3   :  { %v2976_v19 = vpop.eup %2975  ;;  %2521 = vst [vmem:[#allocation9 + $0x120] sm:$0xff] %v2128_v6 }
 0x3f4   :  { %v555_v13 = vpop.xlane.xlu1 %554  ;;  %2977 = vrcp.f32 %v1464_v59  ;;  %v1196_v61 = vsub.f32 1.5, %v1195_v28  ;;  %v1205_v15 = vmul.f32 %v2976_v19, %v4803_v45  ;;  %v1725_v33 = vadd.f32 %v4662_v21, %v1658_v50 }
 0x3f5   :  { %v4810_v43 = vmul.f32 0.007874016, %v555_v13 }
 0x3f6   :  { %v1197_v35 = vmul.f32 %v2972_v29, %v1196_v61  ;;  %1939 = vmatmul.f32.gmra.mxu0 %v1725_v33  ;;  %2148 = vmatmul.f32.gmra.mxu1 %v1725_v33  ;;  %v1206_v26 = vmul.f32 %v2976_v19, %v1205_v15 }
 0x3f7   :  { %2979 = vrsqrt.f32 %v4810_v43  ;;  %2357 = vmatmul.f32.gmra.mxu2 %v1725_v33  ;;  %vm1223_vm15 = vcmp.eq.f32.partialorder %v4810_v43, inf  ;;  %v1226_v12 = vand.u32 2147483648, %v4810_v43  ;;  %vm1225_vm0 = vcmp.eq.f32.partialorder %v4810_v43, 0.0 }
 0x3f8   :  { %v1198_v38 = vmul.f32 %v1197_v35, %v4800_v17  ;;  %v2337_v32 = vpop.f32.mrf.mxu2  ;;  %v1207_v18 = vmul.f32 0.5, %v1206_v26 }
 0x3f9   :  { %2585 = vst [vmem:[#allocation11 + $0x120] sm:$0xff] %v2337_v32 }
 0x3fa   :  { %v2978_v42 = vpop.eup %2977  ;;  %v1922_v63 = vpop.f32.mrf.mxu0  ;;  %v1200_v30 = vsel %vm1199_vm11, %v4800_v17, %v1198_v38  ;;  %v1208_v40 = vsub.f32 1.5, %v1207_v18 }
 0x3fb   :  { %v2131_v11 = vpop.f32.mrf.mxu1  ;;  %2458 = vst [vmem:[#allocation8 + $0x128] sm:$0xff] %v1922_v63  ;;  %v1659_v48 = vmul.f32 %v2978_v42, %v1595_v14  ;;  %v1203_v56 = vsel %vm1201_vm12, %v1202_v39, %v1200_v30 }
 0x3fc   :  { %2522 = vst [vmem:[#allocation9 + $0x128] sm:$0xff] %v2131_v11  ;;  %v1465_v4 = vadd.f32 1e-06, %v1203_v56  ;;  %v1209_v36 = vmul.f32 %v2976_v19, %v1208_v40 }
 0x3fd   :  { %v2980_v47 = vpop.eup %2979  ;;  %v1726_v60 = vadd.f32 %v4662_v21, %v1659_v48 }
 0x3fe   :  { %v1217_v5 = vmul.f32 %v2980_v47, %v4810_v43  ;;  %2981 = vrcp.f32 %v1465_v4  ;;  %v1210_v22 = vmul.f32 %v1209_v36, %v4803_v45 }
 0x3ff   :  { %1942 = vmatmul.f32.gmra.mxu0 %v1726_v60  ;;  %2151 = vmatmul.f32.gmra.mxu1 %v1726_v60 }
 0x400   :  { %2360 = vmatmul.f32.gmra.mxu2 %v1726_v60  ;;  %v1218_v57 = vmul.f32 %v2980_v47, %v1217_v5  ;;  %v1212_v49 = vsel %vm1211_vm13, %v4803_v45, %v1210_v22 }
 0x401   :  { %v2340_v53 = vpop.f32.mrf.mxu2  ;;  %v1215_v46 = vsel %vm1213_vm14, %v1214_v9, %v1212_v49 }
 0x402   :  { %2586 = vst [vmem:[#allocation11 + $0x128] sm:$0xff] %v2340_v53  ;;  %v1219_v24 = vmul.f32 0.5, %v1218_v57  ;;  %v1466_v17 = vadd.f32 1e-06, %v1215_v46 }
 0x404   :  { %v2982_v62 = vpop.eup %2981  ;;  %v1925_v16 = vpop.f32.mrf.mxu0  ;;  %v1220_v23 = vsub.f32 1.5, %v1219_v24  ;;  %2983 = vrcp.f32 %v1466_v17 }
 0x405   :  { %v2134_v41 = vpop.f32.mrf.mxu1  ;;  %2459 = vst [vmem:[#allocation8 + $0x130] sm:$0xff] %v1925_v16  ;;  %v1660_v37 = vmul.f32 %v2982_v62, %v1596_v25 }
 0x406   :  { %2523 = vst [vmem:[#allocation9 + $0x130] sm:$0xff] %v2134_v41  ;;  %v1221_v20 = vmul.f32 %v2980_v47, %v1220_v23 }
 0x407   :  { %v1727_v2 = vadd.f32 %v4662_v21, %v1660_v37 }
 0x408   :  { %v1222_v1 = vmul.f32 %v1221_v20, %v4810_v43 }
 0x409   :  { %1945 = vmatmul.f32.gmra.mxu0 %v1727_v2  ;;  %2154 = vmatmul.f32.gmra.mxu1 %v1727_v2 }
 0x40a   :  { %2363 = vmatmul.f32.gmra.mxu2 %v1727_v2  ;;  %v1224_v45 = vsel %vm1223_vm15, %v4810_v43, %v1222_v1  ;;  %v2984_v34 = vpop.eup %2983 }
 0x40b   :  { %v2343_v29 = vpop.f32.mrf.mxu2  ;;  %v1227_v8 = vsel %vm1225_vm0, %v1226_v12, %v1224_v45  ;;  %v1661_v3 = vmul.f32 %v2984_v34, %v1597_v51 }
 0x40c   :  { %2587 = vst [vmem:[#allocation11 + $0x130] sm:$0xff] %v2343_v29  ;;  %v1928_v58 = vpop.f32.mrf.mxu0  ;;  %v1467_v44 = vadd.f32 1e-06, %v1227_v8 }
 0x40d   :  { %v2137_v27 = vpop.f32.mrf.mxu1  ;;  %2460 = vst [vmem:[#allocation8 + $0x138] sm:$0xff] %v1928_v58  ;;  %v1728_v7 = vadd.f32 %v4662_v21, %v1661_v3 }
 0x40e   :  { %2524 = vst [vmem:[#allocation9 + $0x138] sm:$0xff] %v2137_v27  ;;  %2985 = vrcp.f32 %v1467_v44 }
 0x411   :  { %1948 = vmatmul.f32.gmra.mxu0 %v1728_v7  ;;  %2157 = vmatmul.f32.gmra.mxu1 %v1728_v7 }
 0x412   :  { %2366 = vmatmul.f32.gmra.mxu2 %v1728_v7 }
 0x413   :  { %v2346_v55 = vpop.f32.mrf.mxu2 }
 0x414   :  { %v2986_v52 = vpop.eup %2985  ;;  %2588 = vst [vmem:[#allocation11 + $0x138] sm:$0xff] %v2346_v55  ;;  %v1931_v31 = vpop.f32.mrf.mxu0 }
 0x415   :  { %v2140_v6 = vpop.f32.mrf.mxu1  ;;  %2461 = vst [vmem:[#allocation8 + $0x140] sm:$0xff] %v1931_v31  ;;  %v1662_v59 = vmul.f32 %v2986_v52, %v1598_v10 }
 0x416   :  { %2525 = vst [vmem:[#allocation9 + $0x140] sm:$0xff] %v2140_v6 }
 0x417   :  { %v1729_v28 = vadd.f32 %v4662_v21, %v1662_v59 }
 0x419   :  { %1951 = vmatmul.f32.gmra.mxu0 %v1729_v28  ;;  %2160 = vmatmul.f32.gmra.mxu1 %v1729_v28 }
 0x41a   :  { %2369 = vmatmul.f32.gmra.mxu2 %v1729_v28 }
 0x41b   :  { %v2349_v50 = vpop.f32.mrf.mxu2 }
 0x41c   :  { %2589 = vst [vmem:[#allocation11 + $0x140] sm:$0xff] %v2349_v50  ;;  %v1934_v19 = vpop.f32.mrf.mxu0 }
 0x41d   :  { %v2143_v13 = vpop.f32.mrf.mxu1  ;;  %2462 = vst [vmem:[#allocation8 + $0x148] sm:$0xff] %v1934_v19 }
 0x41e   :  { %2526 = vst [vmem:[#allocation9 + $0x148] sm:$0xff] %v2143_v13 }
 0x423   :  { %v2352_v54 = vpop.f32.mrf.mxu2 }
 0x424   :  { %2590 = vst [vmem:[#allocation11 + $0x148] sm:$0xff] %v2352_v54  ;;  %v1937_v61 = vpop.f32.mrf.mxu0 }
 0x425   :  { %v2146_v15 = vpop.f32.mrf.mxu1  ;;  %2463 = vst [vmem:[#allocation8 + $0x150] sm:$0xff] %v1937_v61 }
 0x426   :  { %2527 = vst [vmem:[#allocation9 + $0x150] sm:$0xff] %v2146_v15 }
 0x42b   :  { %v2355_v43 = vpop.f32.mrf.mxu2 }
 0x42c   :  { %2591 = vst [vmem:[#allocation11 + $0x150] sm:$0xff] %v2355_v43 }
 0x473   :  { %v1940_v33 = vpop.f32.mrf.mxu0  ;;  %v2149_v35 = vpop.f32.mrf.mxu1 }
 0x474   :  { %2464 = vst [vmem:[#allocation8 + $0x158] sm:$0xff] %v1940_v33 }
 0x475   :  { %2528 = vst [vmem:[#allocation9 + $0x158] sm:$0xff] %v2149_v35 }
 0x47a   :  { %v2358_v21 = vpop.f32.mrf.mxu2 }
 0x47b   :  { %2592 = vst [vmem:[#allocation11 + $0x158] sm:$0xff] %v2358_v21 }
 0x47c   :  { %v1943_v26 = vpop.f32.mrf.mxu0  ;;  %v2152_v38 = vpop.f32.mrf.mxu1 }
 0x47d   :  { %2465 = vst [vmem:[#allocation8 + $0x160] sm:$0xff] %v1943_v26 }
 0x47e   :  { %2529 = vst [vmem:[#allocation9 + $0x160] sm:$0xff] %v2152_v38 }
 0x483   :  { %v2361_v14 = vpop.f32.mrf.mxu2 }
 0x484   :  { %2593 = vst [vmem:[#allocation11 + $0x160] sm:$0xff] %v2361_v14 }
 0x486   :  { %v1946_v32 = vpop.f32.mrf.mxu0  ;;  %v2155_v39 = vpop.f32.mrf.mxu1 }
 0x487   :  { %2466 = vst [vmem:[#allocation8 + $0x168] sm:$0xff] %v1946_v32 }
 0x488   :  { %2530 = vst [vmem:[#allocation9 + $0x168] sm:$0xff] %v2155_v39 }
 0x48d   :  { %v2364_v18 = vpop.f32.mrf.mxu2 }
 0x48e   :  { %2594 = vst [vmem:[#allocation11 + $0x168] sm:$0xff] %v2364_v18  ;;  %v1949_v42 = vpop.f32.mrf.mxu0  ;;  %v2158_v63 = vpop.f32.mrf.mxu1 }
 0x48f   :  { %2467 = vst [vmem:[#allocation8 + $0x170] sm:$0xff] %v1949_v42 }
 0x490   :  { %2531 = vst [vmem:[#allocation9 + $0x170] sm:$0xff] %v2158_v63 }
 0x495   :  { %v2367_v11 = vpop.f32.mrf.mxu2 }
 0x496   :  { %2595 = vst [vmem:[#allocation11 + $0x170] sm:$0xff] %v2367_v11  ;;  %v1952_v30 = vpop.f32.mrf.mxu0  ;;  %v2161_v48 = vpop.f32.mrf.mxu1 }
 0x497   :  { %2468 = vst [vmem:[#allocation8 + $0x178] sm:$0xff] %v1952_v30 }
 0x498   :  { %2532 = vst [vmem:[#allocation9 + $0x178] sm:$0xff] %v2161_v48  ;;  %2625 = dma.vmem_to_hbm [thread:$0]  %s2618_s21, 8192, %s2620_s24, [#allocation4], %s3156_s7, %s3156_s7, %s3157_s8  }
 0x499   :  { %2638 = dma.vmem_to_hbm [thread:$0]  %s2631_s26, 8192, %s2633_s29, [#allocation10], %s3156_s7, %s3156_s7, %s3157_s8  }
 0x49d   :  { %v2370_v56 = vpop.f32.mrf.mxu2 }
 0x49e   :  { %2596 = vst [vmem:[#allocation11 + $0x178] sm:$0xff] %v2370_v56 }
 0x49f   :  { %2651 = dma.vmem_to_hbm [thread:$0]  %s2644_s1, 8192, %s2646_s4, [#allocation10], %s3156_s7, %s3156_s7, %s3157_s8  }
 0x4a0   :  { %3150 = dma.done.wait [#allocation4], 8192  }
 0x4a1   :  { %3151 = vsyncadd [#allocation4], 4294959104 }
 0x4a2   :  { %3152 = dma.done.wait [#allocation10], 16384  }
 0x4a3   :  { %3153 = vsyncadd [#allocation10], 4294950912 }
 0x4a4   :  { %2664 = vsyncpa [#allocation3], 1 }
 0x4a5   :  { %2665 = vsyncpa [#allocation6], 1 }
 0x4a6   :  { %2666 = vsyncpa [#allocation4], 1 }
 0x4a7   :  { %2667 = vsyncpa [#allocation10], 1 }

</bundles_post_ra>
